<compile_context>
chip_gen: v5e
topology: v5e:2x2
jax: 0.10.0
libtpu: 0.0.40
codegen_flags: <defaults>
</compile_context>

<pallas_src>
import functools

import jax
import jax.numpy as jnp
from jax.experimental import pallas as pl
from jax.experimental.pallas import tpu as pltpu

_BN_EPS = 1e-5


def _round_up(x, m):
    return (x + m - 1) // m * m


def _make_resblk_kernel(*, n, ho, wo, wp, s2c, cp, kq, qc, has_projection):
    """Fused ResBlk: conv1+BN1+ReLU -> conv2+BN2, + (1x1 conv [+BN] | identity)."""
    m = n * ho * wo
    inv_m = 1.0 / m

    def bn_apply(y, g_row, b_row):
        # Batch-stat BN (PyTorch training mode), one pass: sum & sum-of-squares.
        # TODO(synk): switch to a shifted/two-pass variance when tiling M (the
        # E[x^2]-E[x]^2 form can cancel catastrophically at production scale).
        s1 = jnp.sum(y, axis=0, keepdims=True)
        s2 = jnp.sum(y * y, axis=0, keepdims=True)
        mean = s1 * inv_m
        var = jnp.maximum(s2 * inv_m - mean * mean, 0.0)
        return (y - mean) * jax.lax.rsqrt(var + _BN_EPS) * g_row + b_row

    def kernel(x_ref, w1_ref, w2_ref, ws_ref, bn_ref, out_ref, y1p_ref):
        # ---- conv1: Kq x Kq taps, each a full-lane-dim slice, K = s^2*Cin ----
        acc1 = jnp.zeros((m, cp), jnp.float32)
        for q0 in range(kq):
            for r0 in range(kq):
                tap = x_ref[:, q0:q0 + ho, r0:r0 + wo, :].reshape(m, s2c)
                acc1 = acc1 + jnp.dot(tap, w1_ref[q0 * kq + r0],
                                      preferred_element_type=jnp.float32)
        y1 = jnp.maximum(bn_apply(acc1, bn_ref[0:1, :], bn_ref[1:2, :]), 0.0)
        y1_bf = y1.astype(jnp.bfloat16)   # bf16 only as an MXU operand

        # ---- stage y1: zero the 1-pixel halo, single vectorized interior store ----
        zrow = jnp.zeros((n, 1, wp, cp), jnp.bfloat16)
        zcol = jnp.zeros((n, ho, 1, cp), jnp.bfloat16)
        y1p_ref[:, 0:1, :, :] = zrow                       # top halo row
        y1p_ref[:, 1 + ho:2 + ho, :, :] = zrow             # bottom halo row
        y1p_ref[:, 1:1 + ho, 0:1, :] = zcol                # left halo col
        y1p_ref[:, 1:1 + ho, 1 + wo:2 + wo, :] = zcol      # right halo col
        y1p_ref[:, 1:1 + ho, 1:1 + wo, :] = y1_bf.reshape(n, ho, wo, cp)

        # ---- conv2 (3x3, stride 1): 9 taps concatenated along K (128-aligned),
        #      one MXU dot against the stacked (9*Cp, Cp) weight ----
        taps = [y1p_ref[:, kh:kh + ho, kw:kw + wo, :].reshape(m, cp)
                for kh in range(3) for kw in range(3)]
        lhs2 = jnp.concatenate(taps, axis=-1)              # (m, 9*cp), lane-aligned
        acc2 = jnp.dot(lhs2, w2_ref[...], preferred_element_type=jnp.float32)
        y2 = bn_apply(acc2, bn_ref[2:3, :], bn_ref[3:4, :])

        # ---- shortcut: always one dot (projection weight or embedded identity),
        #      phase/centre selection folded into the weight -> no lane slicing ----
        xc = x_ref[:, qc:qc + ho, qc:qc + wo, :].reshape(m, s2c)
        sc = jnp.dot(xc, ws_ref[...], preferred_element_type=jnp.float32)
        if has_projection:
            res = bn_apply(sc, bn_ref[4:5, :], bn_ref[5:6, :])
        else:
            res = sc                                        # identity (ch_in==ch_out, stride 1)

        out_ref[...] = (y2 + res).astype(out_ref.dtype)

    return kernel


def resblk_forward(x_nhwc, params, stride):
    """Forward pass matching PyTorch ResBlk.forward (NHWC in, NHWC out)."""
    (w1, _b1, g1, be1), (w2, _b2, g2, be2), shortcut = params
    N, H, W, Cin = x_nhwc.shape
    Cout = w1.shape[-1]
    assert stride in (1, 2), "ResNet blocks use stride 1 or 2"

    Cp = _round_up(Cout, 128)          # lane-dense output channels
    Cin_p = _round_up(Cin, 8)          # sublane-aligned input channels
    s2c = stride * stride * Cin_p      # conv1 contraction width (phases packed in lanes)
    Kq = -(-3 // stride)               # ceil(3/stride): conv1 taps per spatial axis
    Ho = (H - 1) // stride + 1
    Wo = (W - 1) // stride + 1
    Hq = Ho + Kq - 1
    Wq = Wo + Kq - 1
    Wp = _round_up(Wo + 2, 8)          # aligned scratch width (8,128) tiles
    M = N * Ho * Wo

    if shortcut is None:
        assert stride == 1 and Cin == Cout, "identity shortcut needs stride=1, ch_in==ch_out"

    # --- layout plumbing (no data inflation): pad + space-to-depth so every
    #     conv1/shortcut tap is a full-last-dim static slice in the kernel ---
    pad_h = stride * Hq - (H + 2)
    pad_w = stride * Wq - (W + 2)
    xp = jnp.pad(x_nhwc, ((0, 0), (1, 1 + pad_h), (1, 1 + pad_w), (0, Cin_p - Cin)))
    xs2d = (xp.reshape(N, Hq, stride, Wq, stride, Cin_p)
              .transpose(0, 1, 3, 2, 4, 5)
              .reshape(N, Hq, Wq, s2c)).astype(jnp.bfloat16)

    # --- conv1 weights folded over stride phases: (Kq*Kq, s2c, Cp) ---
    w1f = jnp.zeros((Kq * Kq, s2c, Cp), jnp.float32)
    for q0 in range(Kq):
        for r0 in range(Kq):
            for ph_h in range(stride):
                for ph_w in range(stride):
                    kh, kw = stride * q0 + ph_h, stride * r0 + ph_w
                    if kh < 3 and kw < 3:
                        lo = (ph_h * stride + ph_w) * Cin_p
                        w1f = w1f.at[q0 * Kq + r0, lo:lo + Cin, :Cout].set(w1[kh, kw])
    w1f = w1f.astype(jnp.bfloat16)

    # --- conv2 weights stacked along K to match the in-kernel tap concat ---
    w2s = jnp.pad(w2.reshape(9, Cout, Cout),
                  ((0, 0), (0, Cp - Cout), (0, Cp - Cout))
                  ).reshape(9 * Cp, Cp).astype(jnp.bfloat16)

    # --- shortcut weight: projection 1x1 (centre phase folded in) or identity ---
    phc = (1 % stride) * stride + (1 % stride)   # phase of the centre tap
    qc = 1 // stride                             # spatial offset of the centre tap
    bnp = jnp.zeros((6, Cp), jnp.float32)
    bnp = bnp.at[0, :Cout].set(g1).at[1, :Cout].set(be1)
    bnp = bnp.at[2, :Cout].set(g2).at[3, :Cout].set(be2)
    wsf = jnp.zeros((s2c, Cp), jnp.float32)
    if shortcut is not None:
        ws, _bs, gs, bes = shortcut
        wsf = wsf.at[phc * Cin_p:phc * Cin_p + Cin, :Cout].set(ws.reshape(Cin, Cout))
        bnp = bnp.at[4, :Cout].set(gs).at[5, :Cout].set(bes)
    else:
        wsf = wsf.at[phc * Cin_p:phc * Cin_p + Cin, :Cin].set(jnp.eye(Cin, dtype=jnp.float32))
    wsf = wsf.astype(jnp.bfloat16)

    kernel = _make_resblk_kernel(
        n=N, ho=Ho, wo=Wo, wp=Wp, s2c=s2c, cp=Cp, kq=Kq, qc=qc,
        has_projection=shortcut is not None)

    vmem = pl.BlockSpec(memory_space=pltpu.MemorySpace.VMEM)
    out = pl.pallas_call(
        kernel,
        out_shape=jax.ShapeDtypeStruct((M, Cp), jnp.float32),
        in_specs=[vmem] * 5,
        out_specs=vmem,
        scratch_shapes=[pltpu.VMEM((N, Ho + 2, Wp, Cp), jnp.bfloat16)],
        compiler_params=pltpu.CompilerParams(vmem_limit_bytes=32 * 1024 * 1024),
    )(xs2d, w1f, w2s, wsf, bnp)

    # Lane-dense (M, 128) kernel output -> (N, Ho, Wo, Cout)
    return out.reshape(N, Ho, Wo, Cp)[..., :Cout]


def _reference_forward(x_nhwc, params, stride):
    """Plain-JAX reference (PyTorch semantics incl. conv biases); bf16 matmul
    operands mirror the kernel's numerics."""
    (w1, b1, g1, be1), (w2, b2, g2, be2), shortcut = params

    def conv(x, w, b, s, pad):
        y = jax.lax.conv_general_dilated(
            x.astype(jnp.bfloat16), w.astype(jnp.bfloat16),
            window_strides=(s, s), padding=((pad, pad), (pad, pad)),
            dimension_numbers=("NHWC", "HWIO", "NHWC"),
            preferred_element_type=jnp.float32)
        return y + b.reshape(1, 1, 1, -1)

    def bn(y, g, b):
        mean = jnp.mean(y, axis=(0, 1, 2), keepdims=True)
        var = jnp.var(y, axis=(0, 1, 2), keepdims=True)
        y = (y - mean) * jax.lax.rsqrt(var + _BN_EPS)
        return y * g.reshape(1, 1, 1, -1) + b.reshape(1, 1, 1, -1)

    y = jnp.maximum(bn(conv(x_nhwc, w1, b1, stride, 1), g1, be1), 0.0)
    y = bn(conv(y, w2, b2, 1, 1), g2, be2)
    if shortcut is not None:
        ws, bs, gs, bes = shortcut
        res = bn(conv(x_nhwc, ws, bs, stride, 0), gs, bes)
    else:
        res = x_nhwc
    return y + res


def init_params(key, ch_in, ch_out):
    """Deterministic synthetic parameters (conv bias included for the reference)."""
    ks = jax.random.split(key, 10)
    w1 = jax.random.normal(ks[0], (3, 3, ch_in, ch_out), jnp.float32) * 0.1
    b1 = jax.random.normal(ks[1], (ch_out,), jnp.float32) * 0.1
    g1 = 1.0 + 0.1 * jax.random.normal(ks[2], (ch_out,), jnp.float32)
    be1 = 0.1 * jax.random.normal(ks[3], (ch_out,), jnp.float32)

    w2 = jax.random.normal(ks[4], (3, 3, ch_out, ch_out), jnp.float32) * 0.1
    b2 = jax.random.normal(ks[5], (ch_out,), jnp.float32) * 0.1
    g2 = 1.0 + 0.1 * jax.random.normal(ks[6], (ch_out,), jnp.float32)
    be2 = 0.1 * jax.random.normal(ks[7], (ch_out,), jnp.float32)

    if ch_in != ch_out:
        ws = jax.random.normal(ks[8], (1, 1, ch_in, ch_out), jnp.float32) * 0.1
        bs = jax.random.normal(ks[9], (ch_out,), jnp.float32) * 0.1
        gs = jnp.ones((ch_out,), jnp.float32)
        bes = jnp.zeros((ch_out,), jnp.float32)
        shortcut = (ws, bs, gs, bes)
    else:
        shortcut = None
    return (w1, b1, g1, be1), (w2, b2, g2, be2), shortcut


def _run_case(key, n, c_in, h, w, c_out, stride):
    k_x, k_p = jax.random.split(key)
    x_nchw = jax.random.normal(k_x, (n, c_in, h, w), jnp.float32)
    x_nhwc = jnp.transpose(x_nchw, (0, 2, 3, 1))          # NCHW -> NHWC
    params = init_params(k_p, c_in, c_out)

    fwd = jax.jit(functools.partial(resblk_forward, stride=stride))
    out_nhwc = fwd(x_nhwc, params)
    jax.block_until_ready(out_nhwc)

    out_nchw = jnp.transpose(out_nhwc, (0, 3, 1, 2))       # back to PyTorch NCHW
    ho, wo = (h - 1) // stride + 1, (w - 1) // stride + 1
    assert out_nchw.shape == (n, c_out, ho, wo)
    assert out_nchw.dtype == jnp.float32
    assert bool(jnp.all(jnp.isfinite(out_nhwc))), "non-finite output"

    ref = _reference_forward(x_nhwc, params, stride)
    max_err = float(jnp.max(jnp.abs(out_nhwc - ref)))
    assert max_err < 5e-2, f"mismatch vs reference: max_err={max_err}"


if __name__ == "__main__":
    key = jax.random.PRNGKey(0)
    k1, k2 = jax.random.split(key)

    # Primary case consistent with the module: ResBlk(ch_in=4, ch_out=8, stride=2)
    _run_case(k1, n=2, c_in=4, h=16, w=16, c_out=8, stride=2)
    # Identity-shortcut case: ResBlk(ch_in=8, ch_out=8, stride=1)
    _run_case(k2, n=2, c_in=8, h=8, w=8, c_out=8, stride=1)

    print("KERNEL_OK")
</pallas_src>

<mosaic_0001>
module attributes {stable_mosaic.version = 11 : i64} {
  func.func @kernel(%arg0: memref<2x9x9x32xbf16, #tpu.memory_space<vmem>>, %arg1: memref<4x32x128xbf16, #tpu.memory_space<vmem>>, %arg2: memref<1152x128xbf16, #tpu.memory_space<vmem>>, %arg3: memref<32x128xbf16, #tpu.memory_space<vmem>>, %arg4: memref<6x128xf32, #tpu.memory_space<vmem>>, %arg5: memref<128x128xf32, #tpu.memory_space<vmem>>, %arg6: memref<2x10x16x128xbf16, #tpu.memory_space<vmem>>) attributes {dimension_semantics = [], scalar_prefetch = 0 : i64, scratch_operands = 1 : i64, tpu.core_type = #tpu.core_type<tc>} {
    %cst = arith.constant 0.000000e+00 : f32
    %0 = vector.broadcast %cst : f32 to vector<128x128xf32>
    %c0 = arith.constant 0 : index
    %c0_0 = arith.constant 0 : index
    %c0_1 = arith.constant 0 : index
    %c0_2 = arith.constant 0 : index
    %1 = vector.load %arg0[%c0, %c0_0, %c0_1, %c0_2] : memref<2x9x9x32xbf16, #tpu.memory_space<vmem>>, vector<2x8x8x32xbf16>
    %2 = vector.shape_cast %1 : vector<2x8x8x32xbf16> to vector<128x32xbf16>
    %c0_3 = arith.constant 0 : index
    %c0_4 = arith.constant 0 : index
    %c0_5 = arith.constant 0 : index
    %3 = vector.load %arg1[%c0_3, %c0_4, %c0_5] : memref<4x32x128xbf16, #tpu.memory_space<vmem>>, vector<1x32x128xbf16>
    %4 = vector.shape_cast %3 : vector<1x32x128xbf16> to vector<32x128xbf16>
    %cst_6 = arith.constant dense<0.000000e+00> : vector<128x128xf32>
    %5 = tpu.matmul %2, %4, %cst_6 {dimension_numbers = #tpu.dot_dimension_numbers<[1], [0], [0], [1], [0, 0, 1, 1], [], []>} : vector<128x32xbf16>, vector<32x128xbf16>, vector<128x128xf32> -> vector<128x128xf32>
    %6 = arith.addf %0, %5 : vector<128x128xf32>
    %c0_7 = arith.constant 0 : index
    %c0_8 = arith.constant 0 : index
    %c1 = arith.constant 1 : index
    %c0_9 = arith.constant 0 : index
    %7 = vector.load %arg0[%c0_7, %c0_8, %c1, %c0_9] : memref<2x9x9x32xbf16, #tpu.memory_space<vmem>>, vector<2x8x8x32xbf16>
    %8 = vector.shape_cast %7 : vector<2x8x8x32xbf16> to vector<128x32xbf16>
    %c1_10 = arith.constant 1 : index
    %c0_11 = arith.constant 0 : index
    %c0_12 = arith.constant 0 : index
    %9 = vector.load %arg1[%c1_10, %c0_11, %c0_12] : memref<4x32x128xbf16, #tpu.memory_space<vmem>>, vector<1x32x128xbf16>
    %10 = vector.shape_cast %9 : vector<1x32x128xbf16> to vector<32x128xbf16>
    %cst_13 = arith.constant dense<0.000000e+00> : vector<128x128xf32>
    %11 = tpu.matmul %8, %10, %cst_13 {dimension_numbers = #tpu.dot_dimension_numbers<[1], [0], [0], [1], [0, 0, 1, 1], [], []>} : vector<128x32xbf16>, vector<32x128xbf16>, vector<128x128xf32> -> vector<128x128xf32>
    %12 = arith.addf %6, %11 : vector<128x128xf32>
    %c0_14 = arith.constant 0 : index
    %c1_15 = arith.constant 1 : index
    %c0_16 = arith.constant 0 : index
    %c0_17 = arith.constant 0 : index
    %13 = vector.load %arg0[%c0_14, %c1_15, %c0_16, %c0_17] : memref<2x9x9x32xbf16, #tpu.memory_space<vmem>>, vector<2x8x8x32xbf16>
    %14 = vector.shape_cast %13 : vector<2x8x8x32xbf16> to vector<128x32xbf16>
    %c2 = arith.constant 2 : index
    %c0_18 = arith.constant 0 : index
    %c0_19 = arith.constant 0 : index
    %15 = vector.load %arg1[%c2, %c0_18, %c0_19] : memref<4x32x128xbf16, #tpu.memory_space<vmem>>, vector<1x32x128xbf16>
    %16 = vector.shape_cast %15 : vector<1x32x128xbf16> to vector<32x128xbf16>
    %cst_20 = arith.constant dense<0.000000e+00> : vector<128x128xf32>
    %17 = tpu.matmul %14, %16, %cst_20 {dimension_numbers = #tpu.dot_dimension_numbers<[1], [0], [0], [1], [0, 0, 1, 1], [], []>} : vector<128x32xbf16>, vector<32x128xbf16>, vector<128x128xf32> -> vector<128x128xf32>
    %18 = arith.addf %12, %17 : vector<128x128xf32>
    %c0_21 = arith.constant 0 : index
    %c1_22 = arith.constant 1 : index
    %c1_23 = arith.constant 1 : index
    %c0_24 = arith.constant 0 : index
    %19 = vector.load %arg0[%c0_21, %c1_22, %c1_23, %c0_24] : memref<2x9x9x32xbf16, #tpu.memory_space<vmem>>, vector<2x8x8x32xbf16>
    %20 = vector.shape_cast %19 : vector<2x8x8x32xbf16> to vector<128x32xbf16>
    %c3 = arith.constant 3 : index
    %c0_25 = arith.constant 0 : index
    %c0_26 = arith.constant 0 : index
    %21 = vector.load %arg1[%c3, %c0_25, %c0_26] : memref<4x32x128xbf16, #tpu.memory_space<vmem>>, vector<1x32x128xbf16>
    %22 = vector.shape_cast %21 : vector<1x32x128xbf16> to vector<32x128xbf16>
    %cst_27 = arith.constant dense<0.000000e+00> : vector<128x128xf32>
    %23 = tpu.matmul %20, %22, %cst_27 {dimension_numbers = #tpu.dot_dimension_numbers<[1], [0], [0], [1], [0, 0, 1, 1], [], []>} : vector<128x32xbf16>, vector<32x128xbf16>, vector<128x128xf32> -> vector<128x128xf32>
    %24 = arith.addf %18, %23 : vector<128x128xf32>
    %c0_28 = arith.constant 0 : index
    %c0_29 = arith.constant 0 : index
    %25 = vector.load %arg4[%c0_28, %c0_29] : memref<6x128xf32, #tpu.memory_space<vmem>>, vector<1x128xf32>
    %c1_30 = arith.constant 1 : index
    %c0_31 = arith.constant 0 : index
    %26 = vector.load %arg4[%c1_30, %c0_31] : memref<6x128xf32, #tpu.memory_space<vmem>>, vector<1x128xf32>
    %cst_32 = arith.constant dense<0.000000e+00> : vector<128xf32>
    %27 = vector.multi_reduction <add>, %24, %cst_32 [0] : vector<128x128xf32> to vector<128xf32>
    %28 = vector.shape_cast %27 : vector<128xf32> to vector<1x128xf32>
    %29 = arith.mulf %24, %24 : vector<128x128xf32>
    %cst_33 = arith.constant dense<0.000000e+00> : vector<128xf32>
    %30 = vector.multi_reduction <add>, %29, %cst_33 [0] : vector<128x128xf32> to vector<128xf32>
    %31 = vector.shape_cast %30 : vector<128xf32> to vector<1x128xf32>
    %cst_34 = arith.constant 7.812500e-03 : f32
    %32 = vector.broadcast %cst_34 : f32 to vector<1x128xf32>
    %33 = arith.mulf %28, %32 : vector<1x128xf32>
    %cst_35 = arith.constant 7.812500e-03 : f32
    %34 = vector.broadcast %cst_35 : f32 to vector<1x128xf32>
    %35 = arith.mulf %31, %34 : vector<1x128xf32>
    %36 = arith.mulf %33, %33 : vector<1x128xf32>
    %37 = arith.subf %35, %36 : vector<1x128xf32>
    %cst_36 = arith.constant 0.000000e+00 : f32
    %38 = vector.broadcast %cst_36 : f32 to vector<1x128xf32>
    %39 = arith.maximumf %37, %38 : vector<1x128xf32>
    %40 = vector.broadcast %33 : vector<1x128xf32> to vector<128x128xf32>
    %41 = arith.subf %24, %40 : vector<128x128xf32>
    %cst_37 = arith.constant 9.99999974E-6 : f32
    %42 = vector.broadcast %cst_37 : f32 to vector<1x128xf32>
    %43 = arith.addf %39, %42 : vector<1x128xf32>
    %44 = math.rsqrt %43 : vector<1x128xf32>
    %45 = vector.broadcast %44 : vector<1x128xf32> to vector<128x128xf32>
    %46 = arith.mulf %41, %45 : vector<128x128xf32>
    %47 = vector.broadcast %25 : vector<1x128xf32> to vector<128x128xf32>
    %48 = arith.mulf %46, %47 : vector<128x128xf32>
    %49 = vector.broadcast %26 : vector<1x128xf32> to vector<128x128xf32>
    %50 = arith.addf %48, %49 : vector<128x128xf32>
    %cst_38 = arith.constant 0.000000e+00 : f32
    %51 = vector.broadcast %cst_38 : f32 to vector<128x128xf32>
    %52 = arith.maximumf %50, %51 : vector<128x128xf32>
    %53 = arith.truncf %52 : vector<128x128xf32> to vector<128x128xbf16>
    %cst_39 = arith.constant 0.000000e+00 : bf16
    %54 = vector.broadcast %cst_39 : bf16 to vector<2x1x16x128xbf16>
    %cst_40 = arith.constant 0.000000e+00 : bf16
    %55 = vector.broadcast %cst_40 : bf16 to vector<2x8x1x128xbf16>
    %c0_41 = arith.constant 0 : index
    %c0_42 = arith.constant 0 : index
    %c0_43 = arith.constant 0 : index
    %c0_44 = arith.constant 0 : index
    %56 = vector.load %arg6[%c0_41, %c0_42, %c0_43, %c0_44] : memref<2x10x16x128xbf16, #tpu.memory_space<vmem>>, vector<2x1x16x128xbf16>
    tpu.vector_store %arg6[%c0_41, %c0_42, %c0_43, %c0_44], %54 {strides = array<i32>} : memref<2x10x16x128xbf16, #tpu.memory_space<vmem>>, vector<2x1x16x128xbf16>,
    %c0_45 = arith.constant 0 : index
    %c9 = arith.constant 9 : index
    %c0_46 = arith.constant 0 : index
    %c0_47 = arith.constant 0 : index
    %57 = vector.load %arg6[%c0_45, %c9, %c0_46, %c0_47] : memref<2x10x16x128xbf16, #tpu.memory_space<vmem>>, vector<2x1x16x128xbf16>
    tpu.vector_store %arg6[%c0_45, %c9, %c0_46, %c0_47], %54 {strides = array<i32>} : memref<2x10x16x128xbf16, #tpu.memory_space<vmem>>, vector<2x1x16x128xbf16>,
    %c0_48 = arith.constant 0 : index
    %c1_49 = arith.constant 1 : index
    %c0_50 = arith.constant 0 : index
    %c0_51 = arith.constant 0 : index
    %58 = vector.load %arg6[%c0_48, %c1_49, %c0_50, %c0_51] : memref<2x10x16x128xbf16, #tpu.memory_space<vmem>>, vector<2x8x1x128xbf16>
    tpu.vector_store %arg6[%c0_48, %c1_49, %c0_50, %c0_51], %55 {strides = array<i32>} : memref<2x10x16x128xbf16, #tpu.memory_space<vmem>>, vector<2x8x1x128xbf16>,
    %c0_52 = arith.constant 0 : index
    %c1_53 = arith.constant 1 : index
    %c9_54 = arith.constant 9 : index
    %c0_55 = arith.constant 0 : index
    %59 = vector.load %arg6[%c0_52, %c1_53, %c9_54, %c0_55] : memref<2x10x16x128xbf16, #tpu.memory_space<vmem>>, vector<2x8x1x128xbf16>
    tpu.vector_store %arg6[%c0_52, %c1_53, %c9_54, %c0_55], %55 {strides = array<i32>} : memref<2x10x16x128xbf16, #tpu.memory_space<vmem>>, vector<2x8x1x128xbf16>,
    %60 = vector.shape_cast %53 : vector<128x128xbf16> to vector<2x8x8x128xbf16>
    %c0_56 = arith.constant 0 : index
    %c1_57 = arith.constant 1 : index
    %c1_58 = arith.constant 1 : index
    %c0_59 = arith.constant 0 : index
    %61 = vector.load %arg6[%c0_56, %c1_57, %c1_58, %c0_59] : memref<2x10x16x128xbf16, #tpu.memory_space<vmem>>, vector<2x8x8x128xbf16>
    tpu.vector_store %arg6[%c0_56, %c1_57, %c1_58, %c0_59], %60 {strides = array<i32>} : memref<2x10x16x128xbf16, #tpu.memory_space<vmem>>, vector<2x8x8x128xbf16>,
    %c0_60 = arith.constant 0 : index
    %c0_61 = arith.constant 0 : index
    %c0_62 = arith.constant 0 : index
    %c0_63 = arith.constant 0 : index
    %62 = vector.load %arg6[%c0_60, %c0_61, %c0_62, %c0_63] : memref<2x10x16x128xbf16, #tpu.memory_space<vmem>>, vector<2x8x8x128xbf16>
    %63 = vector.shape_cast %62 : vector<2x8x8x128xbf16> to vector<128x128xbf16>
    %c0_64 = arith.constant 0 : index
    %c0_65 = arith.constant 0 : index
    %c1_66 = arith.constant 1 : index
    %c0_67 = arith.constant 0 : index
    %64 = vector.load %arg6[%c0_64, %c0_65, %c1_66, %c0_67] : memref<2x10x16x128xbf16, #tpu.memory_space<vmem>>, vector<2x8x8x128xbf16>
    %65 = vector.shape_cast %64 : vector<2x8x8x128xbf16> to vector<128x128xbf16>
    %c0_68 = arith.constant 0 : index
    %c0_69 = arith.constant 0 : index
    %c2_70 = arith.constant 2 : index
    %c0_71 = arith.constant 0 : index
    %66 = vector.load %arg6[%c0_68, %c0_69, %c2_70, %c0_71] : memref<2x10x16x128xbf16, #tpu.memory_space<vmem>>, vector<2x8x8x128xbf16>
    %67 = vector.shape_cast %66 : vector<2x8x8x128xbf16> to vector<128x128xbf16>
    %c0_72 = arith.constant 0 : index
    %c1_73 = arith.constant 1 : index
    %c0_74 = arith.constant 0 : index
    %c0_75 = arith.constant 0 : index
    %68 = vector.load %arg6[%c0_72, %c1_73, %c0_74, %c0_75] : memref<2x10x16x128xbf16, #tpu.memory_space<vmem>>, vector<2x8x8x128xbf16>
    %69 = vector.shape_cast %68 : vector<2x8x8x128xbf16> to vector<128x128xbf16>
    %c0_76 = arith.constant 0 : index
    %c1_77 = arith.constant 1 : index
    %c1_78 = arith.constant 1 : index
    %c0_79 = arith.constant 0 : index
    %70 = vector.load %arg6[%c0_76, %c1_77, %c1_78, %c0_79] : memref<2x10x16x128xbf16, #tpu.memory_space<vmem>>, vector<2x8x8x128xbf16>
    %71 = vector.shape_cast %70 : vector<2x8x8x128xbf16> to vector<128x128xbf16>
    %c0_80 = arith.constant 0 : index
    %c1_81 = arith.constant 1 : index
    %c2_82 = arith.constant 2 : index
    %c0_83 = arith.constant 0 : index
    %72 = vector.load %arg6[%c0_80, %c1_81, %c2_82, %c0_83] : memref<2x10x16x128xbf16, #tpu.memory_space<vmem>>, vector<2x8x8x128xbf16>
    %73 = vector.shape_cast %72 : vector<2x8x8x128xbf16> to vector<128x128xbf16>
    %c0_84 = arith.constant 0 : index
    %c2_85 = arith.constant 2 : index
    %c0_86 = arith.constant 0 : index
    %c0_87 = arith.constant 0 : index
    %74 = vector.load %arg6[%c0_84, %c2_85, %c0_86, %c0_87] : memref<2x10x16x128xbf16, #tpu.memory_space<vmem>>, vector<2x8x8x128xbf16>
    %75 = vector.shape_cast %74 : vector<2x8x8x128xbf16> to vector<128x128xbf16>
    %c0_88 = arith.constant 0 : index
    %c2_89 = arith.constant 2 : index
    %c1_90 = arith.constant 1 : index
    %c0_91 = arith.constant 0 : index
    %76 = vector.load %arg6[%c0_88, %c2_89, %c1_90, %c0_91] : memref<2x10x16x128xbf16, #tpu.memory_space<vmem>>, vector<2x8x8x128xbf16>
    %77 = vector.shape_cast %76 : vector<2x8x8x128xbf16> to vector<128x128xbf16>
    %c0_92 = arith.constant 0 : index
    %c2_93 = arith.constant 2 : index
    %c2_94 = arith.constant 2 : index
    %c0_95 = arith.constant 0 : index
    %78 = vector.load %arg6[%c0_92, %c2_93, %c2_94, %c0_95] : memref<2x10x16x128xbf16, #tpu.memory_space<vmem>>, vector<2x8x8x128xbf16>
    %79 = vector.shape_cast %78 : vector<2x8x8x128xbf16> to vector<128x128xbf16>
    %80 = tpu.concatenate %63, %65, %67, %69, %71, %73, %75, %77, %79 in 1 : vector<128x128xbf16>, vector<128x128xbf16>, vector<128x128xbf16>, vector<128x128xbf16>, vector<128x128xbf16>, vector<128x128xbf16>, vector<128x128xbf16>, vector<128x128xbf16>, vector<128x128xbf16> -> vector<128x1152xbf16>
    %c0_96 = arith.constant 0 : index
    %c0_97 = arith.constant 0 : index
    %81 = vector.load %arg2[%c0_96, %c0_97] : memref<1152x128xbf16, #tpu.memory_space<vmem>>, vector<1152x128xbf16>
    %cst_98 = arith.constant dense<0.000000e+00> : vector<128x128xf32>
    %82 = tpu.matmul %80, %81, %cst_98 {dimension_numbers = #tpu.dot_dimension_numbers<[1], [0], [0], [1], [0, 0, 1, 1], [], []>} : vector<128x1152xbf16>, vector<1152x128xbf16>, vector<128x128xf32> -> vector<128x128xf32>
    %c2_99 = arith.constant 2 : index
    %c0_100 = arith.constant 0 : index
    %83 = vector.load %arg4[%c2_99, %c0_100] : memref<6x128xf32, #tpu.memory_space<vmem>>, vector<1x128xf32>
    %c3_101 = arith.constant 3 : index
    %c0_102 = arith.constant 0 : index
    %84 = vector.load %arg4[%c3_101, %c0_102] : memref<6x128xf32, #tpu.memory_space<vmem>>, vector<1x128xf32>
    %cst_103 = arith.constant dense<0.000000e+00> : vector<128xf32>
    %85 = vector.multi_reduction <add>, %82, %cst_103 [0] : vector<128x128xf32> to vector<128xf32>
    %86 = vector.shape_cast %85 : vector<128xf32> to vector<1x128xf32>
    %87 = arith.mulf %82, %82 : vector<128x128xf32>
    %cst_104 = arith.constant dense<0.000000e+00> : vector<128xf32>
    %88 = vector.multi_reduction <add>, %87, %cst_104 [0] : vector<128x128xf32> to vector<128xf32>
    %89 = vector.shape_cast %88 : vector<128xf32> to vector<1x128xf32>
    %cst_105 = arith.constant 7.812500e-03 : f32
    %90 = vector.broadcast %cst_105 : f32 to vector<1x128xf32>
    %91 = arith.mulf %86, %90 : vector<1x128xf32>
    %cst_106 = arith.constant 7.812500e-03 : f32
    %92 = vector.broadcast %cst_106 : f32 to vector<1x128xf32>
    %93 = arith.mulf %89, %92 : vector<1x128xf32>
    %94 = arith.mulf %91, %91 : vector<1x128xf32>
    %95 = arith.subf %93, %94 : vector<1x128xf32>
    %cst_107 = arith.constant 0.000000e+00 : f32
    %96 = vector.broadcast %cst_107 : f32 to vector<1x128xf32>
    %97 = arith.maximumf %95, %96 : vector<1x128xf32>
    %98 = vector.broadcast %91 : vector<1x128xf32> to vector<128x128xf32>
    %99 = arith.subf %82, %98 : vector<128x128xf32>
    %cst_108 = arith.constant 9.99999974E-6 : f32
    %100 = vector.broadcast %cst_108 : f32 to vector<1x128xf32>
    %101 = arith.addf %97, %100 : vector<1x128xf32>
    %102 = math.rsqrt %101 : vector<1x128xf32>
    %103 = vector.broadcast %102 : vector<1x128xf32> to vector<128x128xf32>
    %104 = arith.mulf %99, %103 : vector<128x128xf32>
    %105 = vector.broadcast %83 : vector<1x128xf32> to vector<128x128xf32>
    %106 = arith.mulf %104, %105 : vector<128x128xf32>
    %107 = vector.broadcast %84 : vector<1x128xf32> to vector<128x128xf32>
    %108 = arith.addf %106, %107 : vector<128x128xf32>
    %c0_109 = arith.constant 0 : index
    %c0_110 = arith.constant 0 : index
    %c0_111 = arith.constant 0 : index
    %c0_112 = arith.constant 0 : index
    %109 = vector.load %arg0[%c0_109, %c0_110, %c0_111, %c0_112] : memref<2x9x9x32xbf16, #tpu.memory_space<vmem>>, vector<2x8x8x32xbf16>
    %110 = vector.shape_cast %109 : vector<2x8x8x32xbf16> to vector<128x32xbf16>
    %c0_113 = arith.constant 0 : index
    %c0_114 = arith.constant 0 : index
    %111 = vector.load %arg3[%c0_113, %c0_114] : memref<32x128xbf16, #tpu.memory_space<vmem>>, vector<32x128xbf16>
    %cst_115 = arith.constant dense<0.000000e+00> : vector<128x128xf32>
    %112 = tpu.matmul %110, %111, %cst_115 {dimension_numbers = #tpu.dot_dimension_numbers<[1], [0], [0], [1], [0, 0, 1, 1], [], []>} : vector<128x32xbf16>, vector<32x128xbf16>, vector<128x128xf32> -> vector<128x128xf32>
    %c4 = arith.constant 4 : index
    %c0_116 = arith.constant 0 : index
    %113 = vector.load %arg4[%c4, %c0_116] : memref<6x128xf32, #tpu.memory_space<vmem>>, vector<1x128xf32>
    %c5 = arith.constant 5 : index
    %c0_117 = arith.constant 0 : index
    %114 = vector.load %arg4[%c5, %c0_117] : memref<6x128xf32, #tpu.memory_space<vmem>>, vector<1x128xf32>
    %cst_118 = arith.constant dense<0.000000e+00> : vector<128xf32>
    %115 = vector.multi_reduction <add>, %112, %cst_118 [0] : vector<128x128xf32> to vector<128xf32>
    %116 = vector.shape_cast %115 : vector<128xf32> to vector<1x128xf32>
    %117 = arith.mulf %112, %112 : vector<128x128xf32>
    %cst_119 = arith.constant dense<0.000000e+00> : vector<128xf32>
    %118 = vector.multi_reduction <add>, %117, %cst_119 [0] : vector<128x128xf32> to vector<128xf32>
    %119 = vector.shape_cast %118 : vector<128xf32> to vector<1x128xf32>
    %cst_120 = arith.constant 7.812500e-03 : f32
    %120 = vector.broadcast %cst_120 : f32 to vector<1x128xf32>
    %121 = arith.mulf %116, %120 : vector<1x128xf32>
    %cst_121 = arith.constant 7.812500e-03 : f32
    %122 = vector.broadcast %cst_121 : f32 to vector<1x128xf32>
    %123 = arith.mulf %119, %122 : vector<1x128xf32>
    %124 = arith.mulf %121, %121 : vector<1x128xf32>
    %125 = arith.subf %123, %124 : vector<1x128xf32>
    %cst_122 = arith.constant 0.000000e+00 : f32
    %126 = vector.broadcast %cst_122 : f32 to vector<1x128xf32>
    %127 = arith.maximumf %125, %126 : vector<1x128xf32>
    %128 = vector.broadcast %121 : vector<1x128xf32> to vector<128x128xf32>
    %129 = arith.subf %112, %128 : vector<128x128xf32>
    %cst_123 = arith.constant 9.99999974E-6 : f32
    %130 = vector.broadcast %cst_123 : f32 to vector<1x128xf32>
    %131 = arith.addf %127, %130 : vector<1x128xf32>
    %132 = math.rsqrt %131 : vector<1x128xf32>
    %133 = vector.broadcast %132 : vector<1x128xf32> to vector<128x128xf32>
    %134 = arith.mulf %129, %133 : vector<128x128xf32>
    %135 = vector.broadcast %113 : vector<1x128xf32> to vector<128x128xf32>
    %136 = arith.mulf %134, %135 : vector<128x128xf32>
    %137 = vector.broadcast %114 : vector<1x128xf32> to vector<128x128xf32>
    %138 = arith.addf %136, %137 : vector<128x128xf32>
    %139 = arith.addf %108, %138 : vector<128x128xf32>
    %c0_124 = arith.constant 0 : index
    %c0_125 = arith.constant 0 : index
    %140 = vector.load %arg5[%c0_124, %c0_125] : memref<128x128xf32, #tpu.memory_space<vmem>>, vector<128x128xf32>
    tpu.vector_store %arg5[%c0_124, %c0_125], %139 {strides = array<i32>} : memref<128x128xf32, #tpu.memory_space<vmem>>, vector<128x128xf32>,
    return
  }
}

</mosaic_0001>

<bundles_post_ra>
// kernel: resblk_forward.1
= control target key start
LH: loop header
LB: loop body
LE: loop exit
PB: predicated region body
PF: predicated region fallthrough
CT: control target
= control target key end

     0   :  { %vm58_vm0 = vsmask.f32 3328  ;;  %vm59_vm1 = vsmask.f32 7440  ;;  %vm326_vm2 = vcmask 261120   ;;  %s7547_s0 = inlined_call_operand.vmem [shape: bf16[2,9,9,32], index: 0, kind: input, shape index: {}]   ;;  %s7548_s1 = inlined_call_operand.vmem [shape: bf16[4,32,128], index: 1, kind: input, shape index: {}]   ;;  %s7549_s2 = inlined_call_operand.vmem [shape: bf16[1152,128], index: 2, kind: input, shape index: {}]   ;;  %s7550_s3 = inlined_call_operand.vmem [shape: bf16[32,128], index: 3, kind: input, shape index: {}]   ;;  %s7551_s4 = inlined_call_operand.vmem [shape: f32[6,128], index: 4, kind: input, shape index: {}]   ;;  %s7552_s5 = inlined_call_operand.hbm [shape: f32[128,128], index: 5, kind: output, shape index: {}]  }
   0x1   :  { %v5234_v0 = vld [vmem:[%s7548_s1 + $0x8] sm:$0xff]  ;;  %v5236_v1 = vld [vmem:[%s7548_s1 + $0x18] sm:$0xff]  ;;  %v5233_v2 = vld [vmem:[%s7548_s1] sm:$0xff] }
   0x2   :  { %v4595_v3 = vld [vmem:[%s7547_s0 + $0x48] sm:$0xf]  ;;  %v5229_v4 = vld [vmem:[%s7547_s0 + $0x4c] sm:$0xf0]  ;;  %5357 = vmatpush.bf16.msra.mxu3 %v5234_v0  ;;  %5355 = vmatpush.bf16.msra.mxu2 %v5236_v1  ;;  %v50_v8 = vld [vmem:[%s7547_s0 + $0x4c] sm:$0x1] }
   0x3   :  { %v5235_v5 = vld [vmem:[%s7548_s1 + $0x10] sm:$0xff]  ;;  %v30_v6 = vld [vmem:[%s7547_s0 + $0x48] sm:$0xf]  ;;  %357 = vmatpush.bf16.msra.mxu0 %v5236_v1  ;;  %482 = vmatpush.bf16.msra.mxu1 %v5234_v0  ;;  %v183_v12 = vshll.u32 %v50_v8, 16  ;;  %v5248_v17 = vld [vmem:[%s7548_s1 + $0x38] sm:$0xff]  ;;  %v4596_v18 = vor.u32 %v5229_v4, %v4595_v3 }
   0x4   :  { %v31_v7 = vld [vmem:[%s7547_s0 + $0x50] sm:$0xf]  ;;  %v51_v9 = vld [vmem:[%s7547_s0 + $0x54] sm:$0x1]  ;;  %v174_v10 = vshrl.u32 %v30_v6, 16  ;;  %v177_v11 = vshll.u32 %v30_v6, 16  ;;  %vm5488_vm3 = vmor %vm58_vm0, %vm59_vm1 }
   0x5   :  { %v188_v13 = vshrl.u32 %v31_v7, 16  ;;  %v191_v14 = vshll.u32 %v31_v7, 16  ;;  %v197_v15 = vshll.u32 %v51_v9, 16  ;;  %v5246_v16 = vld [vmem:[%s7548_s1 + $0x28] sm:$0xff]  ;;  %v32_v23 = vld [vmem:[%s7547_s0 + $0x58] sm:$0xf] }
   0x6   :  { %v176_v19 = vrot.slane %v174_v10, 4  ;;  %v179_v20 = vrot.slane %v177_v11, 5  ;;  %5358 = vmatpush.bf16.msra.mxu3 %v5233_v2  ;;  %5356 = vmatpush.bf16.msra.mxu2 %v5235_v5  ;;  %v185_v25 = vrot.slane %v183_v12, 5  ;;  %v33_v26 = vld [vmem:[%s7547_s0 + $0x60] sm:$0xf]  ;;  %v202_v30 = vshrl.u32 %v32_v23, 16 }
   0x7   :  { %v190_v21 = vrot.slane %v188_v13, 4  ;;  %v193_v22 = vrot.slane %v191_v14, 5  ;;  %v199_v29 = vrot.slane %v197_v15, 5  ;;  %v205_v31 = vshll.u32 %v32_v23, 16  ;;  %358 = vmatpush.bf16.msra.mxu0 %v5235_v5  ;;  %483 = vmatpush.bf16.msra.mxu1 %v5233_v2  ;;  %v52_v39 = vld [vmem:[%s7547_s0 + $0x5c] sm:$0x1] }
   0x8   :  { %v180_v24 = vor.u32 %v179_v20, %v176_v19  ;;  %v216_v33 = vshrl.u32 %v33_v26, 16  ;;  %v219_v34 = vshll.u32 %v33_v26, 16  ;;  %v204_v36 = vrot.slane %v202_v30, 4  ;;  %v53_v40 = vld [vmem:[%s7547_s0 + $0x64] sm:$0x1]  ;;  %v5247_v56 = vld [vmem:[%s7548_s1 + $0x30] sm:$0xff] }
   0x9   :  { %v194_v28 = vor.u32 %v193_v22, %v190_v21  ;;  %4621 = vmatmul.msk.bf16.vlgmr.msra.gmra.mxu3 %vm326_vm2, %v4596_v18  ;;  %v207_v37 = vrot.slane %v205_v31, 5  ;;  %v211_v47 = vshll.u32 %v52_v39, 16  ;;  %v225_v49 = vshll.u32 %v53_v40, 16  ;;  %v4599_v51 = vld [vmem:[%s7547_s0 + $0x58] sm:$0xf]  ;;  %v5245_v55 = vld [vmem:[%s7548_s1 + $0x20] sm:$0xff] }
   0xa   :  { %629 = vmatpush.bf16.msrb.mxu2 %v5246_v16  ;;  %1015 = vmatpush.bf16.msrb.mxu3 %v5248_v17  ;;  %v181_v32 = vrot.slane %v180_v24, 4  ;;  %v218_v41 = vrot.slane %v216_v33, 4  ;;  %v221_v42 = vrot.slane %v219_v34, 5  ;;  %v5230_v52 = vld [vmem:[%s7547_s0 + $0x5c] sm:$0xf0] }
   0xb   :  { %v195_v35 = vrot.slane %v194_v28, 4  ;;  %v208_v46 = vor.u32 %v207_v37, %v204_v36  ;;  %v34_v53 = vld [vmem:[%s7547_s0 + $0x68] sm:$0xf]  ;;  %v35_v54 = vld [vmem:[%s7547_s0 + $0x70] sm:$0xf]  ;;  %v213_v58 = vrot.slane %v211_v47, 5 }
   0xc   :  { %v186_v38 = vsel %vm5488_vm3, %v181_v32, %v185_v25  ;;  %v222_v48 = vor.u32 %v221_v42, %v218_v41  ;;  %v227_v60 = vrot.slane %v225_v49, 5 }
   0xd   :  { %v200_v43 = vsel %vm5488_vm3, %v195_v35, %v199_v29  ;;  %v298_v44 = vunpack.c.l.b16 %v186_v38  ;;  %v209_v57 = vrot.slane %v208_v46, 4 }
   0xe   :  { %v299_v45 = vunpack.c.l.b16 %v200_v43  ;;  %v223_v59 = vrot.slane %v222_v48, 4 }
  0x10   :  { %v310_v50 = vpack.c.b16 %v299_v45, %v298_v44 }
  0x12   :  { %4573 = vmatmul.msk.bf16.vlgmr.msra.gmra.mxu2 %vm326_vm2, %v310_v50 }
  0x13   :  { %10 = vsyncpa [#allocation4], 0  ;;  %630 = vmatpush.bf16.msrb.mxu2 %v5245_v55  ;;  %1016 = vmatpush.bf16.msrb.mxu3 %v5247_v56  ;;  %v230_v61 = vshrl.u32 %v34_v53, 16  ;;  %v233_v62 = vshll.u32 %v34_v53, 16  ;;  %v244_v63 = vshrl.u32 %v35_v54, 16  ;;  %v247_v0 = vshll.u32 %v35_v54, 16 }
  0x14   :  { %v4600_v1 = vor.u32 %v5230_v52, %v4599_v51  ;;  %v214_v2 = vsel %vm5488_vm3, %v209_v57, %v213_v58  ;;  %v228_v3 = vsel %vm5488_vm3, %v223_v59, %v227_v60  ;;  %v54_v10 = vld [vmem:[%s7547_s0 + $0x6c] sm:$0x1]  ;;  %v55_v11 = vld [vmem:[%s7547_s0 + $0x74] sm:$0x1]  ;;  %v36_v17 = vld [vmem:[%s7547_s0 + $0x78] sm:$0xf] }
  0x15   :  { %v232_v4 = vrot.slane %v230_v61, 4  ;;  %v235_v5 = vrot.slane %v233_v62, 5  ;;  %v246_v6 = vrot.slane %v244_v63, 4  ;;  %v249_v7 = vrot.slane %v247_v0, 5  ;;  %v37_v22 = vld [vmem:[%s7547_s0 + $0x80] sm:$0xf] }
  0x16   :  { %v300_v8 = vunpack.c.l.b16 %v214_v2  ;;  %v301_v9 = vunpack.c.l.b16 %v228_v3  ;;  %v239_v13 = vshll.u32 %v54_v10, 16  ;;  %v253_v15 = vshll.u32 %v55_v11, 16  ;;  %v4603_v23 = vld [vmem:[%s7547_s0 + $0x68] sm:$0xf]  ;;  %v5231_v24 = vld [vmem:[%s7547_s0 + $0x6c] sm:$0xf0] }
  0x17   :  { %v236_v12 = vor.u32 %v235_v5, %v232_v4  ;;  %v250_v14 = vor.u32 %v249_v7, %v246_v6  ;;  %v258_v25 = vshrl.u32 %v36_v17, 16  ;;  %v261_v26 = vshll.u32 %v36_v17, 16  ;;  %v56_v33 = vld [vmem:[%s7547_s0 + $0x7c] sm:$0x1]  ;;  %v4693_v36 = vld [vmem:[%s7547_s0 + $0x8] sm:$0xf] }
  0x18   :  { %v311_v16 = vpack.c.b16 %v301_v9, %v300_v8  ;;  %v241_v19 = vrot.slane %v239_v13, 5  ;;  %v255_v21 = vrot.slane %v253_v15, 5  ;;  %v272_v30 = vshrl.u32 %v37_v22, 16  ;;  %v57_v39 = vld [vmem:[%s7547_s0 + $0x84] sm:$0x1]  ;;  %s4545_s6 = sshll.u32 %s7552_s5, 4  ;;  %s4546_s6 = int_to_ptr.hbm [resolvable:$true] %s4545_s6 }
  0x19   :  { %4622 = vmatmul.msk.bf16.gmra.mxu3 %vm326_vm2, %v4600_v1  ;;  %v237_v18 = vrot.slane %v236_v12, 4  ;;  %v251_v20 = vrot.slane %v250_v14, 4  ;;  %v275_v31 = vshll.u32 %v37_v22, 16  ;;  %v4604_v32 = vor.u32 %v5231_v24, %v4603_v23  ;;  %v22_v40 = vld [vmem:[%s7547_s0] sm:$0xf]  ;;  %s5413_s7 = smov 128  }
  0x1a   :  { %v260_v34 = vrot.slane %v258_v25, 4  ;;  %v263_v35 = vrot.slane %v261_v26, 5  ;;  %v23_v41 = vld [vmem:[%s7547_s0 + $0x8] sm:$0xf]  ;;  %v274_v42 = vrot.slane %v272_v30, 4  ;;  %v62_v44 = vshrl.u32 %v22_v40, 16 }
  0x1b   :  { %v242_v28 = vsel %vm5488_vm3, %v237_v18, %v241_v19  ;;  %v256_v29 = vsel %vm5488_vm3, %v251_v20, %v255_v21  ;;  %v277_v43 = vrot.slane %v275_v31, 5  ;;  %v65_v45 = vshll.u32 %v22_v40, 16  ;;  %v4695_v51 = vld [vmem:[%s7547_s0 + $0x10] sm:$0xf]  ;;  %v42_v57 = vld [vmem:[%s7547_s0 + $0x4] sm:$0x1] }
  0x1c   :  { %v302_v37 = vunpack.c.l.b16 %v242_v28  ;;  %v303_v38 = vunpack.c.l.b16 %v256_v29  ;;  %v267_v46 = vshll.u32 %v56_v33, 16  ;;  %v721_v47 = vshrl.u32 %v4693_v36, 16  ;;  %v43_v58 = vld [vmem:[%s7547_s0 + $0xc] sm:$0x1]  ;;  %v4607_v12 = vld [vmem:[%s7547_s0 + $0x78] sm:$0xf] }
  0x1d   :  { %v76_v48 = vshrl.u32 %v23_v41, 16  ;;  %v79_v49 = vshll.u32 %v23_v41, 16  ;;  %v281_v50 = vshll.u32 %v57_v39, 16  ;;  %v724_v52 = vshll.u32 %v4693_v36, 16  ;;  %v4694_v10 = vld [vmem:[%s7547_s0 + $0xc] sm:$0x1] }
  0x1e   :  { %v64_v53 = vrot.slane %v62_v44, 4  ;;  %v67_v54 = vrot.slane %v65_v45, 5  ;;  %v312_v55 = vpack.c.b16 %v303_v38, %v302_v37  ;;  %v264_v56 = vor.u32 %v263_v35, %v260_v34  ;;  %v4579_v21 = vld [vmem:[%s7547_s0] sm:$0xf]  ;;  %v5225_v22 = vld [vmem:[%s7547_s0 + $0x4] sm:$0xf0] }
  0x1f   :  { %v78_v59 = vrot.slane %v76_v48, 4  ;;  %v81_v60 = vrot.slane %v79_v49, 5  ;;  %v278_v61 = vor.u32 %v277_v43, %v274_v42  ;;  %v71_v63 = vshll.u32 %v42_v57, 16  ;;  %v5232_v23 = vld [vmem:[%s7547_s0 + $0x7c] sm:$0xf0]  ;;  %s5414_s8 = smov 8  }
  0x20   :  { %v68_v62 = vor.u32 %v67_v54, %v64_v53  ;;  %v85_v0 = vshll.u32 %v43_v58, 16  ;;  %v723_v1 = vrot.slane %v721_v47, 4  ;;  %v735_v2 = vshrl.u32 %v4695_v51, 16  ;;  %v4696_v24 = vld [vmem:[%s7547_s0 + $0x14] sm:$0x1] }
  0x21   :  { %v738_v3 = vshll.u32 %v4695_v51, 16  ;;  %v82_v4 = vor.u32 %v81_v60, %v78_v59  ;;  %v726_v5 = vrot.slane %v724_v52, 5  ;;  %v73_v7 = vrot.slane %v71_v63, 5  ;;  %v4697_v40 = vld [vmem:[%s7547_s0 + $0x18] sm:$0xf] }
  0x22   :  { %4574 = vmatmul.msk.bf16.gmra.mxu2 %vm326_vm2, %v311_v16  ;;  %v69_v6 = vrot.slane %v68_v62, 4  ;;  %v87_v8 = vrot.slane %v85_v0, 5  ;;  %v265_v9 = vrot.slane %v264_v56, 4  ;;  %v269_v13 = vrot.slane %v267_v46, 5  ;;  %v24_v41 = vld [vmem:[%s7547_s0 + $0x10] sm:$0xf] }
  0x23   :  { %v83_v11 = vrot.slane %v82_v4, 4  ;;  %v279_v14 = vrot.slane %v278_v61, 4  ;;  %v283_v15 = vrot.slane %v281_v50, 5  ;;  %v737_v17 = vrot.slane %v735_v2, 4  ;;  %v25_v42 = vld [vmem:[%s7547_s0 + $0x18] sm:$0xf] }
  0x24   :  { %v74_v16 = vsel %vm5488_vm3, %v69_v6, %v73_v7  ;;  %v740_v18 = vrot.slane %v738_v3, 5  ;;  %v727_v25 = vor.u32 %v726_v5, %v723_v1  ;;  %v730_v26 = vshll.u32 %v4694_v10, 16  ;;  %v4699_v49 = vld [vmem:[%s7547_s0 + $0x20] sm:$0xf]  ;;  %v45_v56 = vld [vmem:[%s7547_s0 + $0x1c] sm:$0x1] }
  0x25   :  { %v88_v19 = vsel %vm5488_vm3, %v83_v11, %v87_v8  ;;  %v290_v20 = vunpack.c.l.b16 %v74_v16  ;;  %v4580_v29 = vor.u32 %v5225_v22, %v4579_v21  ;;  %v270_v30 = vsel %vm5488_vm3, %v265_v9, %v269_v13  ;;  %v4698_v7 = vld [vmem:[%s7547_s0 + $0x1c] sm:$0x1]  ;;  %v4700_v10 = vld [vmem:[%s7547_s0 + $0x24] sm:$0x1] }
  0x26   :  { %v291_v28 = vunpack.c.l.b16 %v88_v19  ;;  %v284_v31 = vsel %vm5488_vm3, %v279_v14, %v283_v15  ;;  %v4608_v33 = vor.u32 %v5232_v23, %v4607_v12  ;;  %v741_v34 = vor.u32 %v740_v18, %v737_v17  ;;  %v4583_v18 = vld [vmem:[%s7547_s0 + $0x10] sm:$0xf]  ;;  %v5226_v19 = vld [vmem:[%s7547_s0 + $0x14] sm:$0xf0] }
  0x27   :  { %4617 = vmatmul.msk.bf16.vlgmr.msra.gmra.mxu1 %vm326_vm2, %v4580_v29  ;;  %v744_v35 = vshll.u32 %v4696_v24, 16  ;;  %v728_v36 = vrot.slane %v727_v25, 4  ;;  %v732_v37 = vrot.slane %v730_v26, 5  ;;  %v304_v38 = vunpack.c.l.b16 %v270_v30  ;;  %v4701_v30 = vld [vmem:[%s7547_s0 + $0x28] sm:$0xf] }
  0x28   :  { %v305_v39 = vunpack.c.l.b16 %v284_v31  ;;  %v90_v43 = vshrl.u32 %v24_v41, 16  ;;  %v93_v44 = vshll.u32 %v24_v41, 16  ;;  %v104_v45 = vshrl.u32 %v25_v42, 16  ;;  %v4703_v31 = vld [vmem:[%s7547_s0 + $0x30] sm:$0xf] }
  0x29   :  { %4623 = vmatmul.msk.bf16.gmra.mxu3 %vm326_vm2, %v4604_v32  ;;  %v306_v32 = vpack.c.b16 %v291_v28, %v290_v20  ;;  %v742_v46 = vrot.slane %v741_v34, 4  ;;  %v746_v47 = vrot.slane %v744_v35, 5  ;;  %v107_v48 = vshll.u32 %v25_v42, 16 }
  0x2a   :  { %v749_v50 = vshrl.u32 %v4697_v40, 16  ;;  %v92_v51 = vrot.slane %v90_v43, 4  ;;  %v95_v52 = vrot.slane %v93_v44, 5  ;;  %v313_v53 = vpack.c.b16 %v305_v39, %v304_v38  ;;  %v4647_v38 = vld [vmem:[%s7547_s0 + $0x8] sm:$0xf] }
  0x2b   :  { %4569 = vmatmul.msk.bf16.vlgmr.msra.gmra.mxu0 %vm326_vm2, %v306_v32  ;;  %v733_v54 = vsel %vm5488_vm3, %v728_v36, %v732_v37  ;;  %v106_v57 = vrot.slane %v104_v45, 4  ;;  %v109_v58 = vrot.slane %v107_v48, 5  ;;  %v752_v59 = vshll.u32 %v4697_v40, 16  ;;  %v26_v32 = vld [vmem:[%s7547_s0 + $0x20] sm:$0xf] }
  0x2c   :  { %v96_v60 = vor.u32 %v95_v52, %v92_v51  ;;  %v113_v62 = vshll.u32 %v45_v56, 16  ;;  %v747_v63 = vsel %vm5488_vm3, %v742_v46, %v746_v47  ;;  %v763_v0 = vshrl.u32 %v4699_v49, 16  ;;  %v5237_v43 = vld [vmem:[%s7547_s0 + $0xc] sm:$0xf0]  ;;  %v46_v48 = vld [vmem:[%s7547_s0 + $0x24] sm:$0x1] }
  0x2d   :  { %v766_v1 = vshll.u32 %v4699_v49, 16  ;;  %v110_v2 = vor.u32 %v109_v58, %v106_v57  ;;  %v949_v6 = vunpack.c.l.b16 %v733_v54  ;;  %v950_v9 = vunpack.c.l.b16 %v747_v63  ;;  %v47_v49 = vld [vmem:[%s7547_s0 + $0x2c] sm:$0x1] }
  0x2e   :  { %v97_v3 = vrot.slane %v96_v60, 4  ;;  %v115_v5 = vrot.slane %v113_v62, 5  ;;  %v751_v11 = vrot.slane %v749_v50, 4  ;;  %v754_v12 = vrot.slane %v752_v59, 5  ;;  %v4702_v63 = vld [vmem:[%s7547_s0 + $0x2c] sm:$0x1] }
  0x2f   :  { %v111_v8 = vrot.slane %v110_v2, 4  ;;  %v765_v14 = vrot.slane %v763_v0, 4  ;;  %v768_v15 = vrot.slane %v766_v1, 5  ;;  %v758_v20 = vshll.u32 %v4698_v7, 16 }
  0x30   :  { %v4584_v22 = vor.u32 %v5226_v19, %v4583_v18  ;;  %v772_v23 = vshll.u32 %v4700_v10, 16  ;;  %v965_v25 = vpack.c.b16 %v950_v9, %v949_v6  ;;  %v755_v26 = vor.u32 %v754_v12, %v751_v11  ;;  %v4587_v11 = vld [vmem:[%s7547_s0 + $0x20] sm:$0xf]  ;;  %v5227_v12 = vld [vmem:[%s7547_s0 + $0x24] sm:$0xf0] }
  0x31   :  { %v116_v16 = vsel %vm5488_vm3, %v111_v8, %v115_v5  ;;  %v769_v28 = vor.u32 %v768_v15, %v765_v14  ;;  %v760_v29 = vrot.slane %v758_v20, 5  ;;  %v118_v35 = vshrl.u32 %v26_v32, 16 }
  0x32   :  { %4575 = vmatmul.msk.bf16.gmra.mxu2 %vm326_vm2, %v312_v55  ;;  %v44_v55 = vld [vmem:[%s7547_s0 + $0x14] sm:$0x1]  ;;  %v293_v21 = vunpack.c.l.b16 %v116_v16  ;;  %v774_v34 = vrot.slane %v772_v23, 5  ;;  %v121_v36 = vshll.u32 %v26_v32, 16  ;;  %v756_v39 = vrot.slane %v755_v26, 4 }
  0x33   :  { %v99_v61 = vshll.u32 %v44_v55, 16  ;;  %v770_v40 = vrot.slane %v769_v28, 4  ;;  %v777_v41 = vshrl.u32 %v4701_v30, 16  ;;  %v780_v44 = vshll.u32 %v4701_v30, 16  ;;  %v29_v26 = vld [vmem:[%s7547_s0 + $0x38] sm:$0xf] }
  0x34   :  { %v791_v45 = vshrl.u32 %v4703_v31, 16  ;;  %v120_v46 = vrot.slane %v118_v35, 4  ;;  %v123_v47 = vrot.slane %v121_v36, 5  ;;  %v794_v52 = vshll.u32 %v4703_v31, 16  ;;  %v5238_v28 = vld [vmem:[%s7547_s0 + $0x1c] sm:$0xf0] }
  0x35   :  { %v101_v4 = vrot.slane %v99_v61, 5  ;;  %v127_v54 = vshll.u32 %v46_v48, 16  ;;  %v141_v55 = vshll.u32 %v47_v49, 16  ;;  %v4648_v56 = vor.u32 %v5237_v43, %v4647_v38  ;;  %v4707_v35 = vld [vmem:[%s7547_s0 + $0x40] sm:$0xf] }
  0x36   :  { %v761_v57 = vsel %vm5488_vm3, %v756_v39, %v760_v29  ;;  %v775_v59 = vsel %vm5488_vm3, %v770_v40, %v774_v34  ;;  %v779_v0 = vrot.slane %v777_v41, 4  ;;  %v782_v1 = vrot.slane %v780_v44, 5  ;;  %v4705_v34 = vld [vmem:[%s7547_s0 + $0x38] sm:$0xf]  ;;  %v48_v40 = vld [vmem:[%s7547_s0 + $0x34] sm:$0x1] }
  0x37   :  { %v102_v13 = vsel %vm5488_vm3, %v97_v3, %v101_v4  ;;  %4618 = vmatmul.msk.bf16.gmra.mxu1 %vm326_vm2, %v4584_v22  ;;  %v129_v61 = vrot.slane %v127_v54, 5  ;;  %v143_v62 = vrot.slane %v141_v55, 5  ;;  %v4704_v3 = vld [vmem:[%s7547_s0 + $0x34] sm:$0x1]  ;;  %v793_v4 = vrot.slane %v791_v45, 4 }
  0x38   :  { %v292_v17 = vunpack.c.l.b16 %v102_v13  ;;  %v796_v5 = vrot.slane %v794_v52, 5  ;;  %v951_v7 = vunpack.c.l.b16 %v761_v57  ;;  %v952_v8 = vunpack.c.l.b16 %v775_v59  ;;  %v49_v41 = vld [vmem:[%s7547_s0 + $0x3c] sm:$0x1] }
  0x39   :  { %4624 = vmatmul.msk.bf16.gmra.mxu3 %vm326_vm2, %v4608_v33  ;;  %v27_v33 = vld [vmem:[%s7547_s0 + $0x28] sm:$0xf]  ;;  %v786_v13 = vshll.u32 %v4702_v63, 16  ;;  %v4588_v15 = vor.u32 %v5227_v12, %v4587_v11  ;;  %v783_v16 = vor.u32 %v782_v1, %v779_v0  ;;  %v160_v32 = vshrl.u32 %v29_v26, 16  ;;  %v4591_v0 = vld [vmem:[%s7547_s0 + $0x30] sm:$0xf] }
  0x3a   :  { %v307_v24 = vpack.c.b16 %v293_v21, %v292_v17  ;;  %v132_v37 = vshrl.u32 %v27_v33, 16  ;;  %v135_v42 = vshll.u32 %v27_v33, 16  ;;  %v800_v17 = vshll.u32 %v4704_v3, 16  ;;  %v4651_v21 = vld [vmem:[%s7547_s0 + $0x18] sm:$0xf] }
  0x3b   :  { %v797_v18 = vor.u32 %v796_v5, %v793_v4  ;;  %v966_v20 = vpack.c.b16 %v952_v8, %v951_v7  ;;  %v788_v22 = vrot.slane %v786_v13, 5  ;;  %v784_v23 = vrot.slane %v783_v16, 4  ;;  %v5228_v1 = vld [vmem:[%s7547_s0 + $0x34] sm:$0xf0]  ;;  %v4708_v7 = vld [vmem:[%s7547_s0 + $0x44] sm:$0x1] }
  0x3c   :  { %4570 = vmatmul.msk.bf16.gmra.mxu0 %vm326_vm2, %v307_v24  ;;  %v134_v50 = vrot.slane %v132_v37, 4  ;;  %v137_v51 = vrot.slane %v135_v42, 5  ;;  %v802_v24 = vrot.slane %v800_v17, 5  ;;  %v163_v33 = vshll.u32 %v29_v26, 16  ;;  %v4711_v16 = vld [vmem:[%s7547_s0 + $0x58] sm:$0xf] }
  0x3d   :  { %v798_v29 = vrot.slane %v797_v18, 4  ;;  %v4652_v38 = vor.u32 %v5238_v28, %v4651_v21  ;;  %v789_v39 = vsel %vm5488_vm3, %v784_v23, %v788_v22  ;;  %v162_v42 = vrot.slane %v160_v32, 4  ;;  %v5239_v17 = vld [vmem:[%s7547_s0 + $0x2c] sm:$0xf0] }
  0x3e   :  { %v138_v58 = vor.u32 %v137_v51, %v134_v50  ;;  %v165_v43 = vrot.slane %v163_v33, 5  ;;  %v805_v48 = vshrl.u32 %v4705_v34, 16  ;;  %v808_v49 = vshll.u32 %v4705_v34, 16 }
  0x3f   :  { %v803_v44 = vsel %vm5488_vm3, %v798_v29, %v802_v24  ;;  %v819_v50 = vshrl.u32 %v4707_v35, 16  ;;  %v822_v52 = vshll.u32 %v4707_v35, 16  ;;  %v953_v57 = vunpack.c.l.b16 %v789_v39 }
  0x40   :  { %v139_v2 = vrot.slane %v138_v58, 4  ;;  %v166_v51 = vor.u32 %v165_v43, %v162_v42  ;;  %v954_v58 = vunpack.c.l.b16 %v803_v44  ;;  %v4592_v5 = vor.u32 %v5228_v1, %v4591_v0  ;;  %v4714_v0 = vld [vmem:[%s7547_s0 + $0x64] sm:$0x1]  ;;  %v4716_v1 = vld [vmem:[%s7547_s0 + $0x6c] sm:$0x1] }
  0x41   :  { %v824_v3 = vrot.slane %v822_v52, 5  ;;  %v828_v13 = vshll.u32 %v4708_v7, 16  ;;  %v847_v24 = vshrl.u32 %v4711_v16, 16  ;;  %v4663_v7 = vld [vmem:[%s7547_s0 + $0x50] sm:$0xf]  ;;  %vm1258_vm4 = vcmask 1040384  }
  0x42   :  { %4576 = vmatmul.msk.bf16.gmra.mxu2 %vm326_vm2, %v313_v53  ;;  %v124_v53 = vor.u32 %v123_v47, %v120_v46  ;;  %v144_v9 = vsel %vm5488_vm3, %v139_v2, %v143_v62  ;;  %v155_v46 = vshll.u32 %v48_v40, 16  ;;  %v169_v47 = vshll.u32 %v49_v41, 16 }
  0x43   :  { %v295_v14 = vunpack.c.l.b16 %v144_v9  ;;  %v821_v2 = vrot.slane %v819_v50, 4  ;;  %v967_v9 = vpack.c.b16 %v954_v58, %v953_v57  ;;  %v830_v21 = vrot.slane %v828_v13, 5  ;;  %v4715_v50 = vld [vmem:[%s7547_s0 + $0x68] sm:$0xf]  ;;  %v4717_v13 = vld [vmem:[%s7547_s0 + $0x70] sm:$0xf] }
  0x44   :  { %v125_v60 = vrot.slane %v124_v53, 4  ;;  %v157_v54 = vrot.slane %v155_v46, 5  ;;  %v171_v55 = vrot.slane %v169_v47, 5  ;;  %v849_v32 = vrot.slane %v847_v24, 4  ;;  %v4659_v47 = vld [vmem:[%s7547_s0 + $0x38] sm:$0xf] }
  0x45   :  { %v825_v12 = vor.u32 %v824_v3, %v821_v2  ;;  %v878_v57 = vshll.u32 %v4715_v50, 16  ;;  %vm1259_vm5 = vsmask.f32 256  ;;  %vm1309_vm6 = vsmask.f32 7938 }
  0x46   :  { %v130_v6 = vsel %vm5488_vm3, %v125_v60, %v129_v61  ;;  %v807_v60 = vrot.slane %v805_v48, 4  ;;  %v810_v61 = vrot.slane %v808_v49, 5  ;;  %v5240_v48 = vld [vmem:[%s7547_s0 + $0x3c] sm:$0xf0]  ;;  %vm6002_vm7 = vmand %vm1258_vm4, %vm1259_vm5  ;;  %vm1519_vm12 = vcmask 1043456  }
  0x47   :  { %v294_v10 = vunpack.c.l.b16 %v130_v6  ;;  %4619 = vmatmul.msk.bf16.gmra.mxu1 %vm326_vm2, %v4588_v15  ;;  %v4706_v6 = vld [vmem:[%s7547_s0 + $0x3c] sm:$0x1]  ;;  %v4709_v15 = vld [vmem:[%s7547_s0 + $0x50] sm:$0xf]  ;;  %v4713_v49 = vld [vmem:[%s7547_s0 + $0x60] sm:$0xf] }
  0x48   :  { %v814_v11 = vshll.u32 %v4706_v6, 16  ;;  %v833_v22 = vshrl.u32 %v4709_v15, 16  ;;  %v836_v23 = vshll.u32 %v4709_v15, 16  ;;  %v884_v6 = vshll.u32 %v4716_v1, 16  ;;  %vm6009_vm8 = vmand %vm1258_vm4, %vm1309_vm6 }
  0x49   :  { %4737 = vmatmul.msk.bf16.vlgmr.msrb.gmra.mxu3 %vm326_vm2, %v965_v25  ;;  %v308_v19 = vpack.c.b16 %v295_v14, %v294_v10  ;;  %v28_v25 = vld [vmem:[%s7547_s0 + $0x30] sm:$0xf]  ;;  %v811_v10 = vor.u32 %v810_v61, %v807_v60  ;;  %v4655_v14 = vld [vmem:[%s7547_s0 + $0x28] sm:$0xf]  ;;  %vm1921_vm13 = vcmask 1042432   ;;  %vm1922_vm14 = vcmask 1046532   ;;  %vm6180_vm15 = vmand %vm1519_vm12, %vm1309_vm6 }
  0x4a   :  { %v146_v30 = vshrl.u32 %v28_v25, 16  ;;  %v149_v31 = vshll.u32 %v28_v25, 16  ;;  %v850_v25 = vshll.u32 %v4711_v16, 16  ;;  %v4656_v26 = vor.u32 %v5239_v17, %v4655_v14  ;;  %v4719_v14 = vld [vmem:[%s7547_s0 + $0x78] sm:$0xf]  ;;  %vm6207_vm0 = vmor %vm1921_vm13, %vm1922_vm14 }
  0x4b   :  { %v812_v18 = vrot.slane %v811_v10, 4  ;;  %v889_v17 = vshrl.u32 %v4717_v13, 16 }
  0x4c   :  { %4571 = vmatmul.msk.bf16.gmra.mxu0 %vm326_vm2, %v308_v19  ;;  %v148_v36 = vrot.slane %v146_v30, 4  ;;  %v151_v37 = vrot.slane %v149_v31, 5  ;;  %v816_v19 = vrot.slane %v814_v11, 5  ;;  %v835_v30 = vrot.slane %v833_v22, 4 }
  0x4d   :  { %v838_v31 = vrot.slane %v836_v23, 5  ;;  %v852_v33 = vrot.slane %v850_v25, 5  ;;  %v906_v22 = vshll.u32 %v4719_v14, 16  ;;  %v891_v25 = vrot.slane %v889_v17, 4 }
  0x4e   :  { %v152_v45 = vor.u32 %v151_v37, %v148_v36  ;;  %v817_v28 = vsel %vm5488_vm3, %v812_v18, %v816_v19  ;;  %v4710_v36 = vld [vmem:[%s7547_s0 + $0x54] sm:$0x1]  ;;  %v4712_v37 = vld [vmem:[%s7547_s0 + $0x5c] sm:$0x1]  ;;  %v892_v18 = vshll.u32 %v4717_v13, 16 }
  0x4f   :  { %v955_v34 = vunpack.c.l.b16 %v817_v28  ;;  %v842_v39 = vshll.u32 %v4710_v36, 16  ;;  %v853_v40 = vor.u32 %v852_v33, %v849_v32  ;;  %v856_v41 = vshll.u32 %v4712_v37, 16 }
  0x50   :  { %v153_v53 = vrot.slane %v152_v45, 4 }
  0x51   :  { %v844_v44 = vrot.slane %v842_v39, 5  ;;  %v854_v45 = vrot.slane %v853_v40, 4  ;;  %v858_v46 = vrot.slane %v856_v41, 5 }
  0x52   :  { %4685 = vmatmul.msk.bf16.vlgmr.msrb.gmra.mxu2 %vm326_vm2, %v4648_v56  ;;  %v167_v56 = vrot.slane %v166_v51, 4  ;;  %v158_v59 = vsel %vm5488_vm3, %v153_v53, %v157_v54  ;;  %v4660_v51 = vor.u32 %v5240_v48, %v4659_v47  ;;  %v861_v54 = vshrl.u32 %v4713_v49, 16  ;;  %v4723_v47 = vld [vmem:[%s7547_s0 + $0x88] sm:$0xf] }
  0x53   :  { %v296_v63 = vunpack.c.l.b16 %v158_v59  ;;  %v859_v53 = vsel %vm5488_vm3, %v854_v45, %v858_v46  ;;  %v5242_v45 = vld [vmem:[%s7547_s0 + $0x64] sm:$0xf0]  ;;  %v4721_v46 = vld [vmem:[%s7547_s0 + $0x80] sm:$0xf] }
  0x54   :  { %v172_v62 = vsel %vm5488_vm3, %v167_v56, %v171_v55  ;;  %v864_v55 = vshll.u32 %v4713_v49, 16  ;;  %v875_v56 = vshrl.u32 %v4715_v50, 16  ;;  %v958_v59 = vunpack.c.l.b16 %v859_v53 }
  0x55   :  { %v297_v4 = vunpack.c.l.b16 %v172_v62  ;;  %v863_v60 = vrot.slane %v861_v54, 4  ;;  %v917_v53 = vshrl.u32 %v4721_v46, 16  ;;  %v920_v54 = vshll.u32 %v4721_v46, 16 }
  0x56   :  { %v866_v61 = vrot.slane %v864_v55, 5  ;;  %v877_v62 = vrot.slane %v875_v56, 4  ;;  %v931_v55 = vshrl.u32 %v4723_v47, 16  ;;  %v934_v56 = vshll.u32 %v4723_v47, 16 }
  0x57   :  { %v309_v8 = vpack.c.b16 %v297_v4, %v296_v63  ;;  %4620 = vmatmul.msk.bf16.gmra.mxu1 %vm326_vm2, %v4592_v5  ;;  %v880_v63 = vrot.slane %v878_v57, 5  ;;  %v870_v4 = vshll.u32 %v4714_v0, 16  ;;  %v4724_v0 = vld [vmem:[%s7547_s0 + $0x8c] sm:$0x1] }
  0x58   :  { %v867_v3 = vor.u32 %v866_v61, %v863_v60  ;;  %v922_v60 = vrot.slane %v920_v54, 5  ;;  %v933_v61 = vrot.slane %v931_v55, 4 }
  0x59   :  { %4738 = vmatmul.msk.bf16.gmra.mxu3 %vm326_vm2, %v966_v20  ;;  %v826_v20 = vrot.slane %v825_v12, 4  ;;  %v881_v5 = vor.u32 %v880_v63, %v877_v62  ;;  %v872_v10 = vrot.slane %v870_v4, 5  ;;  %v886_v12 = vrot.slane %v884_v6, 5  ;;  %v4722_v63 = vld [vmem:[%s7547_s0 + $0x84] sm:$0x1] }
  0x5a   :  { %v936_v62 = vrot.slane %v934_v56, 5  ;;  %v926_v6 = vshll.u32 %v4722_v63, 16 }
  0x5b   :  { %v831_v29 = vsel %vm5488_vm3, %v826_v20, %v830_v21  ;;  %v882_v11 = vrot.slane %v881_v5, 4  ;;  %v903_v21 = vshrl.u32 %v4719_v14, 16 }
  0x5c   :  { %4572 = vmatmul.msk.bf16.gmra.mxu0 %vm326_vm2, %v309_v8  ;;  %v956_v35 = vunpack.c.l.b16 %v831_v29  ;;  %v5241_v8 = vld [vmem:[%s7547_s0 + $0x54] sm:$0xf0]  ;;  %v908_v29 = vrot.slane %v906_v22, 5 }
  0x5d   :  { %v4664_v16 = vor.u32 %v5241_v8, %v4663_v7  ;;  %v887_v20 = vsel %vm5488_vm3, %v882_v11, %v886_v12  ;;  %v905_v28 = vrot.slane %v903_v21, 4  ;;  %v937_v7 = vor.u32 %v936_v62, %v933_v61 }
  0x5e   :  { %v968_v42 = vpack.c.b16 %v956_v35, %v955_v34  ;;  %v960_v24 = vunpack.c.l.b16 %v887_v20  ;;  %v940_v8 = vshll.u32 %v4724_v0, 16  ;;  %v928_v12 = vrot.slane %v926_v6, 5 }
  0x5f   :  { %v938_v13 = vrot.slane %v937_v7, 4 }
  0x60   :  { %v942_v14 = vrot.slane %v940_v8, 5 }
  0x62   :  { %4686 = vmatmul.msk.bf16.gmra.mxu2 %vm326_vm2, %v4652_v38  ;;  %v839_v38 = vor.u32 %v838_v31, %v835_v30  ;;  %v4718_v30 = vld [vmem:[%s7547_s0 + $0x74] sm:$0x1]  ;;  %v4720_v31 = vld [vmem:[%s7547_s0 + $0x7c] sm:$0x1] }
  0x63   :  { %v898_v37 = vshll.u32 %v4718_v30, 16  ;;  %v912_v39 = vshll.u32 %v4720_v31, 16 }
  0x64   :  { %v840_v43 = vrot.slane %v839_v38, 4  ;;  %v909_v38 = vor.u32 %v908_v29, %v905_v28  ;;  %v5244_v28 = vld [vmem:[%s7547_s0 + $0x84] sm:$0xf0] }
  0x65   :  { %v900_v41 = vrot.slane %v898_v37, 5 }
  0x66   :  { %v845_v52 = vsel %vm5488_vm3, %v840_v43, %v844_v44  ;;  %v914_v43 = vrot.slane %v912_v39, 5  ;;  %v4667_v44 = vld [vmem:[%s7547_s0 + $0x60] sm:$0xf] }
  0x67   :  { %v957_v58 = vunpack.c.l.b16 %v845_v52  ;;  %v4668_v50 = vor.u32 %v5242_v45, %v4667_v44 }
  0x69   :  { %4739 = vmatmul.msk.bf16.gmra.mxu3 %vm326_vm2, %v967_v9  ;;  %v969_v2 = vpack.c.b16 %v958_v59, %v957_v58  ;;  %v868_v9 = vrot.slane %v867_v3, 4  ;;  %v919_v59 = vrot.slane %v917_v53, 4 }
  0x6b   :  { %v873_v19 = vsel %vm5488_vm3, %v868_v9, %v872_v10  ;;  %v923_v5 = vor.u32 %v922_v60, %v919_v59  ;;  %v4671_v9 = vld [vmem:[%s7547_s0 + $0x70] sm:$0xf]  ;;  %v5243_v10 = vld [vmem:[%s7547_s0 + $0x74] sm:$0xf0] }
  0x6c   :  { %v959_v23 = vunpack.c.l.b16 %v873_v19  ;;  %v4672_v17 = vor.u32 %v5243_v10, %v4671_v9  ;;  %v943_v19 = vsel %vm5488_vm3, %v938_v13, %v942_v14 }
  0x6d   :  { %v924_v11 = vrot.slane %v923_v5, 4  ;;  %v964_v21 = vunpack.c.l.b16 %v943_v19 }
  0x6e   :  { %v970_v34 = vpack.c.b16 %v960_v24, %v959_v23 }
  0x72   :  { %4687 = vmatmul.msk.bf16.gmra.mxu2 %vm326_vm2, %v4656_v26  ;;  %v894_v26 = vrot.slane %v892_v18, 5  ;;  %v929_v18 = vsel %vm5488_vm3, %v924_v11, %v928_v12 }
  0x73   :  { %v963_v20 = vunpack.c.l.b16 %v929_v18 }
  0x74   :  { %v895_v35 = vor.u32 %v894_v26, %v891_v25  ;;  %v4675_v26 = vld [vmem:[%s7547_s0 + $0x80] sm:$0xf] }
  0x75   :  { %v972_v25 = vpack.c.b16 %v964_v21, %v963_v20  ;;  %v4676_v31 = vor.u32 %v5244_v28, %v4675_v26 }
  0x76   :  { %v896_v40 = vrot.slane %v895_v35, 4 }
  0x79   :  { %4740 = vmatmul.msk.bf16.gmra.mxu3 %vm326_vm2, %v968_v42  ;;  %v910_v42 = vrot.slane %v909_v38, 4 }
  0x7b   :  { %v915_v52 = vsel %vm5488_vm3, %v910_v42, %v914_v43 }
  0x7c   :  { %v962_v58 = vunpack.c.l.b16 %v915_v52 }
  0x82   :  { %4688 = vmatmul.msk.bf16.gmra.mxu2 %vm326_vm2, %v4660_v51  ;;  %v901_v51 = vsel %vm5488_vm3, %v896_v40, %v900_v41 }
  0x83   :  { %v961_v57 = vunpack.c.l.b16 %v901_v51 }
  0x85   :  { %v971_v4 = vpack.c.b16 %v962_v58, %v961_v57 }
  0x89   :  { %4741 = vmatmul.msk.bf16.gmra.mxu3 %vm326_vm2, %v969_v2 }
  0x8c   :  { %v505_v15 = vpop.f32.mrf.mxu3 }
  0x92   :  { %4689 = vmatmul.msk.bf16.gmra.mxu2 %vm326_vm2, %v4664_v16 }
  0x94   :  { %v5814_v33 = vpop.f32.mrf.mxu3 }
  0x95   :  { %v380_v32 = vpop.f32.mrf.mxu2 }
  0x96   :  { %v5816_v36 = vadd.f32 %v505_v15, %v380_v32 }
  0x99   :  { %4742 = vmatmul.msk.bf16.gmra.mxu3 %vm326_vm2, %v970_v34 }
  0x9c   :  { %v510_v49 = vpop.f32.mrf.mxu3 }
  0x9d   :  { %v5831_v48 = vpop.f32.mrf.mxu2 }
  0xa2   :  { %4690 = vmatmul.msk.bf16.gmra.mxu2 %vm326_vm2, %v4668_v50 }
  0xa4   :  { %v5844_v2 = vpop.f32.mrf.mxu3  ;;  %v485_v38 = vpop.f32.mrf.mxu1 }
  0xa5   :  { %v385_v1 = vpop.f32.mrf.mxu2 }
  0xa6   :  { %v5846_v3 = vadd.f32 %v510_v49, %v385_v1 }
  0xa8   :  { %v360_v37 = vpop.f32.mrf.mxu0 }
  0xa9   :  { %4743 = vmatmul.msk.bf16.gmra.mxu3 %vm326_vm2, %v971_v4  ;;  %v486_v43 = vadd.f32 %v485_v38, %v360_v37 }
  0xac   :  { %v515_v16 = vpop.f32.mrf.mxu3  ;;  %v487_v42 = vpop.f32.mrf.mxu1 }
  0xad   :  { %v5855_v15 = vpop.f32.mrf.mxu2 }
  0xb0   :  { %v362_v41 = vpop.f32.mrf.mxu0 }
  0xb2   :  { %4691 = vmatmul.msk.bf16.gmra.mxu2 %vm326_vm2, %v4672_v17 }
  0xb4   :  { %v5862_v23 = vpop.f32.mrf.mxu3  ;;  %v490_v50 = vpop.f32.mrf.mxu1 }
  0xb5   :  { %v390_v22 = vpop.f32.mrf.mxu2 }
  0xb6   :  { %v5864_v24 = vadd.f32 %v515_v16, %v390_v22 }
  0xb9   :  { %4744 = vmatmul.msk.bf16.gmra.mxu3 %vm326_vm2, %v972_v25  ;;  %v365_v49 = vpop.f32.mrf.mxu0  ;;  %v488_v25 = vadd.f32 %v487_v42, %v362_v41 }
  0xba   :  { %v491_v53 = vadd.f32 %v490_v50, %v365_v49 }
  0xbc   :  { %v520_v30 = vpop.f32.mrf.mxu3  ;;  %v492_v55 = vpop.f32.mrf.mxu1 }
  0xbd   :  { %v5873_v29 = vpop.f32.mrf.mxu2 }
  0xc1   :  { %v367_v54 = vpop.f32.mrf.mxu0 }
  0xc2   :  { %4692 = vmatmul.msk.bf16.gmra.mxu2 %vm326_vm2, %v4676_v31 }
  0xc4   :  { %v5876_v34 = vpop.f32.mrf.mxu3  ;;  %v495_v63 = vpop.f32.mrf.mxu1 }
  0xc5   :  { %v395_v32 = vpop.f32.mrf.mxu2 }
  0xc6   :  { %v5878_v35 = vadd.f32 %v520_v30, %v395_v32  ;;  %v493_v30 = vadd.f32 %v492_v55, %v367_v54 }
  0xc9   :  { %v370_v62 = vpop.f32.mrf.mxu0 }
  0xca   :  { %v496_v0 = vadd.f32 %v495_v63, %v370_v62 }
  0xcc   :  { %v1018_v40 = vpop.f32.mrf.mxu3  ;;  %v497_v17 = vpop.f32.mrf.mxu1 }
  0xcd   :  { %v5880_v39 = vpop.f32.mrf.mxu2 }
  0xd1   :  { %v372_v16 = vpop.f32.mrf.mxu0 }
  0xd2   :  { %v498_v38 = vadd.f32 %v497_v17, %v372_v16 }
  0xd4   :  { %v1020_v45 = vpop.f32.mrf.mxu3  ;;  %v500_v22 = vpop.f32.mrf.mxu1 }
  0xd5   :  { %v632_v44 = vpop.f32.mrf.mxu2 }
  0xd6   :  { %v672_v46 = vadd.f32 %v632_v44, %v486_v43 }
  0xd8   :  { %v5882_v47 = vadd.f32 %v1018_v40, %v672_v46 }
  0xd9   :  { %v375_v21 = vpop.f32.mrf.mxu0 }
  0xda   :  { %v501_v44 = vadd.f32 %v500_v22, %v375_v21  ;;  %v1097_v41 = vmul.f32 %v5882_v47, %v5882_v47 }
  0xdc   :  { %v1023_v52 = vpop.f32.mrf.mxu3  ;;  %v502_v43 = vpop.f32.mrf.mxu1 }
  0xdd   :  { %v634_v51 = vpop.f32.mrf.mxu2 }
  0xde   :  { %v673_v28 = vadd.f32 %v634_v51, %v488_v25 }
  0xe0   :  { %v5888_v32 = vadd.f32 %v1020_v45, %v673_v28 }
  0xe1   :  { %v377_v40 = vpop.f32.mrf.mxu0 }
  0xe2   :  { %v1098_v49 = vmul.f32 %v5888_v32, %v5888_v32  ;;  %v1076_v54 = vadd.f32 %v5888_v32, %v5882_v47 }
  0xe4   :  { %v1025_v57 = vpop.f32.mrf.mxu3  ;;  %v1113_v55 = vadd.f32 %v1098_v49, %v1097_v41 }
  0xe5   :  { %v637_v56 = vpop.f32.mrf.mxu2 }
  0xe6   :  { %v674_v58 = vadd.f32 %v637_v56, %v491_v53  ;;  %v503_v53 = vadd.f32 %v502_v43, %v377_v40 }
  0xe8   :  { %v5884_v59 = vadd.f32 %v1023_v52, %v674_v58 }
  0xea   :  { %v1099_v42 = vmul.f32 %v5884_v59, %v5884_v59 }
  0xec   :  { %v1028_v61 = vpop.f32.mrf.mxu3 }
  0xed   :  { %v639_v60 = vpop.f32.mrf.mxu2 }
  0xee   :  { %v675_v37 = vadd.f32 %v639_v60, %v493_v30  ;;  %v1077_v60 = vadd.f32 %v1076_v54, %v5884_v59 }
  0xf0   :  { %v5892_v50 = vadd.f32 %v1025_v57, %v675_v37 }
  0xf2   :  { %v1100_v56 = vmul.f32 %v5892_v50, %v5892_v50 }
  0xf4   :  { %v1030_v4 = vpop.f32.mrf.mxu3 }
  0xf5   :  { %v642_v1 = vpop.f32.mrf.mxu2 }
  0xf6   :  { %v676_v5 = vadd.f32 %v642_v1, %v496_v0  ;;  %v508_v1 = vadd.f32 %v5814_v33, %v5831_v48  ;;  %v513_v33 = vadd.f32 %v5844_v2, %v5855_v15  ;;  %v518_v2 = vadd.f32 %v5862_v23, %v5873_v29 }
  0xf8   :  { %v5886_v6 = vadd.f32 %v1028_v61, %v676_v5  ;;  %v1114_v61 = vadd.f32 %v1113_v55, %v1099_v42  ;;  %v1078_v5 = vadd.f32 %v1077_v60, %v5892_v50 }
  0xfa   :  { %v1101_v62 = vmul.f32 %v5886_v6, %v5886_v6  ;;  %v1079_v16 = vadd.f32 %v1078_v5, %v5886_v6 }
  0xfc   :  { %v1033_v8 = vpop.f32.mrf.mxu3 }
  0xfd   :  { %v644_v7 = vpop.f32.mrf.mxu2 }
  0xfe   :  { %v677_v52 = vadd.f32 %v644_v7, %v498_v38  ;;  %v1115_v7 = vadd.f32 %v1114_v61, %v1100_v56 }
 0x100   :  { %v5902_v58 = vadd.f32 %v1030_v4, %v677_v52  ;;  %v1116_v21 = vadd.f32 %v1115_v7, %v1101_v62 }
 0x102   :  { %v1102_v4 = vmul.f32 %v5902_v58, %v5902_v58  ;;  %v1080_v48 = vadd.f32 %v1079_v16, %v5902_v58 }
 0x104   :  { %v1035_v10 = vpop.f32.mrf.mxu3 }
 0x105   :  { %v647_v9 = vpop.f32.mrf.mxu2 }
 0x106   :  { %v678_v45 = vadd.f32 %v647_v9, %v501_v44 }
 0x108   :  { %v5907_v63 = vadd.f32 %v1033_v8, %v678_v45 }
 0x10a   :  { %v1103_v8 = vmul.f32 %v5907_v63, %v5907_v63 }
 0x10c   :  { %v1038_v12 = vpop.f32.mrf.mxu3 }
 0x10d   :  { %v649_v11 = vpop.f32.mrf.mxu2 }
 0x10e   :  { %v679_v57 = vadd.f32 %v649_v11, %v503_v53 }
 0x110   :  { %v5915_v9 = vadd.f32 %v1035_v10, %v679_v57  ;;  %v1117_v10 = vadd.f32 %v1116_v21, %v1102_v4 }
 0x112   :  { %v1104_v25 = vmul.f32 %v5915_v9, %v5915_v9  ;;  %v1118_v37 = vadd.f32 %v1117_v10, %v1103_v8 }
 0x114   :  { %v1040_v14 = vpop.f32.mrf.mxu3 }
 0x115   :  { %v652_v13 = vpop.f32.mrf.mxu2 }
 0x116   :  { %v680_v0 = vadd.f32 %v652_v13, %v5816_v36 }
 0x118   :  { %v5920_v36 = vadd.f32 %v1038_v12, %v680_v0 }
 0x11a   :  { %v1105_v12 = vmul.f32 %v5920_v36, %v5920_v36 }
 0x11c   :  { %v1043_v19 = vpop.f32.mrf.mxu3 }
 0x11d   :  { %v654_v18 = vpop.f32.mrf.mxu2 }
 0x11e   :  { %v681_v17 = vadd.f32 %v654_v18, %v508_v1  ;;  %v1081_v18 = vadd.f32 %v1080_v48, %v5907_v63  ;;  %v5304_v48 = vld [vmem:[%s7549_s2 + $0xf8] sm:$0xff] }
 0x11f   :  { %3784 = vmatpush.bf16.msra.mxu3 %v5304_v48 }
 0x120   :  { %v5929_v28 = vadd.f32 %v1040_v14, %v681_v17  ;;  %v1082_v15 = vadd.f32 %v1081_v18, %v5915_v9 }
 0x122   :  { %v1083_v40 = vadd.f32 %v1082_v15, %v5920_v36  ;;  %v1106_v14 = vmul.f32 %v5929_v28, %v5929_v28  ;;  %v5296_v15 = vld [vmem:[%s7549_s2 + $0xb8] sm:$0xff] }
 0x123   :  { %3735 = vmatpush.bf16.msra.mxu2 %v5296_v15 }
 0x124   :  { %v1045_v26 = vpop.f32.mrf.mxu3  ;;  %v1084_v23 = vadd.f32 %v1083_v40, %v5929_v28  ;;  %v5278_v40 = vld [vmem:[%s7549_s2 + $0x28] sm:$0xff] }
 0x125   :  { %v657_v20 = vpop.f32.mrf.mxu2 }
 0x126   :  { %v682_v22 = vadd.f32 %v657_v20, %v5846_v3  ;;  %v1119_v20 = vadd.f32 %v1118_v37, %v1104_v25  ;;  %v5303_v37 = vld [vmem:[%s7549_s2 + $0xf0] sm:$0xff] }
 0x127   :  { %3785 = vmatpush.bf16.msra.mxu3 %v5303_v37  ;;  %v5298_v37 = vld [vmem:[%s7549_s2 + $0xc8] sm:$0xff] }
 0x128   :  { %v5936_v38 = vadd.f32 %v1043_v19, %v682_v22  ;;  %v1120_v44 = vadd.f32 %v1119_v20, %v1105_v12 }
 0x12a   :  { %v1107_v29 = vmul.f32 %v5936_v38, %v5936_v38  ;;  %v1121_v53 = vadd.f32 %v1120_v44, %v1106_v14  ;;  %v1085_v41 = vadd.f32 %v1084_v23, %v5936_v38  ;;  %v5302_v14 = vld [vmem:[%s7549_s2 + $0xe8] sm:$0xff] }
 0x12b   :  { %3786 = vmatpush.bf16.msra.mxu3 %v5302_v14  ;;  %v5297_v14 = vld [vmem:[%s7549_s2 + $0xc0] sm:$0xff] }
 0x12c   :  { %v1048_v46 = vpop.f32.mrf.mxu3  ;;  %v1122_v45 = vadd.f32 %v1121_v53, %v1107_v29  ;;  %v1356_v53 = vld [vmem:[#allocation2 + $0x94] sm:$0x1] }
 0x12d   :  { %v659_v31 = vpop.f32.mrf.mxu2 }
 0x12e   :  { %v683_v30 = vadd.f32 %v659_v31, %v513_v33  ;;  %v5280_v33 = vld [vmem:[%s7549_s2 + $0x38] sm:$0xff] }
 0x12f   :  { %3637 = vmatpush.bf16.msrb.mxu0 %v5280_v33  ;;  %v5275_v33 = vld [vmem:[%s7549_s2 + $0x10] sm:$0xff] }
 0x130   :  { %v5942_v31 = vadd.f32 %v1045_v26, %v683_v30  ;;  %v5279_v30 = vld [vmem:[%s7549_s2 + $0x30] sm:$0xff] }
 0x132   :  { %v1108_v26 = vmul.f32 %v5942_v31, %v5942_v31 }
 0x133   :  { %3638 = vmatpush.bf16.msrb.mxu0 %v5279_v30  ;;  %v5274_v30 = vld [vmem:[%s7549_s2 + $0x8] sm:$0xff] }
 0x134   :  { %v1050_v11 = vpop.f32.mrf.mxu3 }
 0x135   :  { %v662_v51 = vpop.f32.mrf.mxu2 }
 0x136   :  { %v684_v3 = vadd.f32 %v662_v51, %v5864_v24  ;;  %v1086_v51 = vadd.f32 %v1085_v41, %v5942_v31 }
 0x137   :  { %3639 = vmatpush.bf16.msrb.mxu0 %v5278_v40  ;;  %v1314_v40 = vld [vmem:[#allocation2 + $0x14] sm:$0x1] }
 0x138   :  { %v5947_v19 = vadd.f32 %v1048_v46, %v684_v3  ;;  %v523_v46 = vadd.f32 %v5876_v34, %v5880_v39 }
 0x13a   :  { %v1109_v54 = vmul.f32 %v5947_v19, %v5947_v19  ;;  %v1087_v56 = vadd.f32 %v1086_v51, %v5947_v19  ;;  %v5277_v51 = vld [vmem:[%s7549_s2 + $0x20] sm:$0xff] }
 0x13b   :  { %3640 = vmatpush.bf16.msrb.mxu0 %v5277_v51 }
 0x13c   :  { %v1053_v49 = vpop.f32.mrf.mxu3 }
 0x13d   :  { %v664_v13 = vpop.f32.mrf.mxu2 }
 0x13e   :  { %v685_v43 = vadd.f32 %v664_v13, %v518_v2 }
 0x140   :  { %v5953_v42 = vadd.f32 %v1050_v11, %v685_v43 }
 0x142   :  { %v1110_v57 = vmul.f32 %v5953_v42, %v5953_v42  ;;  %v1088_v62 = vadd.f32 %v1087_v56, %v5953_v42  ;;  %v5294_v56 = vld [vmem:[%s7549_s2 + $0xa8] sm:$0xff] }
 0x144   :  { %v1055_v5 = vpop.f32.mrf.mxu3 }
 0x145   :  { %v667_v52 = vpop.f32.mrf.mxu2 }
 0x146   :  { %v686_v24 = vadd.f32 %v667_v52, %v5878_v35  ;;  %v1123_v35 = vadd.f32 %v1122_v45, %v1108_v26  ;;  %v5288_v45 = vld [vmem:[%s7549_s2 + $0x78] sm:$0xff] }
 0x147   :  { %3686 = vmatpush.bf16.msrb.mxu1 %v5288_v45  ;;  %v1276_v45 = vld [vmem:[#allocation2 + $0x30] sm:$0x1] }
 0x148   :  { %v5958_v55 = vadd.f32 %v1053_v49, %v686_v24  ;;  %v1124_v61 = vadd.f32 %v1123_v35, %v1109_v54  ;;  %v5295_v49 = vld [vmem:[%s7549_s2 + $0xb0] sm:$0xff]  ;;  %v5301_v35 = vld [vmem:[%s7549_s2 + $0xe0] sm:$0xff] }
 0x149   :  { %v1306_v24 = vld [vmem:[#allocation2 + $0x90] sm:$0x1]  ;;  %3736 = vmatpush.bf16.msra.mxu2 %v5295_v49  ;;  %3787 = vmatpush.bf16.msra.mxu3 %v5301_v35 }
 0x14a   :  { %v1111_v0 = vmul.f32 %v5958_v55, %v5958_v55  ;;  %v1125_v7 = vadd.f32 %v1124_v61, %v1110_v57  ;;  %v1089_v4 = vadd.f32 %v1088_v62, %v5958_v55  ;;  %v1307_v41 = vsel %vm6002_vm7, 0, %v1306_v24  ;;  %v1261_v57 = vld [vmem:[#allocation2 + $0x8] sm:$0x1]  ;;  %v5287_v62 = vld [vmem:[%s7549_s2 + $0x70] sm:$0xff] }
 0x14b   :  { %1308 = vst [vmem:[#allocation2 + $0x90] sm:$0x1] %v1307_v41  ;;  %3687 = vmatpush.bf16.msrb.mxu1 %v5287_v62  ;;  %v1273_v24 = vld [vmem:[#allocation2 + $0x28] sm:$0x1]  ;;  %v5283_v41 = vld [vmem:[%s7549_s2 + $0x50] sm:$0xff] }
 0x14c   :  { %v1126_v34 = vadd.f32 %v1125_v7, %v1111_v0  ;;  %v1262_v0 = vsel %vm6002_vm7, 0, %v1261_v57  ;;  %v5276_v7 = vld [vmem:[%s7549_s2 + $0x18] sm:$0xff]  ;;  %v1274_v35 = vsel %vm6002_vm7, 0, %v1273_v24  ;;  %v1277_v57 = vsel %vm6002_vm7, 0, %v1276_v45 }
 0x14d   :  { %v669_v60 = vpop.f32.mrf.mxu2  ;;  %3737 = vmatpush.bf16.msra.mxu2 %v5294_v56  ;;  %1263 = vst [vmem:[#allocation2 + $0x8] sm:$0x1] %v1262_v0  ;;  %3641 = vmatpush.bf16.msrb.mxu0 %v5276_v7  ;;  %v1323_v56 = vld [vmem:[#allocation2 + $0x2c] sm:$0x1] }
 0x14e   :  { %v687_v1 = vadd.f32 %v669_v60, %v523_v46  ;;  %v1357_v46 = vsel %vm6009_vm8, 0, %v1356_v53  ;;  %v1311_v60 = vld [vmem:[#allocation2 + $0xc] sm:$0x1]  ;;  %1275 = vst [vmem:[#allocation2 + $0x28] sm:$0x1] %v1274_v35 }
 0x14f   :  { %1358 = vst [vmem:[#allocation2 + $0x94] sm:$0x1] %v1357_v46 }
 0x150   :  { %v5969_v11 = vadd.f32 %v1055_v5, %v687_v1  ;;  %v1312_v1 = vsel %vm6009_vm8, 0, %v1311_v60  ;;  %v1264_v5 = vld [vmem:[#allocation2 + $0x10] sm:$0x1]  ;;  %1278 = vst [vmem:[#allocation2 + $0x30] sm:$0x1] %v1277_v57 }
 0x151   :  { %1313 = vst [vmem:[#allocation2 + $0xc] sm:$0x1] %v1312_v1  ;;  %3642 = vmatpush.bf16.msrb.mxu0 %v5275_v33  ;;  %v6111_v1 = vld [vmem:[%s7551_s4] ss:$0 sm:$0xff] }
 0x152   :  { %v1090_v39 = vadd.f32 %v1089_v4, %v5969_v11  ;;  %v1112_v16 = vmul.f32 %v5969_v11, %v5969_v11  ;;  %v5300_v4 = vld [vmem:[%s7549_s2 + $0xd8] sm:$0xff] }
 0x153   :  { %3788 = vmatpush.bf16.msra.mxu3 %v5300_v4  ;;  %v1324_v4 = vsel %vm6009_vm8, 0, %v1323_v56 }
 0x154   :  { %v1091_v17 = vrot.slane %v1090_v39, 4  ;;  %v1127_v21 = vadd.f32 %v1126_v34, %v1112_v16  ;;  %v1265_v34 = vsel %vm6002_vm7, 0, %v1264_v5  ;;  %v5293_v16 = vld [vmem:[%s7549_s2 + $0xa0] sm:$0xff]  ;;  %1325 = vst [vmem:[#allocation2 + $0x2c] sm:$0x1] %v1324_v4 }
 0x155   :  { %1266 = vst [vmem:[#allocation2 + $0x10] sm:$0x1] %v1265_v34  ;;  %3738 = vmatpush.bf16.msra.mxu2 %v5293_v16  ;;  %3643 = vmatpush.bf16.msrb.mxu0 %v5274_v30 }
 0x156   :  { %v1092_v8 = vadd.f32 %v1091_v17, %v1090_v39  ;;  %v1128_v13 = vrot.slane %v1127_v21, 4  ;;  %v1267_v17 = vld [vmem:[#allocation2 + $0x18] sm:$0x1] }
 0x158   :  { %v1093_v22 = vrot.slane %v1092_v8, 2  ;;  %v1129_v10 = vadd.f32 %v1128_v13, %v1127_v21  ;;  %v1270_v21 = vld [vmem:[#allocation2 + $0x20] sm:$0x1]  ;;  %v1268_v13 = vsel %vm6002_vm7, 0, %v1267_v17 }
 0x159   :  { %1269 = vst [vmem:[#allocation2 + $0x18] sm:$0x1] %v1268_v13  ;;  %v1271_v48 = vsel %vm6002_vm7, 0, %v1270_v21 }
 0x15a   :  { %v1094_v25 = vadd.f32 %v1093_v22, %v1092_v8  ;;  %v1130_v18 = vrot.slane %v1129_v10, 2  ;;  %v5286_v8 = vld [vmem:[%s7549_s2 + $0x68] sm:$0xff]  ;;  %v5299_v22 = vld [vmem:[%s7549_s2 + $0xd0] sm:$0xff]  ;;  %1272 = vst [vmem:[#allocation2 + $0x20] sm:$0x1] %v1271_v48 }
 0x15b   :  { %3688 = vmatpush.bf16.msrb.mxu1 %v5286_v8  ;;  %3789 = vmatpush.bf16.msra.mxu3 %v5299_v22 }
 0x15c   :  { %v1095_v12 = vrot.slane %v1094_v25, 1  ;;  %v1131_v2 = vadd.f32 %v1130_v18, %v1129_v10  ;;  %v5292_v10 = vld [vmem:[%s7549_s2 + $0x98] sm:$0xff]  ;;  %v5411_v18 = vmov 0  }
 0x15d   :  { %3739 = vmatpush.bf16.msra.mxu2 %v5292_v10  ;;  %1248 = vst [vmem:[#allocation2] sm:$0xf] %v5411_v18 }
 0x15e   :  { %v1096_v3 = vadd.f32 %v1095_v12, %v1094_v25  ;;  %v1132_v20 = vrot.slane %v1131_v2, 1  ;;  %v5285_v25 = vld [vmem:[%s7549_s2 + $0x60] sm:$0xff]  ;;  %v5291_v12 = vld [vmem:[%s7549_s2 + $0x90] sm:$0xff]  ;;  %1249 = vst [vmem:[#allocation2 + $0x4] sm:$0xf] %v5411_v18 }
 0x15f   :  { %1250 = vst [vmem:[#allocation2 + $0x50] sm:$0xf] %v5411_v18  ;;  %3689 = vmatpush.bf16.msrb.mxu1 %v5285_v25  ;;  %3790 = vmatpush.bf16.msra.mxu3 %v5298_v37 }
 0x160   :  { %v1133_v43 = vadd.f32 %v1132_v20, %v1131_v2  ;;  %v5995_v44 = vmul.f32 0.0078125, %v1096_v3  ;;  %v5284_v3 = vld [vmem:[%s7549_s2 + $0x58] sm:$0xff]  ;;  %v5273_v20 = vld [vmem:[%s7549_s2] sm:$0xff]  ;;  %1251 = vst [vmem:[#allocation2 + $0x54] sm:$0xf] %v5411_v18 }
 0x161   :  { %3740 = vmatpush.bf16.msra.mxu2 %v5291_v12  ;;  %1253 = vst [vmem:[#allocation2 + $0x48] sm:$0xf] %v5411_v18  ;;  %3644 = vmatpush.bf16.msrb.mxu0 %v5273_v20 }
 0x162   :  { %v1135_v52 = vmul.f32 0.0078125, %v1133_v43  ;;  %v1136_v23 = vmul.f32 %v5995_v44, %v5995_v44  ;;  %v5290_v43 = vld [vmem:[%s7549_s2 + $0x88] sm:$0xff]  ;;  %1254 = vst [vmem:[#allocation2 + $0x4c] sm:$0xf] %v5411_v18  ;;  %v1154_v0 = vsub.f32 %v5969_v11, %v5995_v44  ;;  %v1139_v5 = vsub.f32 %v5882_v47, %v5995_v44  ;;  %v5289_v11 = vld [vmem:[%s7549_s2 + $0x80] sm:$0xff] }
 0x163   :  { %3690 = vmatpush.bf16.msrb.mxu1 %v5284_v3  ;;  %1255 = vst [vmem:[#allocation2 + $0x98] sm:$0xf] %v5411_v18  ;;  %3791 = vmatpush.bf16.msra.mxu3 %v5297_v14  ;;  %v1140_v7 = vsub.f32 %v5888_v32, %v5995_v44  ;;  %v6130_v47 = vld [vmem:[%s7551_s4 + $0x1] ss:$0 sm:$0xff]  ;;  %v1142_v8 = vsub.f32 %v5892_v50, %v5995_v44 }
 0x164   :  { %v1137_v54 = vsub.f32 %v1135_v52, %v1136_v23  ;;  %v1317_v52 = vld [vmem:[#allocation2 + $0x1c] sm:$0x1]  ;;  %v1315_v23 = vsel %vm6009_vm8, 0, %v1314_v40  ;;  %1256 = vst [vmem:[#allocation2 + $0x9c] sm:$0xf] %v5411_v18  ;;  %v1143_v13 = vsub.f32 %v5886_v6, %v5995_v44  ;;  %v1144_v33 = vsub.f32 %v5902_v58, %v5995_v44 }
 0x165   :  { %3741 = vmatpush.bf16.msra.mxu2 %v5290_v43  ;;  %v1318_v51 = vsel %vm6009_vm8, 0, %v1317_v52  ;;  %1316 = vst [vmem:[#allocation2 + $0x14] sm:$0x1] %v1315_v23  ;;  %v1617_v21 = vld [vmem:[#allocation2] sm:$0xf]  ;;  %v1145_v48 = vsub.f32 %v5907_v63, %v5995_v44  ;;  %v5312_v6 = vld [vmem:[%s7549_s2 + $0x138] sm:$0xff] }
 0x166   :  { %v1138_v61 = vmax.f32 %v1137_v54, 0.0  ;;  %v1320_v54 = vld [vmem:[#allocation2 + $0x24] sm:$0x1]  ;;  %1319 = vst [vmem:[#allocation2 + $0x1c] sm:$0x1] %v1318_v51  ;;  %v1650_v58 = vshrl.u32 %v1617_v21, 16  ;;  %3833 = vmatpush.bf16.msra.mxu0 %v5312_v6 }
 0x167   :  { %3691 = vmatpush.bf16.msrb.mxu1 %v5283_v41  ;;  %v1321_v62 = vsel %vm6009_vm8, 0, %v1320_v54  ;;  %v6148_v25 = vld [vmem:[#allocation2] sm:$0xe]  ;;  %v1653_v30 = vshll.u32 %v1617_v21, 16 }
 0x168   :  { %v6042_v39 = vadd.f32 1e-05, %v1138_v61  ;;  %v5282_v61 = vld [vmem:[%s7549_s2 + $0x48] sm:$0xff]  ;;  %1322 = vst [vmem:[#allocation2 + $0x24] sm:$0x1] %v1321_v62  ;;  %v4745_v40 = vrot.slane %v6148_v25, 9 }
 0x169   :  { %3742 = vmatpush.bf16.msra.mxu2 %v5289_v11  ;;  %v6165_v41 = vrot.slane %v1650_v58, 4  ;;  %v6170_v57 = vrot.slane %v1653_v30, 5  ;;  %v1633_v58 = vld [vmem:[#allocation2 + $0x4] sm:$0x1]  ;;  %v5319_v25 = vld [vmem:[%s7549_s2 + $0x170] sm:$0xff] }
 0x16a   :  { %5369 = vrsqrt.f32 %v6042_v39  ;;  %vm1162_vm10 = vweird.f32 %v6042_v39 }
 0x16b   :  { %3692 = vmatpush.bf16.msrb.mxu1 %v5282_v61 }
 0x170   :  { %v5370_v2 = vpop.eup %5369 }
 0x171   :  { %v1157_v15 = vmul.f32 %v5370_v2, %v6042_v39  ;;  %vm1163_vm9 = vweird.f32 %v5370_v2  ;;  %v1141_v39 = vsub.f32 %v5884_v59, %v5995_v44  ;;  %v5281_v59 = vld [vmem:[%s7549_s2 + $0x40] sm:$0xff] }
 0x172   :  { %vm1164_vm11 = vmor %vm1162_vm10, %vm1163_vm9  ;;  %3693 = vmatpush.bf16.msrb.mxu1 %v5281_v59 }
 0x173   :  { %v1158_v49 = vmul.f32 %v5370_v2, %v1157_v15 }
 0x175   :  { %v1159_v53 = vmul.f32 0.5, %v1158_v49 }
 0x177   :  { %v1160_v46 = vsub.f32 1.5, %v1159_v53 }
 0x179   :  { %v1161_v60 = vmul.f32 %v5370_v2, %v1160_v46 }
 0x17b   :  { %v6119_v34 = vsel %vm1164_vm11, %v5370_v2, %v1161_v60  ;;  %v5320_v60 = vld [vmem:[%s7549_s2 + $0x178] sm:$0xff] }
 0x17c   :  { %v1181_v16 = vmul.f32 %v6119_v34, %v1154_v0  ;;  %v1166_v32 = vmul.f32 %v6119_v34, %v1139_v5  ;;  %v1167_v17 = vmul.f32 %v6119_v34, %v1140_v7  ;;  %v1168_v18 = vmul.f32 %v6119_v34, %v1141_v39  ;;  %3882 = vmatpush.bf16.msra.mxu1 %v5320_v60 }
 0x17d   :  { %v1169_v37 = vmul.f32 %v6119_v34, %v1142_v8  ;;  %v1170_v12 = vmul.f32 %v6119_v34, %v1143_v13  ;;  %v1171_v49 = vmul.f32 %v6119_v34, %v1144_v33 }
 0x17e   :  { %v1198_v22 = vmul.f32 %v6111_v1, %v1181_v16  ;;  %v1183_v50 = vmul.f32 %v6111_v1, %v1166_v32  ;;  %v1184_v10 = vmul.f32 %v6111_v1, %v1167_v17  ;;  %v1185_v20 = vmul.f32 %v6111_v1, %v1168_v18  ;;  %v1611_v16 = vld [vmem:[#allocation2 + $0x90] sm:$0xf]  ;;  %v1614_v32 = vld [vmem:[#allocation2 + $0x94] sm:$0x1] }
 0x17f   :  { %v1186_v14 = vmul.f32 %v6111_v1, %v1169_v37  ;;  %v1187_v43 = vmul.f32 %v6111_v1, %v1170_v12  ;;  %v1188_v54 = vmul.f32 %v6111_v1, %v1171_v49  ;;  %v1527_v49 = vld [vmem:[#allocation2 + $0x10] sm:$0xf] }
 0x180   :  { %v1215_v2 = vadd.f32 %v6130_v47, %v1198_v22  ;;  %v1200_v15 = vadd.f32 %v6130_v47, %v1183_v50  ;;  %v1201_v3 = vadd.f32 %v6130_v47, %v1184_v10  ;;  %v1202_v53 = vadd.f32 %v6130_v47, %v1185_v20  ;;  %v1521_v22 = vld [vmem:[#allocation2 + $0x8] sm:$0xf]  ;;  %3883 = vmatpush.bf16.msra.mxu1 %v5319_v25 }
 0x181   :  { %v1203_v45 = vadd.f32 %v6130_v47, %v1186_v14  ;;  %v1204_v51 = vadd.f32 %v6130_v47, %v1187_v43  ;;  %v1205_v5 = vadd.f32 %v6130_v47, %v1188_v54  ;;  %v1524_v14 = vld [vmem:[#allocation2 + $0xc] sm:$0x1]  ;;  %v1926_v54 = vrot.slane %v1633_v58, 5 }
 0x182   :  { %v1231_v52 = vmax.f32 %v1215_v2, 0.0  ;;  %v1216_v23 = vmax.f32 %v1200_v15, 0.0  ;;  %v1217_v24 = vmax.f32 %v1201_v3, 0.0  ;;  %v1218_v61 = vmax.f32 %v1202_v53, 0.0 }
 0x183   :  { %v1219_v62 = vmax.f32 %v1203_v45, 0.0  ;;  %v1220_v0 = vmax.f32 %v1204_v51, 0.0  ;;  %v1221_v10 = vmax.f32 %v1205_v5, 0.0  ;;  %v1656_v5 = vor.u32 %v6170_v57, %v6165_v41 }
 0x184   :  { %v1247_v46 = vpack.c.bf16 %v1231_v52, %v1231_v52  ;;  %v1232_v35 = vpack.c.bf16 %v1216_v23, %v1216_v23  ;;  %v1233_v56 = vpack.c.bf16 %v1217_v24, %v1217_v24  ;;  %v1234_v8 = vpack.c.bf16 %v1218_v61, %v1218_v61 }
 0x185   :  { %v1235_v59 = vpack.c.bf16 %v1219_v62, %v1219_v62  ;;  %v6176_v50 = vpack.c.bf16 %v1220_v0, %v1220_v0  ;;  %v1539_v62 = vld [vmem:[#allocation2 + $0x20] sm:$0xf]  ;;  %v1927_v63 = vsel %vm6207_vm0, %v4745_v40, %v1926_v54 }
 0x186   :  { %v1480_v7 = vshrl.u32 %v1247_v46, 16  ;;  %v1483_v4 = vshll.u32 %v1247_v46, 16  ;;  %v1360_v11 = vshrl.u32 %v1232_v35, 16  ;;  %v1363_v39 = vshll.u32 %v1232_v35, 16  ;;  %v1533_v46 = vld [vmem:[#allocation2 + $0x18] sm:$0xf] }
 0x187   :  { %v1368_v17 = vshrl.u32 %v1233_v56, 16  ;;  %v1371_v21 = vshll.u32 %v1233_v56, 16  ;;  %v1376_v30 = vshrl.u32 %v1234_v8, 16  ;;  %v1379_v37 = vshll.u32 %v1234_v8, 16 }
 0x188   :  { %v1482_v13 = vrot.slane %v1480_v7, 7  ;;  %v1362_v33 = vrot.slane %v1360_v11, 7  ;;  %v1384_v12 = vshrl.u32 %v1235_v59, 16  ;;  %v1387_v24 = vshll.u32 %v1235_v59, 16  ;;  %v1530_v11 = vld [vmem:[#allocation2 + $0x14] sm:$0x1] }
 0x189   :  { %v1370_v6 = vrot.slane %v1368_v17, 7  ;;  %v1378_v52 = vrot.slane %v1376_v30, 7  ;;  %v1659_v56 = vshll.u32 %v1633_v58, 16  ;;  %v1392_v17 = vshrl.u32 %v6176_v50, 16  ;;  %v6228_v30 = vld [vmem:[#allocation2 + $0x38] sm:$0x1] }
 0x18a   :  { %v1485_v2 = vor.u32 %v1483_v4, %v1482_v13  ;;  %v1486_v15 = vrot.slane %v1482_v13, 4  ;;  %v1365_v3 = vor.u32 %v1363_v39, %v1362_v33  ;;  %v1366_v20 = vrot.slane %v1362_v33, 4  ;;  %v4795_v33 = vld [vmem:[#allocation2] sm:$0xf] }
 0x18b   :  { %v1373_v43 = vor.u32 %v1371_v21, %v1370_v6  ;;  %v6184_v23 = vrot.slane %v1384_v12, 7  ;;  %v1381_v60 = vor.u32 %v1379_v37, %v1378_v52  ;;  %v1382_v7 = vrot.slane %v1378_v52, 4 }
 0x18c   :  { %v1612_v53 = vsel %vm6180_vm15, %v1485_v2, %v1611_v16  ;;  %v1615_v45 = vsel %vm6002_vm7, %v1486_v15, %v1614_v32  ;;  %v1522_v51 = vsel %vm6180_vm15, %v1365_v3, %v1521_v22  ;;  %v1525_v35 = vsel %vm6002_vm7, %v1366_v20, %v1524_v14  ;;  %v1536_v16 = vld [vmem:[#allocation2 + $0x1c] sm:$0x1]  ;;  %v5311_v32 = vld [vmem:[%s7549_s2 + $0x130] sm:$0xff]  ;;  %v6234_v2 = vld [vmem:[#allocation2 + $0x40] sm:$0x1] }
 0x18d   :  { %1613 = vst [vmem:[#allocation2 + $0x90] sm:$0xf] %v1612_v53  ;;  %v1389_v61 = vor.u32 %v1387_v24, %v6184_v23  ;;  %v1528_v0 = vsel %vm6180_vm15, %v1373_v43, %v1527_v49  ;;  %v1374_v4 = vrot.slane %v1370_v6, 4  ;;  %v1534_v39 = vsel %vm6180_vm15, %v1381_v60, %v1533_v46  ;;  %3834 = vmatpush.bf16.msra.mxu0 %v5311_v32  ;;  %v1545_v24 = vld [vmem:[#allocation2 + $0x28] sm:$0xf] }
 0x18e   :  { %1616 = vst [vmem:[#allocation2 + $0x94] sm:$0x1] %v1615_v45  ;;  %v1237_v21 = vpack.c.bf16 %v1221_v10, %v1221_v10  ;;  %v1172_v8 = vmul.f32 %v6119_v34, %v1145_v48  ;;  %v1657_v22 = vrot.slane %v1656_v5, 4  ;;  %v1661_v10 = vrot.slane %v1659_v56, 5  ;;  %v6244_v53 = vld [vmem:[#allocation2 + $0x34] sm:$0x1] }
 0x18f   :  { %1523 = vst [vmem:[#allocation2 + $0x8] sm:$0xf] %v1522_v51  ;;  %v1540_v57 = vsel %vm6180_vm15, %v1389_v61, %v1539_v62  ;;  %v1531_v59 = vsel %vm6002_vm7, %v1374_v4, %v1530_v11  ;;  %v1537_v6 = vsel %vm6002_vm7, %v1382_v7, %v1536_v16  ;;  %v6226_v48 = vrot.slane %v1392_v17, 7  ;;  %v1551_v60 = vld [vmem:[#allocation2 + $0x30] sm:$0xf] }
 0x190   :  { %1526 = vst [vmem:[#allocation2 + $0xc] sm:$0x1] %v1525_v35  ;;  %v1400_v13 = vshrl.u32 %v1237_v21, 16  ;;  %v1189_v58 = vmul.f32 %v6111_v1, %v1172_v8  ;;  %v1146_v12 = vsub.f32 %v5915_v9, %v5995_v44  ;;  %v1390_v15 = vrot.slane %v6184_v23, 4  ;;  %v6246_v23 = vld [vmem:[#allocation2 + $0x3c] sm:$0x1] }
 0x191   :  { %1529 = vst [vmem:[#allocation2 + $0x10] sm:$0xf] %v1528_v0  ;;  %v1395_v40 = vshll.u32 %v6176_v50, 16  ;;  %v1403_v3 = vshll.u32 %v1237_v21, 16  ;;  %v2805_v52 = vunpack.c.l.b16 %v1927_v63  ;;  %v1662_v9 = vsel %vm5488_vm3, %v1657_v22, %v1661_v10  ;;  %v1542_v16 = vld [vmem:[#allocation2 + $0x24] sm:$0x1] }
 0x192   :  { %1535 = vst [vmem:[#allocation2 + $0x18] sm:$0xf] %v1534_v39  ;;  %v6230_v37 = vrot.slane %v1400_v13, 7  ;;  %v1206_v20 = vadd.f32 %v6130_v47, %v1189_v58  ;;  %v1147_v45 = vsub.f32 %v5920_v36, %v5995_v44  ;;  %v1148_v50 = vsub.f32 %v5929_v28, %v5995_v44  ;;  %v1548_v13 = vld [vmem:[#allocation2 + $0x2c] sm:$0x1] }
 0x193   :  { %1541 = vst [vmem:[#allocation2 + $0x20] sm:$0xf] %v1540_v57  ;;  %v1397_v56 = vor.u32 %v1395_v40, %v6226_v48  ;;  %v1280_v61 = vsel %vm6002_vm7, 0, %v6228_v30  ;;  %v1398_v39 = vrot.slane %v6226_v48, 4  ;;  %v1283_v17 = vsel %vm6002_vm7, 0, %v6234_v2 }
 0x194   :  { %1532 = vst [vmem:[#allocation2 + $0x14] sm:$0x1] %v1531_v59  ;;  %v1405_v4 = vor.u32 %v1403_v3, %v6230_v37  ;;  %v1222_v32 = vmax.f32 %v1206_v20, 0.0  ;;  %v1327_v10 = vsel %vm6009_vm8, 0, %v6244_v53  ;;  %v2773_v63 = vunpack.c.l.b16 %v1662_v9 }
 0x195   :  { %1538 = vst [vmem:[#allocation2 + $0x1c] sm:$0x1] %v1537_v6  ;;  %v1546_v22 = vsel %vm6180_vm15, %v1397_v56, %v1545_v24  ;;  %v1330_v6 = vsel %vm6009_vm8, 0, %v6246_v23  ;;  %v1543_v40 = vsel %vm6002_vm7, %v1390_v15, %v1542_v16  ;;  %v1173_v9 = vmul.f32 %v6119_v34, %v1146_v12  ;;  %v5310_v16 = vld [vmem:[%s7549_s2 + $0x128] sm:$0xff] }
 0x196   :  { %v5249_v14 = vld [vmem:[#allocation2 + $0x4] sm:$0xf0]  ;;  %v1552_v25 = vsel %vm6180_vm15, %v1405_v4, %v1551_v60  ;;  %v6281_v24 = vpack.c.bf16 %v1222_v32, %v1222_v32  ;;  %1547 = vst [vmem:[#allocation2 + $0x28] sm:$0xf] %v1546_v22  ;;  %v6285_v60 = vld [vmem:[#allocation2 + $0x58] sm:$0x1]  ;;  %3835 = vmatpush.bf16.msra.mxu0 %v5310_v16 }
 0x197   :  { %v4827_v43 = vld [vmem:[#allocation2 + $0x8] sm:$0xf]  ;;  %v4796_v51 = vor.u32 %v5249_v14, %v4795_v33  ;;  %v1634_v54 = vld [vmem:[#allocation2 + $0xc] sm:$0x1]  ;;  %1553 = vst [vmem:[#allocation2 + $0x30] sm:$0xf] %v1552_v25  ;;  %v1190_v28 = vmul.f32 %v6111_v1, %v1173_v9 }
 0x198   :  { %v1874_v49 = vld [vmem:[#allocation2 + $0x8] sm:$0xe]  ;;  %v5257_v62 = vld [vmem:[#allocation2 + $0xc] sm:$0xf0]  ;;  %v1930_v0 = vrot.slane %v1634_v54, 5  ;;  %v1673_v59 = vshll.u32 %v1634_v54, 16 }
 0x199   :  { %v4746_v46 = vrot.slane %v1874_v49, 9  ;;  %v1618_v35 = vld [vmem:[#allocation2 + $0x8] sm:$0xf]  ;;  %3645 = vmatmul.bf16.vlgmr.msrb.gmra.mxu0 %v4796_v51  ;;  %v4828_v11 = vor.u32 %v5257_v62, %v4827_v43  ;;  %v1875_v30 = vld [vmem:[#allocation2 + $0x10] sm:$0xe]  ;;  %v1549_v49 = vsel %vm6002_vm7, %v1398_v39, %v1548_v13  ;;  %v1406_v39 = vrot.slane %v6230_v37, 4 }
 0x19a   :  { %v1664_v5 = vshrl.u32 %v1618_v35, 16  ;;  %v1667_v7 = vshll.u32 %v1618_v35, 16  ;;  %v1876_v2 = vld [vmem:[#allocation2 + $0x18] sm:$0xe]  ;;  %v1619_v14 = vld [vmem:[#allocation2 + $0x10] sm:$0xf] }
 0x19b   :  { %v1931_v21 = vsel %vm6207_vm0, %v4746_v46, %v1930_v0  ;;  %3792 = vmatmul.bf16.vlgmr.msra.gmra.mxu3 %v4828_v11  ;;  %v6271_v48 = vld [vmem:[#allocation2 + $0x14] sm:$0x1]  ;;  %v1620_v43 = vld [vmem:[#allocation2 + $0x18] sm:$0xf]  ;;  %v1675_v51 = vrot.slane %v1673_v59, 5  ;;  %v1678_v54 = vshrl.u32 %v1619_v14, 16  ;;  %v1175_v59 = vmul.f32 %v6119_v34, %v1148_v50 }
 0x19c   :  { %v1666_v57 = vrot.slane %v1664_v5, 4  ;;  %v1669_v8 = vrot.slane %v1667_v7, 5  ;;  %v2806_v33 = vunpack.c.l.b16 %v1931_v21  ;;  %v6277_v20 = vld [vmem:[#allocation2 + $0x1c] sm:$0x1]  ;;  %v1681_v46 = vshll.u32 %v1619_v14, 16 }
 0x19d   :  { %v4747_v35 = vrot.slane %v1875_v30, 9  ;;  %v1934_v15 = vrot.slane %v6271_v48, 5  ;;  %v1692_v56 = vshrl.u32 %v1620_v43, 16  ;;  %v1938_v0 = vrot.slane %v6277_v20, 5  ;;  %1544 = vst [vmem:[#allocation2 + $0x24] sm:$0x1] %v1543_v40 }
 0x19e   :  { %v1670_v58 = vor.u32 %v1669_v8, %v1666_v57  ;;  %v2821_v3 = vpack.c.b16 %v2806_v33, %v2805_v52  ;;  %v4748_v52 = vrot.slane %v1876_v2, 9  ;;  %v1680_v12 = vrot.slane %v1678_v54, 4  ;;  %1550 = vst [vmem:[#allocation2 + $0x2c] sm:$0x1] %v1549_v49  ;;  %v4799_v32 = vld [vmem:[#allocation2 + $0x10] sm:$0xf] }
 0x19f   :  { %v1683_v5 = vrot.slane %v1681_v46, 5  ;;  %v1694_v4 = vrot.slane %v1692_v56, 4  ;;  %v1695_v11 = vshll.u32 %v1620_v43, 16  ;;  %v5250_v21 = vld [vmem:[#allocation2 + $0x14] sm:$0xf0]  ;;  %v1174_v8 = vmul.f32 %v6119_v34, %v1147_v45  ;;  %v5318_v54 = vld [vmem:[%s7549_s2 + $0x168] sm:$0xff] }
 0x1a0   :  { %v1671_v53 = vrot.slane %v1670_v58, 4  ;;  %3743 = vmatmul.bf16.vlgmr.msra.gmra.mxu2 %v2821_v3  ;;  %1281 = vst [vmem:[#allocation2 + $0x38] sm:$0x1] %v1280_v61  ;;  %v4831_v33 = vld [vmem:[#allocation2 + $0x18] sm:$0xf]  ;;  %v1935_v22 = vsel %vm6207_vm0, %v4747_v35, %v1934_v15  ;;  %v1687_v58 = vshll.u32 %v6271_v48, 16  ;;  %v1939_v36 = vsel %vm6207_vm0, %v4748_v52, %v1938_v0  ;;  %3884 = vmatpush.bf16.msra.mxu1 %v5318_v54 }
 0x1a1   :  { %v1684_v57 = vor.u32 %v1683_v5, %v1680_v12  ;;  %v1697_v30 = vrot.slane %v1695_v11, 5  ;;  %1284 = vst [vmem:[#allocation2 + $0x40] sm:$0x1] %v1283_v17  ;;  %v6307_v61 = vld [vmem:[#allocation2 + $0x20] sm:$0xe]  ;;  %v1408_v45 = vshrl.u32 %v6281_v24, 16  ;;  %v1149_v40 = vsub.f32 %v5936_v38, %v5995_v44 }
 0x1a2   :  { %v1676_v62 = vsel %vm5488_vm3, %v1671_v53, %v1675_v51  ;;  %1328 = vst [vmem:[#allocation2 + $0x34] sm:$0x1] %v1327_v10  ;;  %v1286_v50 = vsel %vm6002_vm7, 0, %v6285_v60  ;;  %v1701_v17 = vshll.u32 %v6277_v20, 16  ;;  %v1621_v25 = vld [vmem:[#allocation2 + $0x20] sm:$0xf]  ;;  %v4800_v3 = vor.u32 %v5250_v21, %v4799_v32 }
 0x1a3   :  { %v2774_v7 = vunpack.c.l.b16 %v1676_v62  ;;  %v1685_v48 = vrot.slane %v1684_v57, 4  ;;  %v1698_v2 = vor.u32 %v1697_v30, %v1694_v4  ;;  %v2807_v14 = vunpack.c.l.b16 %v1935_v22  ;;  %v6323_v46 = vld [vmem:[#allocation2 + $0x28] sm:$0xe]  ;;  %1331 = vst [vmem:[#allocation2 + $0x3c] sm:$0x1] %v1330_v6 }
 0x1a4   :  { %v1191_v43 = vmul.f32 %v6111_v1, %v1174_v8  ;;  %v1192_v10 = vmul.f32 %v6111_v1, %v1175_v59  ;;  %v2808_v49 = vunpack.c.l.b16 %v1939_v36  ;;  %v1689_v9 = vrot.slane %v1687_v58, 5  ;;  %v1622_v35 = vld [vmem:[#allocation2 + $0x28] sm:$0xf]  ;;  %v6329_v12 = vld [vmem:[#allocation2 + $0x24] sm:$0x1] }
 0x1a5   :  { %v2789_v13 = vpack.c.b16 %v2774_v7, %v2773_v63  ;;  %v5258_v63 = vld [vmem:[#allocation2 + $0x1c] sm:$0xf0]  ;;  %v1699_v53 = vrot.slane %v1698_v2, 4  ;;  %v4749_v51 = vrot.slane %v6307_v61, 9  ;;  %v1706_v38 = vshrl.u32 %v1621_v25, 16 }
 0x1a6   :  { %v4832_v20 = vor.u32 %v5258_v63, %v4831_v33  ;;  %v1410_v15 = vrot.slane %v1408_v45, 7  ;;  %v1207_v52 = vadd.f32 %v6130_v47, %v1190_v28  ;;  %v1690_v56 = vsel %vm5488_vm3, %v1685_v48, %v1689_v9  ;;  %v6331_v5 = vld [vmem:[#allocation2 + $0x2c] sm:$0x1]  ;;  %1287 = vst [vmem:[#allocation2 + $0x58] sm:$0x1] %v1286_v50 }
 0x1a7   :  { %3694 = vmatmul.bf16.vlgmr.msrb.gmra.mxu1 %v2789_v13  ;;  %v1703_v60 = vrot.slane %v1701_v17, 5  ;;  %v1709_v62 = vshll.u32 %v1621_v25, 16  ;;  %v1411_v0 = vshll.u32 %v6281_v24, 16  ;;  %v1208_v7 = vadd.f32 %v6130_v47, %v1191_v43  ;;  %v1557_v57 = vld [vmem:[#allocation2 + $0x38] sm:$0xf]  ;;  %v5309_v17 = vld [vmem:[%s7549_s2 + $0x120] sm:$0xff] }
 0x1a8   :  { %v1209_v4 = vadd.f32 %v6130_v47, %v1192_v10  ;;  %v1176_v11 = vmul.f32 %v6119_v34, %v1149_v40  ;;  %v2822_v16 = vpack.c.b16 %v2808_v49, %v2807_v14  ;;  %v4750_v32 = vrot.slane %v6323_v46, 9  ;;  %v1288_v36 = vld [vmem:[#allocation2 + $0x60] sm:$0x1]  ;;  %v1335_v25 = vld [vmem:[#allocation2 + $0x5c] sm:$0x1]  ;;  %3836 = vmatpush.bf16.msra.mxu0 %v5309_v17 }
 0x1a9   :  { %3650 = vmatmul.bf16.gmra.mxu0 %v4800_v3  ;;  %v1704_v24 = vsel %vm5488_vm3, %v1699_v53, %v1703_v60  ;;  %v1720_v21 = vshrl.u32 %v1622_v35, 16  ;;  %v1554_v8 = vld [vmem:[#allocation2 + $0x34] sm:$0x1]  ;;  %v2775_v59 = vunpack.c.l.b16 %v1690_v56  ;;  %v6343_v13 = vrot.slane %v1706_v38, 4  ;;  %v5251_v10 = vld [vmem:[#allocation2 + $0x24] sm:$0xf0] }
 0x1aa   :  { %v1723_v23 = vshll.u32 %v1622_v35, 16  ;;  %v1413_v6 = vor.u32 %v1411_v0, %v1410_v15  ;;  %v1942_v33 = vrot.slane %v6329_v12, 5  ;;  %v1946_v22 = vrot.slane %v6331_v5, 5  ;;  %v1560_v54 = vld [vmem:[#allocation2 + $0x3c] sm:$0x1] }
 0x1ab   :  { %3797 = vmatmul.bf16.gmra.mxu3 %v4832_v20  ;;  %v1711_v58 = vrot.slane %v1709_v62, 5  ;;  %v1223_v30 = vmax.f32 %v1207_v52, 0.0  ;;  %v2776_v45 = vunpack.c.l.b16 %v1704_v24  ;;  %v1414_v28 = vrot.slane %v1410_v15, 4  ;;  %v1623_v20 = vld [vmem:[#allocation2 + $0x30] sm:$0xf]  ;;  %v5317_v24 = vld [vmem:[%s7549_s2 + $0x160] sm:$0xff] }
 0x1ac   :  { %v1558_v63 = vsel %vm6180_vm15, %v1413_v6, %v1557_v57  ;;  %v1555_v48 = vsel %vm6002_vm7, %v1406_v39, %v1554_v8  ;;  %v1722_v2 = vrot.slane %v1720_v21, 4  ;;  %v1150_v40 = vsub.f32 %v5942_v31, %v5995_v44  ;;  %v4803_v39 = vld [vmem:[#allocation2 + $0x20] sm:$0xf]  ;;  %v4835_v35 = vld [vmem:[#allocation2 + $0x28] sm:$0xf]  ;;  %3885 = vmatpush.bf16.msra.mxu1 %v5317_v24 }
 0x1ad   :  { %1559 = vst [vmem:[#allocation2 + $0x38] sm:$0xf] %v1558_v63  ;;  %v1239_v50 = vpack.c.bf16 %v1223_v30, %v1223_v30  ;;  %v1725_v3 = vrot.slane %v1723_v23, 5  ;;  %v1224_v14 = vmax.f32 %v1208_v7, 0.0  ;;  %v1225_v43 = vmax.f32 %v1209_v4, 0.0 }
 0x1ae   :  { %1556 = vst [vmem:[#allocation2 + $0x34] sm:$0x1] %v1555_v48  ;;  %v1289_v37 = vsel %vm6002_vm7, 0, %v1288_v36  ;;  %v1712_v49 = vor.u32 %v1711_v58, %v6343_v13  ;;  %v1715_v9 = vshll.u32 %v6329_v12, 16  ;;  %v1193_v46 = vmul.f32 %v6111_v1, %v1176_v11  ;;  %v5259_v38 = vld [vmem:[#allocation2 + $0x2c] sm:$0xf0] }
 0x1af   :  { %v1416_v53 = vshrl.u32 %v1239_v50, 16  ;;  %v2790_v31 = vpack.c.b16 %v2776_v45, %v2775_v59  ;;  %v1943_v15 = vsel %vm6207_vm0, %v4749_v51, %v1942_v33  ;;  %v1561_v52 = vsel %vm6002_vm7, %v1414_v28, %v1560_v54  ;;  %1290 = vst [vmem:[#allocation2 + $0x60] sm:$0x1] %v1289_v37  ;;  %v1563_v4 = vld [vmem:[#allocation2 + $0x40] sm:$0xf] }
 0x1b0   :  { %3748 = vmatmul.bf16.gmra.mxu2 %v2822_v16  ;;  %v1240_v56 = vpack.c.bf16 %v1224_v14, %v1224_v14  ;;  %v1419_v62 = vshll.u32 %v1239_v50, 16  ;;  %1562 = vst [vmem:[#allocation2 + $0x3c] sm:$0x1] %v1561_v52  ;;  %v1241_v0 = vpack.c.bf16 %v1225_v43, %v1225_v43  ;;  %v1336_v12 = vsel %vm6009_vm8, 0, %v1335_v25  ;;  %v1879_v48 = vld [vmem:[#allocation2 + $0x30] sm:$0xe] }
 0x1b1   :  { %v6369_v60 = vrot.slane %v1416_v53, 7  ;;  %v1947_v7 = vsel %vm6207_vm0, %v4750_v32, %v1946_v22  ;;  %v1726_v61 = vor.u32 %v1725_v3, %v1722_v2  ;;  %v1734_v11 = vshrl.u32 %v1623_v20, 16  ;;  %1337 = vst [vmem:[#allocation2 + $0x5c] sm:$0x1] %v1336_v12 }
 0x1b2   :  { %v1737_v51 = vshll.u32 %v1623_v20, 16  ;;  %v1424_v21 = vshrl.u32 %v1240_v56, 16  ;;  %v1432_v57 = vshrl.u32 %v1241_v0, 16  ;;  %v1177_v8 = vmul.f32 %v6119_v34, %v1150_v40  ;;  %v1569_v40 = vld [vmem:[#allocation2 + $0x58] sm:$0xf] }
 0x1b3   :  { %v1421_v16 = vor.u32 %v1419_v62, %v6369_v60  ;;  %v4804_v59 = vor.u32 %v5251_v10, %v4803_v39  ;;  %v4836_v13 = vor.u32 %v5259_v38, %v4835_v35  ;;  %v1717_v23 = vrot.slane %v1715_v9, 5 }
 0x1b4   :  { %v1729_v32 = vshll.u32 %v6331_v5, 16  ;;  %v2809_v6 = vunpack.c.l.b16 %v1943_v15  ;;  %v2810_v33 = vunpack.c.l.b16 %v1947_v7  ;;  %v1713_v22 = vrot.slane %v1712_v49, 4  ;;  %v1624_v30 = vld [vmem:[#allocation2 + $0x38] sm:$0xf]  ;;  %v1291_v7 = vld [vmem:[#allocation2 + $0x68] sm:$0x1] }
 0x1b5   :  { %v1564_v58 = vsel %vm6180_vm15, %v1421_v16, %v1563_v4  ;;  %v1727_v36 = vrot.slane %v1726_v61, 4  ;;  %v1736_v45 = vrot.slane %v1734_v11, 4  ;;  %v1739_v28 = vrot.slane %v1737_v51, 5  ;;  %v1639_v53 = vld [vmem:[#allocation2 + $0x34] sm:$0x1] }
 0x1b6   :  { %1565 = vst [vmem:[#allocation2 + $0x40] sm:$0xf] %v1564_v58  ;;  %v1427_v63 = vshll.u32 %v1240_v56, 16  ;;  %v1748_v2 = vshrl.u32 %v1624_v30, 16  ;;  %v1751_v50 = vshll.u32 %v1624_v30, 16  ;;  %v1426_v17 = vrot.slane %v1424_v21, 7 }
 0x1b7   :  { %3699 = vmatmul.bf16.gmra.mxu1 %v2790_v31  ;;  %v6383_v25 = vrot.slane %v1432_v57, 7  ;;  %v1731_v5 = vrot.slane %v1729_v32, 5  ;;  %v1435_v3 = vshll.u32 %v1241_v0, 16  ;;  %v1194_v14 = vmul.f32 %v6111_v1, %v1177_v8  ;;  %v1575_v10 = vld [vmem:[#allocation2 + $0x60] sm:$0xf]  ;;  %v5308_v57 = vld [vmem:[%s7549_s2 + $0x118] sm:$0xff] }
 0x1b8   :  { %v2823_v43 = vpack.c.b16 %v2810_v33, %v2809_v6  ;;  %v1718_v37 = vsel %vm5488_vm3, %v1713_v22, %v1717_v23  ;;  %v1429_v39 = vor.u32 %v1427_v63, %v1426_v17  ;;  %v1210_v49 = vadd.f32 %v6130_v47, %v1193_v46  ;;  %v1572_v35 = vld [vmem:[#allocation2 + $0x5c] sm:$0x1]  ;;  %v1880_v15 = vld [vmem:[#allocation2 + $0x38] sm:$0xe]  ;;  %v1294_v4 = vld [vmem:[#allocation2 + $0x70] sm:$0x1]  ;;  %3837 = vmatpush.bf16.msra.mxu0 %v5308_v57 }
 0x1b9   :  { %3655 = vmatmul.bf16.gmra.mxu0 %v4804_v59  ;;  %v1732_v9 = vsel %vm5488_vm3, %v1727_v36, %v1731_v5  ;;  %v4751_v54 = vrot.slane %v1879_v48, 9  ;;  %v1430_v20 = vrot.slane %v1426_v17, 4  ;;  %v1437_v31 = vor.u32 %v1435_v3, %v6383_v25  ;;  %v6392_v38 = vld [vmem:[#allocation2 + $0x3c] sm:$0x1]  ;;  %v4807_v23 = vld [vmem:[#allocation2 + $0x30] sm:$0xf] }
 0x1ba   :  { %v1740_v52 = vor.u32 %v1739_v28, %v1736_v45  ;;  %v1750_v56 = vrot.slane %v1748_v2, 4  ;;  %v1753_v62 = vrot.slane %v1751_v50, 5  ;;  %v1570_v0 = vsel %vm6180_vm15, %v1429_v39, %v1569_v40  ;;  %v6408_v6 = vld [vmem:[#allocation2 + $0x50] sm:$0xe]  ;;  %v5252_v33 = vld [vmem:[#allocation2 + $0x34] sm:$0xf0] }
 0x1bb   :  { %3802 = vmatmul.bf16.gmra.mxu3 %v4836_v13  ;;  %v2777_v12 = vunpack.c.l.b16 %v1718_v37  ;;  %1571 = vst [vmem:[#allocation2 + $0x58] sm:$0xf] %v1570_v0  ;;  %v1576_v46 = vsel %vm6180_vm15, %v1437_v31, %v1575_v10  ;;  %v1211_v61 = vadd.f32 %v6130_v47, %v1194_v14  ;;  %v1151_v11 = vsub.f32 %v5947_v19, %v5995_v44  ;;  %v6410_v22 = vld [vmem:[#allocation2 + $0x54] sm:$0x1]  ;;  %v1338_v2 = vld [vmem:[#allocation2 + $0x64] sm:$0x1] }
 0x1bc   :  { %v2778_v51 = vunpack.c.l.b16 %v1732_v9  ;;  %v1950_v16 = vrot.slane %v1639_v53, 5  ;;  %v1743_v24 = vshll.u32 %v1639_v53, 16  ;;  %1577 = vst [vmem:[#allocation2 + $0x60] sm:$0xf] %v1576_v46  ;;  %v1573_v21 = vsel %vm6002_vm7, %v1430_v20, %v1572_v35  ;;  %v1341_v40 = vld [vmem:[#allocation2 + $0x6c] sm:$0x1] }
 0x1bd   :  { %v4752_v8 = vrot.slane %v1880_v15, 9  ;;  %v1954_v59 = vrot.slane %v6392_v38, 5  ;;  %1574 = vst [vmem:[#allocation2 + $0x5c] sm:$0x1] %v1573_v21  ;;  %v1178_v13 = vmul.f32 %v6119_v34, %v1151_v11  ;;  %v1741_v19 = vrot.slane %v1740_v52, 4  ;;  %v5316_v31 = vld [vmem:[%s7549_s2 + $0x158] sm:$0xff] }
 0x1be   :  { %v1754_v32 = vor.u32 %v1753_v62, %v1750_v56  ;;  %v1226_v58 = vmax.f32 %v1210_v49, 0.0  ;;  %v1292_v30 = vsel %vm6002_vm7, 0, %v1291_v7  ;;  %v1227_v36 = vmax.f32 %v1211_v61, 0.0  ;;  %v1625_v37 = vld [vmem:[#allocation2 + $0x50] sm:$0xf]  ;;  %3886 = vmatpush.bf16.msra.mxu1 %v5316_v31 }
 0x1bf   :  { %v1295_v45 = vsel %vm6002_vm7, 0, %v1294_v4  ;;  %v2791_v28 = vpack.c.b16 %v2778_v51, %v2777_v12  ;;  %v1951_v63 = vsel %vm6207_vm0, %v4751_v54, %v1950_v16  ;;  %v1745_v48 = vrot.slane %v1743_v24, 5  ;;  %1293 = vst [vmem:[#allocation2 + $0x68] sm:$0x1] %v1292_v30  ;;  %v5260_v9 = vld [vmem:[#allocation2 + $0x3c] sm:$0xf0] }
 0x1c0   :  { %3753 = vmatmul.bf16.gmra.mxu2 %v2823_v43  ;;  %v1955_v50 = vsel %vm6207_vm0, %v4752_v8, %v1954_v59  ;;  %v1757_v17 = vshll.u32 %v6392_v38, 16  ;;  %v1242_v5 = vpack.c.bf16 %v1226_v58, %v1226_v58  ;;  %1296 = vst [vmem:[#allocation2 + $0x70] sm:$0x1] %v1295_v45  ;;  %v1195_v3 = vmul.f32 %v6111_v1, %v1178_v13  ;;  %v4839_v43 = vld [vmem:[#allocation2 + $0x38] sm:$0xf] }
 0x1c1   :  { %v4808_v14 = vor.u32 %v5252_v33, %v4807_v23  ;;  %v1243_v39 = vpack.c.bf16 %v1227_v36, %v1227_v36  ;;  %v1152_v10 = vsub.f32 %v5953_v42, %v5995_v44  ;;  %v1153_v49 = vsub.f32 %v5958_v55, %v5995_v44 }
 0x1c2   :  { %v1746_v53 = vsel %vm5488_vm3, %v1741_v19, %v1745_v48  ;;  %v1755_v54 = vrot.slane %v1754_v32, 4  ;;  %v4753_v20 = vrot.slane %v6408_v6, 9  ;;  %v1339_v35 = vsel %vm6009_vm8, 0, %v1338_v2  ;;  %v1626_v61 = vld [vmem:[#allocation2 + $0x58] sm:$0xf] }
 0x1c3   :  { %v2811_v38 = vunpack.c.l.b16 %v1951_v63  ;;  %v2812_v15 = vunpack.c.l.b16 %v1955_v50  ;;  %v1958_v42 = vrot.slane %v6410_v22, 5  ;;  %v1342_v52 = vsel %vm6009_vm8, 0, %v1341_v40  ;;  %1340 = vst [vmem:[#allocation2 + $0x64] sm:$0x1] %v1339_v35  ;;  %v6443_v8 = vld [vmem:[#allocation2 + $0x58] sm:$0xe] }
 0x1c4   :  { %v1759_v56 = vrot.slane %v1757_v17, 5  ;;  %v1438_v62 = vrot.slane %v6383_v25, 4  ;;  %v1440_v0 = vshrl.u32 %v1242_v5, 16  ;;  %v1212_v12 = vadd.f32 %v6130_v47, %v1195_v3  ;;  %1343 = vst [vmem:[#allocation2 + $0x6c] sm:$0x1] %v1342_v52 }
 0x1c5   :  { %v4840_v46 = vor.u32 %v5260_v9, %v4839_v43  ;;  %v6439_v7 = vunpack.c.l.b16 %v1746_v53  ;;  %v1762_v4 = vshrl.u32 %v1625_v37, 16  ;;  %v1448_v11 = vshrl.u32 %v1243_v39, 16  ;;  %v1297_v25 = vld [vmem:[#allocation2 + $0x78] sm:$0x1]  ;;  %v1300_v48 = vld [vmem:[#allocation2 + $0x80] sm:$0x1] }
 0x1c6   :  { %v1760_v51 = vsel %vm5488_vm3, %v1755_v54, %v1759_v56  ;;  %v1765_v16 = vshll.u32 %v1625_v37, 16  ;;  %v1442_v24 = vrot.slane %v1440_v0, 7  ;;  %v1443_v21 = vshll.u32 %v1242_v5, 16  ;;  %v1581_v59 = vld [vmem:[#allocation2 + $0x68] sm:$0xf] }
 0x1c7   :  { %3704 = vmatmul.bf16.gmra.mxu1 %v2791_v28  ;;  %v2824_v57 = vpack.c.b16 %v2812_v15, %v2811_v38  ;;  %v6445_v13 = vrot.slane %v1448_v11, 7  ;;  %v1451_v23 = vshll.u32 %v1243_v39, 16  ;;  %v1179_v19 = vmul.f32 %v6119_v34, %v1152_v10  ;;  %v1587_v58 = vld [vmem:[#allocation2 + $0x70] sm:$0xf]  ;;  %v6450_v2 = vld [vmem:[#allocation2 + $0x5c] sm:$0x1] }
 0x1c8   :  { %v1776_v32 = vshrl.u32 %v1626_v61, 16  ;;  %v1779_v6 = vshll.u32 %v1626_v61, 16  ;;  %v1445_v33 = vor.u32 %v1443_v21, %v1442_v24  ;;  %v1228_v30 = vmax.f32 %v1212_v12, 0.0  ;;  %v1344_v3 = vld [vmem:[#allocation2 + $0x74] sm:$0x1] }
 0x1c9   :  { %3660 = vmatmul.bf16.gmra.mxu0 %v4808_v14  ;;  %v2780_v36 = vunpack.c.l.b16 %v1760_v51  ;;  %v1764_v45 = vrot.slane %v1762_v4, 4  ;;  %v1771_v28 = vshll.u32 %v6410_v22, 16  ;;  %v1453_v63 = vor.u32 %v1451_v23, %v6445_v13  ;;  %v5307_v22 = vld [vmem:[%s7549_s2 + $0x110] sm:$0xff]  ;;  %v5253_v12 = vld [vmem:[#allocation2 + $0x54] sm:$0xf0] }
 0x1ca   :  { %v1767_v50 = vrot.slane %v1765_v16, 5  ;;  %v1446_v17 = vrot.slane %v1442_v24, 4  ;;  %v1582_v5 = vsel %vm6180_vm15, %v1445_v33, %v1581_v59  ;;  %v1244_v40 = vpack.c.bf16 %v1228_v30, %v1228_v30  ;;  %v1578_v54 = vld [vmem:[#allocation2 + $0x64] sm:$0x1]  ;;  %3838 = vmatpush.bf16.msra.mxu0 %v5307_v22  ;;  %v4811_v52 = vld [vmem:[#allocation2 + $0x50] sm:$0xf] }
 0x1cb   :  { %3807 = vmatmul.bf16.gmra.mxu3 %v4840_v46  ;;  %v4754_v14 = vrot.slane %v6443_v8, 9  ;;  %1583 = vst [vmem:[#allocation2 + $0x68] sm:$0xf] %v1582_v5  ;;  %v1588_v43 = vsel %vm6180_vm15, %v1453_v63, %v1587_v58  ;;  %v1298_v37 = vsel %vm6002_vm7, 0, %v1297_v25  ;;  %v1196_v39 = vmul.f32 %v6111_v1, %v1179_v19  ;;  %v1584_v15 = vld [vmem:[#allocation2 + $0x6c] sm:$0x1] }
 0x1cc   :  { %v6465_v10 = vsel %vm6207_vm0, %v4753_v20, %v1958_v42  ;;  %v1778_v9 = vrot.slane %v1776_v32, 4  ;;  %v1781_v53 = vrot.slane %v1779_v6, 5  ;;  %1589 = vst [vmem:[#allocation2 + $0x70] sm:$0xf] %v1588_v43  ;;  %v1180_v31 = vmul.f32 %v6119_v34, %v1153_v49  ;;  %v1347_v34 = vld [vmem:[#allocation2 + $0x7c] sm:$0x1] }
 0x1cd   :  { %v1962_v35 = vrot.slane %v6450_v2, 5  ;;  %v1579_v38 = vsel %vm6002_vm7, %v1438_v62, %v1578_v54  ;;  %1299 = vst [vmem:[#allocation2 + $0x78] sm:$0x1] %v1298_v37  ;;  %v1456_v1 = vshrl.u32 %v1244_v40, 16  ;;  %v1213_v20 = vadd.f32 %v6130_v47, %v1196_v39  ;;  %v4843_v46 = vld [vmem:[#allocation2 + $0x58] sm:$0xf] }
 0x1ce   :  { %v2792_v42 = vpack.c.b16 %v2780_v36, %v6439_v7  ;;  %v1768_v56 = vor.u32 %v1767_v50, %v1764_v45  ;;  %1580 = vst [vmem:[#allocation2 + $0x64] sm:$0x1] %v1579_v38  ;;  %v1585_v55 = vsel %vm6002_vm7, %v1446_v17, %v1584_v15  ;;  %v1301_v44 = vsel %vm6002_vm7, 0, %v1300_v48  ;;  %v5375_v61 = vld [vmem:[%s7551_s4] ss:$0 sm:$0xff]  ;;  %v5315_v16 = vld [vmem:[%s7549_s2 + $0x150] sm:$0xff] }
 0x1cf   :  { %1586 = vst [vmem:[#allocation2 + $0x6c] sm:$0x1] %v1585_v55  ;;  %v6480_v49 = vrot.slane %v1456_v1, 7  ;;  %v1459_v62 = vshll.u32 %v1244_v40, 16  ;;  %v1229_v0 = vmax.f32 %v1213_v20, 0.0  ;;  %v1345_v47 = vsel %vm6009_vm8, 0, %v1344_v3  ;;  %3887 = vmatpush.bf16.msra.mxu1 %v5315_v16 }
 0x1d0   :  { %3758 = vmatmul.bf16.gmra.mxu2 %v2824_v57  ;;  %v1782_v7 = vor.u32 %v1781_v53, %v1778_v9  ;;  %1302 = vst [vmem:[#allocation2 + $0x80] sm:$0x1] %v1301_v44  ;;  %v1197_v4 = vmul.f32 %v5375_v61, %v1180_v31  ;;  %v5261_v11 = vld [vmem:[#allocation2 + $0x5c] sm:$0xf0]  ;;  %v1963_v51 = vsel %vm6207_vm0, %v4754_v14, %v1962_v35  ;;  %v2813_v25 = vunpack.c.l.b16 %v6465_v10  ;;  %v1303_v3 = vld [vmem:[#allocation2 + $0x88] sm:$0x1] }
 0x1d1   :  { %v1461_v24 = vor.u32 %v1459_v62, %v6480_v49  ;;  %v1245_v21 = vpack.c.bf16 %v1229_v0, %v1229_v0  ;;  %1346 = vst [vmem:[#allocation2 + $0x74] sm:$0x1] %v1345_v47  ;;  %v1785_v57 = vshll.u32 %v6450_v2, 16  ;;  %v1627_v8 = vld [vmem:[#allocation2 + $0x60] sm:$0xf]  ;;  %v1348_v59 = vsel %vm6009_vm8, 0, %v1347_v34 }
 0x1d2   :  { %v4812_v23 = vor.u32 %v5253_v12, %v4811_v52  ;;  %v1769_v19 = vrot.slane %v1768_v56, 4  ;;  %v1773_v32 = vrot.slane %v1771_v28, 5  ;;  %v4844_v33 = vor.u32 %v5261_v11, %v4843_v46  ;;  %v1628_v36 = vld [vmem:[#allocation2 + $0x68] sm:$0xf]  ;;  %v5376_v63 = vld [vmem:[%s7551_s4 + $0x1] ss:$0 sm:$0xff] }
 0x1d3   :  { %v1464_v6 = vshrl.u32 %v1245_v21, 16  ;;  %v2814_v58 = vunpack.c.l.b16 %v1963_v51  ;;  %v1783_v30 = vrot.slane %v1782_v7, 4  ;;  %v1214_v48 = vadd.f32 %v5376_v63, %v1197_v4  ;;  %1349 = vst [vmem:[#allocation2 + $0x7c] sm:$0x1] %v1348_v59  ;;  %v6507_v43 = vld [vmem:[#allocation2 + $0x60] sm:$0xe] }
 0x1d4   :  { %v1593_v45 = vld [vmem:[#allocation2 + $0x78] sm:$0xf]  ;;  %v1790_v2 = vshrl.u32 %v1627_v8, 16  ;;  %v1467_v28 = vshll.u32 %v1245_v21, 16  ;;  %v1787_v5 = vrot.slane %v1785_v57, 5  ;;  %v1454_v40 = vrot.slane %v6445_v13, 4 }
 0x1d5   :  { %v1594_v50 = vsel %vm6180_vm15, %v1461_v24, %v1593_v45  ;;  %v6502_v17 = vrot.slane %v1464_v6, 7  ;;  %v1774_v14 = vsel %vm5488_vm3, %v1769_v19, %v1773_v32  ;;  %v1793_v22 = vshll.u32 %v1627_v8, 16  ;;  %v5336_v10 = vld [vmem:[%s7549_s2 + $0x1f8] sm:$0xff]  ;;  %v1350_v38 = vld [vmem:[#allocation2 + $0x84] sm:$0x1]  ;;  %v5306_v46 = vld [vmem:[%s7549_s2 + $0x108] sm:$0xff] }
 0x1d6   :  { %v1804_v37 = vshrl.u32 %v1628_v36, 16  ;;  %1595 = vst [vmem:[#allocation2 + $0x78] sm:$0xf] %v1594_v50  ;;  %v2825_v9 = vpack.c.b16 %v2814_v58, %v2813_v25  ;;  %v1788_v13 = vsel %vm5488_vm3, %v1783_v30, %v1787_v5  ;;  %v1807_v53 = vshll.u32 %v1628_v36, 16  ;;  %v1353_v15 = vld [vmem:[#allocation2 + $0x8c] sm:$0x1]  ;;  %3980 = vmatpush.bf16.msrb.mxu3 %v5336_v10  ;;  %3839 = vmatpush.bf16.msra.mxu0 %v5306_v46 }
 0x1d7   :  { %3709 = vmatmul.bf16.gmra.mxu1 %v2792_v42  ;;  %v1469_v39 = vor.u32 %v1467_v28, %v6502_v17  ;;  %v1599_v54 = vld [vmem:[#allocation2 + $0x80] sm:$0xf]  ;;  %v1230_v35 = vmax.f32 %v1214_v48, 0.0  ;;  %v1884_v1 = vld [vmem:[#allocation2 + $0x68] sm:$0xe]  ;;  %v1792_v20 = vrot.slane %v1790_v2, 4  ;;  %v2781_v62 = vunpack.c.l.b16 %v1774_v14 }
 0x1d8   :  { %v1590_v31 = vld [vmem:[#allocation2 + $0x74] sm:$0x1]  ;;  %v1462_v42 = vrot.slane %v6480_v49, 4  ;;  %v1304_v56 = vsel %vm6002_vm7, 0, %v1303_v3  ;;  %v1643_v55 = vld [vmem:[#allocation2 + $0x64] sm:$0x1]  ;;  %v2782_v0 = vunpack.c.l.b16 %v1788_v13 }
 0x1d9   :  { %3665 = vmatmul.bf16.gmra.mxu0 %v4812_v23  ;;  %v1600_v52 = vsel %vm6180_vm15, %v1469_v39, %v1599_v54  ;;  %v6520_v44 = vld [vmem:[#allocation2 + $0x6c] sm:$0x1]  ;;  %v1591_v34 = vsel %vm6002_vm7, %v1454_v40, %v1590_v31  ;;  %v1795_v47 = vrot.slane %v1793_v22, 5  ;;  %v5335_v49 = vld [vmem:[%s7549_s2 + $0x1f0] sm:$0xff]  ;;  %v5328_v12 = vld [vmem:[%s7549_s2 + $0x1b8] sm:$0xff]  ;;  %v1246_v7 = vpack.c.bf16 %v1230_v35, %v1230_v35 }
 0x1da   :  { %1601 = vst [vmem:[#allocation2 + $0x80] sm:$0xf] %v1600_v52  ;;  %v4755_v61 = vrot.slane %v6507_v43, 9  ;;  %v1806_v4 = vrot.slane %v1804_v37, 4  ;;  %v1809_v11 = vrot.slane %v1807_v53, 5  ;;  %3981 = vmatpush.bf16.msrb.mxu3 %v5335_v49  ;;  %3931 = vmatpush.bf16.msrb.mxu2 %v5328_v12  ;;  %v5334_v24 = vld [vmem:[%s7549_s2 + $0x1e8] sm:$0xff]  ;;  %v2793_v32 = vpack.c.b16 %v2782_v0, %v2781_v62 }
 0x1db   :  { %3812 = vmatmul.bf16.gmra.mxu3 %v4844_v33  ;;  %1592 = vst [vmem:[#allocation2 + $0x74] sm:$0x1] %v1591_v34  ;;  %v1596_v51 = vld [vmem:[#allocation2 + $0x7c] sm:$0x1]  ;;  %v1472_v21 = vshrl.u32 %v1246_v7, 16  ;;  %v1351_v25 = vsel %vm6009_vm8, 0, %v1350_v38  ;;  %v1796_v30 = vor.u32 %v1795_v47, %v1792_v20 }
 0x1dc   :  { %v1597_v16 = vsel %vm6002_vm7, %v1462_v42, %v1596_v51  ;;  %1305 = vst [vmem:[#allocation2 + $0x88] sm:$0x1] %v1304_v56  ;;  %v1354_v57 = vsel %vm6009_vm8, 0, %v1353_v15  ;;  %v1966_v8 = vrot.slane %v1643_v55, 5  ;;  %v4756_v59 = vrot.slane %v1884_v1, 9  ;;  %v5327_v19 = vld [vmem:[%s7549_s2 + $0x1b0] sm:$0xff] }
 0x1dd   :  { %v1970_v23 = vrot.slane %v6520_v44, 5  ;;  %1598 = vst [vmem:[#allocation2 + $0x7c] sm:$0x1] %v1597_v16  ;;  %v4815_v6 = vld [vmem:[#allocation2 + $0x60] sm:$0xf]  ;;  %v1799_v36 = vshll.u32 %v1643_v55, 16  ;;  %v1810_v45 = vor.u32 %v1809_v11, %v1806_v4 }
 0x1de   :  { %v5254_v33 = vld [vmem:[#allocation2 + $0x64] sm:$0xf0]  ;;  %v1474_v63 = vrot.slane %v1472_v21, 7  ;;  %v1475_v48 = vshll.u32 %v1246_v7, 16  ;;  %1352 = vst [vmem:[#allocation2 + $0x84] sm:$0x1] %v1351_v25  ;;  %3982 = vmatpush.bf16.msrb.mxu3 %v5334_v24  ;;  %v1967_v5 = vsel %vm6207_vm0, %v4755_v61, %v1966_v8  ;;  %3932 = vmatpush.bf16.msrb.mxu2 %v5327_v19 }
 0x1df   :  { %v4847_v58 = vld [vmem:[#allocation2 + $0x68] sm:$0xf]  ;;  %v5262_v2 = vld [vmem:[#allocation2 + $0x6c] sm:$0xf0]  ;;  %v5333_v28 = vld [vmem:[%s7549_s2 + $0x1e0] sm:$0xff]  ;;  %v1971_v40 = vsel %vm6207_vm0, %v4756_v59, %v1970_v23  ;;  %v1813_v3 = vshll.u32 %v6520_v44, 16  ;;  %v4816_v22 = vor.u32 %v5254_v33, %v4815_v6  ;;  %v2815_v31 = vunpack.c.l.b16 %v1967_v5 }
 0x1e0   :  { %3763 = vmatmul.bf16.gmra.mxu2 %v2825_v9  ;;  %v5314_v50 = vld [vmem:[%s7549_s2 + $0x148] sm:$0xff]  ;;  %1355 = vst [vmem:[#allocation2 + $0x8c] sm:$0x1] %v1354_v57  ;;  %v1477_v43 = vor.u32 %v1475_v48, %v1474_v63  ;;  %v1797_v37 = vrot.slane %v1796_v30, 4  ;;  %v1470_v39 = vrot.slane %v6502_v17, 4  ;;  %v4848_v10 = vor.u32 %v5262_v2, %v4847_v58  ;;  %v5332_v56 = vld [vmem:[%s7549_s2 + $0x1d8] sm:$0xff] }
 0x1e1   :  { %v5326_v14 = vld [vmem:[%s7549_s2 + $0x1a8] sm:$0xff]  ;;  %3888 = vmatpush.bf16.msra.mxu1 %v5314_v50  ;;  %v1801_v9 = vrot.slane %v1799_v36, 5  ;;  %v1811_v13 = vrot.slane %v1810_v45, 4  ;;  %v1629_v53 = vld [vmem:[#allocation2 + $0x70] sm:$0xf]  ;;  %v2816_v35 = vunpack.c.l.b16 %v1971_v40  ;;  %v1478_v15 = vrot.slane %v1474_v63, 4 }
 0x1e2   :  { %v1630_v38 = vld [vmem:[#allocation2 + $0x78] sm:$0xf]  ;;  %3983 = vmatpush.bf16.msrb.mxu3 %v5333_v28  ;;  %v1815_v20 = vrot.slane %v1813_v3, 5  ;;  %3933 = vmatpush.bf16.msrb.mxu2 %v5326_v14  ;;  %v1818_v42 = vshrl.u32 %v1629_v53, 16  ;;  %v1821_v52 = vshll.u32 %v1629_v53, 16  ;;  %v5325_v55 = vld [vmem:[%s7549_s2 + $0x1a0] sm:$0xff] }
 0x1e3   :  { %v1605_v54 = vld [vmem:[#allocation2 + $0x88] sm:$0xf]  ;;  %v1802_v17 = vsel %vm5488_vm3, %v1797_v37, %v1801_v9  ;;  %v1832_v34 = vshrl.u32 %v1630_v38, 16  ;;  %v1835_v62 = vshll.u32 %v1630_v38, 16  ;;  %v2826_v49 = vpack.c.b16 %v2816_v35, %v2815_v31  ;;  %v1885_v12 = vld [vmem:[#allocation2 + $0x70] sm:$0xe] }
 0x1e4   :  { %v1606_v1 = vsel %vm6180_vm15, %v1477_v43, %v1605_v54  ;;  %v1816_v18 = vsel %vm5488_vm3, %v1811_v13, %v1815_v20  ;;  %v1886_v46 = vld [vmem:[#allocation2 + $0x78] sm:$0xe]  ;;  %v1645_v61 = vld [vmem:[#allocation2 + $0x74] sm:$0x1]  ;;  %v1646_v4 = vld [vmem:[#allocation2 + $0x7c] sm:$0x1]  ;;  %v2783_v11 = vunpack.c.l.b16 %v1802_v17 }
 0x1e5   :  { %1607 = vst [vmem:[#allocation2 + $0x88] sm:$0xf] %v1606_v1  ;;  %v1602_v44 = vld [vmem:[#allocation2 + $0x84] sm:$0x1]  ;;  %v2784_v51 = vunpack.c.l.b16 %v1816_v18  ;;  %v1820_v16 = vrot.slane %v1818_v42, 4  ;;  %v1823_v24 = vrot.slane %v1821_v52, 5 }
 0x1e6   :  { %v1603_v0 = vsel %vm6002_vm7, %v1470_v39, %v1602_v44  ;;  %3984 = vmatpush.bf16.msrb.mxu3 %v5332_v56  ;;  %3934 = vmatpush.bf16.msrb.mxu2 %v5325_v55  ;;  %v5331_v21 = vld [vmem:[%s7549_s2 + $0x1d0] sm:$0xff]  ;;  %v5324_v25 = vld [vmem:[%s7549_s2 + $0x198] sm:$0xff]  ;;  %v5305_v57 = vld [vmem:[%s7549_s2 + $0x100] sm:$0xff]  ;;  %v1834_v8 = vrot.slane %v1832_v34, 4  ;;  %v1837_v59 = vrot.slane %v1835_v62, 5  ;;  %v4757_v19 = vrot.slane %v1885_v12, 9 }
 0x1e7   :  { %3714 = vmatmul.bf16.gmra.mxu1 %v2793_v32  ;;  %v1608_v47 = vld [vmem:[#allocation2 + $0x8c] sm:$0x1]  ;;  %1604 = vst [vmem:[#allocation2 + $0x84] sm:$0x1] %v1603_v0  ;;  %3840 = vmatpush.bf16.msra.mxu0 %v5305_v57  ;;  %v1974_v32 = vrot.slane %v1645_v61, 5  ;;  %v4758_v6 = vrot.slane %v1886_v46, 9  ;;  %v2794_v30 = vpack.c.b16 %v2784_v51, %v2783_v11  ;;  %v1824_v48 = vor.u32 %v1823_v24, %v1820_v16 }
 0x1e8   :  { %v1609_v7 = vsel %vm6002_vm7, %v1478_v15, %v1608_v47  ;;  %v5330_v23 = vld [vmem:[%s7549_s2 + $0x1c8] sm:$0xff]  ;;  %v1978_v33 = vrot.slane %v1646_v4, 5  ;;  %v5323_v58 = vld [vmem:[%s7549_s2 + $0x190] sm:$0xff]  ;;  %v5255_v45 = vld [vmem:[#allocation2 + $0x74] sm:$0xf0]  ;;  %v1827_v50 = vshll.u32 %v1645_v61, 16  ;;  %v1838_v28 = vor.u32 %v1837_v59, %v1834_v8 }
 0x1e9   :  { %3670 = vmatmul.bf16.gmra.mxu0 %v4816_v22  ;;  %1610 = vst [vmem:[#allocation2 + $0x8c] sm:$0x1] %v1609_v7  ;;  %v4819_v36 = vld [vmem:[#allocation2 + $0x70] sm:$0xf]  ;;  %v4851_v63 = vld [vmem:[#allocation2 + $0x78] sm:$0xf]  ;;  %v1975_v43 = vsel %vm6207_vm0, %v4757_v19, %v1974_v32 }
 0x1ea   :  { %3985 = vmatpush.bf16.msrb.mxu3 %v5331_v21  ;;  %3935 = vmatpush.bf16.msrb.mxu2 %v5324_v25  ;;  %v5263_v2 = vld [vmem:[#allocation2 + $0x7c] sm:$0xf0]  ;;  %v1988_v3 = vld [vmem:[#allocation2 + $0x8] sm:$0xf]  ;;  %v4820_v14 = vor.u32 %v5255_v45, %v4819_v36  ;;  %v1979_v22 = vsel %vm6207_vm0, %v4758_v6, %v1978_v33  ;;  %v1841_v37 = vshll.u32 %v1646_v4, 16  ;;  %v1825_v53 = vrot.slane %v1824_v48, 4 }
 0x1eb   :  { %3817 = vmatmul.bf16.gmra.mxu3 %v4848_v10  ;;  %v1631_v5 = vld [vmem:[#allocation2 + $0x80] sm:$0xf]  ;;  %v5322_v9 = vld [vmem:[%s7549_s2 + $0x188] sm:$0xff]  ;;  %v4852_v13 = vor.u32 %v5263_v2, %v4851_v63  ;;  %v1829_v35 = vrot.slane %v1827_v50, 5  ;;  %v1839_v38 = vrot.slane %v1838_v28, 4  ;;  %v2021_v15 = vshrl.u32 %v1988_v3, 16 }
 0x1ec   :  { %v1632_v40 = vld [vmem:[#allocation2 + $0x88] sm:$0xf]  ;;  %v5313_v39 = vld [vmem:[%s7549_s2 + $0x140] sm:$0xff]  ;;  %v1846_v54 = vshrl.u32 %v1631_v5, 16  ;;  %v1849_v31 = vshll.u32 %v1631_v5, 16  ;;  %v2024_v1 = vshll.u32 %v1988_v3, 16  ;;  %v2817_v20 = vunpack.c.l.b16 %v1975_v43 }
 0x1ed   :  { %v5329_v10 = vld [vmem:[%s7549_s2 + $0x1c0] sm:$0xff]  ;;  %3889 = vmatpush.bf16.msra.mxu1 %v5313_v39  ;;  %v2818_v17 = vunpack.c.l.b16 %v1979_v22  ;;  %v1860_v42 = vshrl.u32 %v1632_v40, 16  ;;  %v1863_v52 = vshll.u32 %v1632_v40, 16  ;;  %v1989_v56 = vld [vmem:[#allocation2 + $0x10] sm:$0xf]  ;;  %v1843_v55 = vrot.slane %v1841_v37, 5 }
 0x1ee   :  { %3986 = vmatpush.bf16.msrb.mxu3 %v5330_v23  ;;  %3936 = vmatpush.bf16.msrb.mxu2 %v5323_v58  ;;  %v1830_v44 = vsel %vm5488_vm3, %v1825_v53, %v1829_v35  ;;  %v1887_v18 = vld [vmem:[#allocation2 + $0x80] sm:$0xe]  ;;  %v1848_v34 = vrot.slane %v1846_v54, 4  ;;  %v1851_v62 = vrot.slane %v1849_v31, 5  ;;  %v2023_v12 = vrot.slane %v2021_v15, 4  ;;  %v5344_v15 = vld [vmem:[%s7549_s2 + $0x238] sm:$0xff] }
 0x1ef   :  { %v5321_v0 = vld [vmem:[%s7549_s2 + $0x180] sm:$0xff]  ;;  %v1844_v47 = vsel %vm5488_vm3, %v1839_v38, %v1843_v55  ;;  %v2026_v46 = vrot.slane %v2024_v1, 5  ;;  %v2035_v7 = vshrl.u32 %v1989_v56, 16  ;;  %v2827_v61 = vpack.c.b16 %v2818_v17, %v2817_v20  ;;  %v1888_v4 = vld [vmem:[#allocation2 + $0x88] sm:$0xe]  ;;  %4029 = vmatpush.bf16.msrb.mxu0 %v5344_v15 }
 0x1f0   :  { %3768 = vmatmul.bf16.gmra.mxu2 %v2826_v49  ;;  %v6613_v49 = vld [vmem:[#allocation2 + $0xc] sm:$0x1]  ;;  %v1862_v11 = vrot.slane %v1860_v42, 4  ;;  %v1865_v51 = vrot.slane %v1863_v52, 5  ;;  %v2038_v16 = vshll.u32 %v1989_v56, 16  ;;  %v2785_v25 = vunpack.c.l.b16 %v1830_v44 }
 0x1f1   :  { %v1647_v24 = vld [vmem:[#allocation2 + $0x84] sm:$0x1]  ;;  %v1648_v21 = vld [vmem:[#allocation2 + $0x8c] sm:$0x1]  ;;  %v2786_v57 = vunpack.c.l.b16 %v1844_v47  ;;  %v4759_v8 = vrot.slane %v1887_v18, 9  ;;  %v2030_v59 = vshll.u32 %v6613_v49, 16  ;;  %v1852_v6 = vor.u32 %v1851_v62, %v1848_v34 }
 0x1f2   :  { %3987 = vmatpush.bf16.msrb.mxu3 %v5329_v10  ;;  %3937 = vmatpush.bf16.msrb.mxu2 %v5322_v9  ;;  %v2357_v23 = vld [vmem:[#allocation2 + $0x10] sm:$0xf]  ;;  %v2358_v19 = vld [vmem:[#allocation2 + $0x18] sm:$0xf]  ;;  %v4760_v32 = vrot.slane %v1888_v4, 9  ;;  %v2027_v33 = vor.u32 %v2026_v46, %v2023_v12  ;;  %v2037_v58 = vrot.slane %v2035_v7, 4  ;;  %v1866_v45 = vor.u32 %v1865_v51, %v1862_v11 }
 0x1f3   :  { %v1986_v36 = vrot.slane %v1648_v21, 5  ;;  %v2040_v63 = vrot.slane %v2038_v16, 5  ;;  %v2390_v48 = vshrl.u32 %v2357_v23, 16  ;;  %v2393_v2 = vshll.u32 %v2357_v23, 16  ;;  %v4823_v40 = vld [vmem:[#allocation2 + $0x80] sm:$0xf] }
 0x1f4   :  { %v2404_v50 = vshrl.u32 %v2358_v19, 16  ;;  %v2407_v28 = vshll.u32 %v2358_v19, 16  ;;  %v2795_v5 = vpack.c.b16 %v2786_v57, %v2785_v25  ;;  %v5264_v3 = vld [vmem:[#allocation2 + $0x8c] sm:$0xf0]  ;;  %v1869_v43 = vshll.u32 %v1648_v21, 16  ;;  %v5354_v52 = vld [vmem:[%s7550_s3 + $0x8] sm:$0xff] }
 0x1f5   :  { %v6616_v22 = vld [vmem:[#allocation2 + $0x14] sm:$0x1]  ;;  %v5256_v37 = vld [vmem:[#allocation2 + $0x84] sm:$0xf0]  ;;  %v1853_v39 = vrot.slane %v1852_v6, 4  ;;  %v2028_v10 = vrot.slane %v2027_v33, 4  ;;  %v1987_v54 = vsel %vm6207_vm0, %v4760_v32, %v1986_v36  ;;  %v2041_v35 = vor.u32 %v2040_v63, %v2037_v58  ;;  %4322 = vmatpush.bf16.msrb.mxu1 %v5354_v52 }
 0x1f6   :  { %3938 = vmatpush.bf16.msrb.mxu2 %v5321_v0  ;;  %v2032_v9 = vrot.slane %v2030_v59, 5  ;;  %v1867_v31 = vrot.slane %v1866_v45, 4  ;;  %v2373_v38 = vld [vmem:[#allocation2 + $0x14] sm:$0x1]  ;;  %v2392_v1 = vrot.slane %v2390_v48, 4  ;;  %v2395_v20 = vrot.slane %v2393_v2, 5 }
 0x1f7   :  { %3719 = vmatmul.bf16.gmra.mxu1 %v2794_v30  ;;  %v1982_v30 = vrot.slane %v1647_v24, 5  ;;  %v2406_v17 = vrot.slane %v2404_v50, 4  ;;  %v2409_v42 = vrot.slane %v2407_v28, 5  ;;  %v4824_v56 = vor.u32 %v5256_v37, %v4823_v40  ;;  %v2374_v34 = vld [vmem:[#allocation2 + $0x1c] sm:$0x1] }
 0x1f8   :  { %v1871_v44 = vrot.slane %v1869_v43, 5  ;;  %v2044_v18 = vshll.u32 %v6616_v22, 16  ;;  %v2033_v47 = vsel %vm5488_vm3, %v2028_v10, %v2032_v9  ;;  %v2820_v12 = vunpack.c.l.b16 %v1987_v54  ;;  %v1990_v25 = vld [vmem:[#allocation2 + $0x18] sm:$0xf]  ;;  %v1991_v57 = vld [vmem:[#allocation2 + $0x20] sm:$0xf] }
 0x1f9   :  { %3675 = vmatmul.bf16.gmra.mxu0 %v4820_v14  ;;  %v1855_v14 = vshll.u32 %v1647_v24, 16  ;;  %v1983_v53 = vsel %vm6207_vm0, %v4759_v8, %v1982_v30  ;;  %v2396_v4 = vor.u32 %v2395_v20, %v2392_v1  ;;  %v2399_v11 = vshll.u32 %v2373_v38, 16  ;;  %v2359_v32 = vld [vmem:[#allocation2 + $0x20] sm:$0xf]  ;;  %v2360_v6 = vld [vmem:[#allocation2 + $0x28] sm:$0xf] }
 0x1fa   :  { %v2819_v0 = vunpack.c.l.b16 %v1983_v53  ;;  %v1872_v7 = vsel %vm5488_vm3, %v1867_v31, %v1871_v44  ;;  %v2410_v51 = vor.u32 %v2409_v42, %v2406_v17  ;;  %v2413_v16 = vshll.u32 %v2374_v34, 16  ;;  %v2244_v45 = vld [vmem:[#allocation2 + $0x8] sm:$0xe]  ;;  %v2245_v63 = vld [vmem:[#allocation2 + $0x10] sm:$0xe] }
 0x1fb   :  { %3822 = vmatmul.bf16.gmra.mxu3 %v4852_v13  ;;  %v4855_v13 = vld [vmem:[#allocation2 + $0x88] sm:$0xf]  ;;  %v1857_v55 = vrot.slane %v1855_v14, 5  ;;  %v2046_v24 = vrot.slane %v2044_v18, 5  ;;  %v2788_v59 = vunpack.c.l.b16 %v1872_v7  ;;  %v2885_v19 = vunpack.c.l.b16 %v2033_v47  ;;  %v2375_v7 = vld [vmem:[#allocation2 + $0x24] sm:$0x1] }
 0x1fc   :  { %v4856_v62 = vor.u32 %v5264_v3, %v4855_v13  ;;  %v2828_v8 = vpack.c.b16 %v2820_v12, %v2819_v0  ;;  %v2397_v33 = vrot.slane %v2396_v4, 4  ;;  %v2401_v58 = vrot.slane %v2399_v11, 5  ;;  %v1992_v18 = vld [vmem:[#allocation2 + $0x28] sm:$0xf]  ;;  %v6654_v12 = vld [vmem:[#allocation2 + $0x24] sm:$0x1] }
 0x1fd   :  { %v1858_v46 = vsel %vm5488_vm3, %v1853_v39, %v1857_v55  ;;  %v2411_v30 = vrot.slane %v2410_v51, 4  ;;  %v2415_v36 = vrot.slane %v2413_v16, 5  ;;  %v2049_v48 = vshrl.u32 %v1990_v25, 16  ;;  %v5343_v55 = vld [vmem:[%s7549_s2 + $0x230] sm:$0xff]  ;;  %v2376_v11 = vld [vmem:[#allocation2 + $0x2c] sm:$0x1] }
 0x1fe   :  { %v2787_v21 = vunpack.c.l.b16 %v1858_v46  ;;  %v2052_v2 = vshll.u32 %v1990_v25, 16  ;;  %v2063_v50 = vshrl.u32 %v1991_v57, 16  ;;  %v2066_v28 = vshll.u32 %v1991_v57, 16  ;;  %4030 = vmatpush.bf16.msrb.mxu0 %v5343_v55 }
 0x1ff   :  { %v2421_v40 = vshll.u32 %v2359_v32, 16  ;;  %v2432_v3 = vshrl.u32 %v2360_v6, 16  ;;  %v2435_v14 = vshll.u32 %v2360_v6, 16  ;;  %v4761_v39 = vrot.slane %v2244_v45, 9 }
 0x200   :  { %3773 = vmatmul.bf16.gmra.mxu2 %v2827_v61  ;;  %v2042_v61 = vrot.slane %v2041_v35, 4  ;;  %v2796_v43 = vpack.c.b16 %v2788_v59, %v2787_v21  ;;  %v2294_v10 = vrot.slane %v6613_v49, 5  ;;  %v2402_v9 = vsel %vm5488_vm3, %v2397_v33, %v2401_v58 }
 0x201   :  { %v2416_v13 = vsel %vm5488_vm3, %v2411_v30, %v2415_v36  ;;  %v4762_v53 = vrot.slane %v2245_v63, 9  ;;  %v2298_v54 = vrot.slane %v6616_v22, 5  ;;  %v2051_v31 = vrot.slane %v2049_v48, 4  ;;  %v4859_v22 = vld [vmem:[#allocation2 + $0x10] sm:$0xf] }
 0x202   :  { %v2047_v23 = vsel %vm5488_vm3, %v2042_v61, %v2046_v24  ;;  %v2054_v35 = vrot.slane %v2052_v2, 5  ;;  %v2065_v38 = vrot.slane %v2063_v50, 4  ;;  %v2068_v15 = vrot.slane %v2066_v28, 5  ;;  %v1332_v24 = vld [vmem:[#allocation2 + $0x44] sm:$0x1] }
 0x203   :  { %v2886_v37 = vunpack.c.l.b16 %v2047_v23  ;;  %v2423_v20 = vrot.slane %v2421_v40, 5  ;;  %v2434_v17 = vrot.slane %v2432_v3, 4  ;;  %v2437_v42 = vrot.slane %v2435_v14, 5  ;;  %v2246_v30 = vld [vmem:[#allocation2 + $0x18] sm:$0xe] }
 0x204   :  { %v2997_v52 = vunpack.c.l.b16 %v2402_v9  ;;  %v2998_v49 = vunpack.c.l.b16 %v2416_v13  ;;  %v2295_v0 = vsel %vm6207_vm0, %v4761_v39, %v2294_v10  ;;  %v2299_v47 = vsel %vm6207_vm0, %v4762_v53, %v2298_v54  ;;  %v2247_v50 = vld [vmem:[#allocation2 + $0x20] sm:$0xe]  ;;  %v2361_v9 = vld [vmem:[#allocation2 + $0x30] sm:$0xf] }
 0x205   :  { %v2901_v34 = vpack.c.b16 %v2886_v37, %v2885_v19  ;;  %v2055_v46 = vor.u32 %v2054_v35, %v2051_v31  ;;  %v2069_v4 = vor.u32 %v2068_v15, %v2065_v38  ;;  %v2438_v16 = vor.u32 %v2437_v42, %v2434_v17  ;;  %v2362_v31 = vld [vmem:[#allocation2 + $0x38] sm:$0xf] }
 0x206   :  { %v3013_v21 = vpack.c.b16 %v2998_v49, %v2997_v52  ;;  %v2077_v25 = vshrl.u32 %v1992_v18, 16  ;;  %v2080_v57 = vshll.u32 %v1992_v18, 16  ;;  %v2918_v59 = vunpack.c.l.b16 %v2299_v47 }
 0x207   :  { %3724 = vmatmul.bf16.gmra.mxu1 %v2795_v5  ;;  %v2418_v5 = vshrl.u32 %v2359_v32, 16  ;;  %v2072_v23 = vshll.u32 %v6654_v12, 16  ;;  %v2427_v19 = vshll.u32 %v2375_v7, 16  ;;  %v1993_v32 = vld [vmem:[#allocation2 + $0x30] sm:$0xf]  ;;  %v2056_v33 = vrot.slane %v2055_v46, 4 }
 0x208   :  { %v2441_v58 = vshll.u32 %v2376_v11, 16  ;;  %v1333_v36 = vsel %vm6009_vm8, 0, %v1332_v24  ;;  %v2070_v63 = vrot.slane %v2069_v4, 4  ;;  %v2439_v2 = vrot.slane %v2438_v16, 4 }
 0x209   :  { %3680 = vmatmul.bf16.gmra.mxu0 %v4824_v56  ;;  %v2420_v1 = vrot.slane %v2418_v5, 4  ;;  %v6643_v56 = vld [vmem:[#allocation2 + $0x1c] sm:$0x1]  ;;  %1334 = vst [vmem:[#allocation2 + $0x44] sm:$0x1] %v1333_v36  ;;  %v2079_v28 = vrot.slane %v2077_v25, 4 }
 0x20a   :  { %v2058_v61 = vshll.u32 %v6643_v56, 16  ;;  %v2082_v5 = vrot.slane %v2080_v57, 5  ;;  %v2091_v40 = vshrl.u32 %v1993_v32, 16  ;;  %v2094_v3 = vshll.u32 %v1993_v32, 16  ;;  %v5342_v25 = vld [vmem:[%s7549_s2 + $0x228] sm:$0xff] }
 0x20b   :  { %3827 = vmatmul.bf16.gmra.mxu3 %v4856_v62  ;;  %v5265_v62 = vld [vmem:[#allocation2 + $0x14] sm:$0xf0]  ;;  %v2424_v51 = vor.u32 %v2423_v20, %v2420_v1  ;;  %v1422_v14 = vrot.slane %v6369_v60, 4  ;;  %v2074_v39 = vrot.slane %v2072_v23, 5  ;;  %v2429_v10 = vrot.slane %v2427_v19, 5  ;;  %4031 = vmatpush.bf16.msrb.mxu0 %v5342_v25 }
 0x20c   :  { %v4860_v6 = vor.u32 %v5265_v62, %v4859_v22  ;;  %v2060_v45 = vrot.slane %v2058_v61, 5  ;;  %v2443_v13 = vrot.slane %v2441_v58, 5  ;;  %v4763_v53 = vrot.slane %v2246_v30, 9  ;;  %v6671_v1 = vld [vmem:[#allocation2 + $0x2c] sm:$0x1] }
 0x20d   :  { %v2425_v48 = vrot.slane %v2424_v51, 4  ;;  %v2302_v54 = vrot.slane %v6643_v56, 5  ;;  %v2075_v35 = vsel %vm5488_vm3, %v2070_v63, %v2074_v39  ;;  %v4764_v38 = vrot.slane %v2247_v50, 9  ;;  %v1994_v36 = vld [vmem:[#allocation2 + $0x38] sm:$0xf] }
 0x20e   :  { %v2061_v26 = vsel %vm5488_vm3, %v2056_v33, %v2060_v45  ;;  %v2306_v15 = vrot.slane %v6654_v12, 5  ;;  %v2444_v20 = vsel %vm5488_vm3, %v2439_v2, %v2443_v13  ;;  %v2083_v17 = vor.u32 %v2082_v5, %v2079_v28  ;;  %v2378_v33 = vld [vmem:[#allocation2 + $0x3c] sm:$0x1]  ;;  %v4863_v63 = vld [vmem:[#allocation2 + $0x20] sm:$0xf] }
 0x20f   :  { %v2430_v60 = vsel %vm5488_vm3, %v2425_v48, %v2429_v10  ;;  %v2093_v42 = vrot.slane %v2091_v40, 4  ;;  %v2096_v52 = vrot.slane %v2094_v3, 5  ;;  %v2446_v55 = vshrl.u32 %v2361_v9, 16  ;;  %v5266_v48 = vld [vmem:[#allocation2 + $0x24] sm:$0xf0] }
 0x210   :  { %3778 = vmatmul.bf16.gmra.mxu2 %v2828_v8  ;;  %v2917_v8 = vunpack.c.l.b16 %v2295_v0  ;;  %v2449_v22 = vshll.u32 %v2361_v9, 16  ;;  %v2460_v18 = vshrl.u32 %v2362_v31, 16  ;;  %v2887_v0 = vunpack.c.l.b16 %v2061_v26  ;;  %v1566_v46 = vld [vmem:[#allocation2 + $0x44] sm:$0x1] }
 0x211   :  { %v2888_v47 = vunpack.c.l.b16 %v2075_v35  ;;  %v2086_v12 = vshll.u32 %v6671_v1, 16  ;;  %v2999_v7 = vunpack.c.l.b16 %v2430_v60  ;;  %v2303_v61 = vsel %vm6207_vm0, %v4763_v53, %v2302_v54  ;;  %v2248_v54 = vld [vmem:[#allocation2 + $0x28] sm:$0xe] }
 0x212   :  { %v2933_v37 = vpack.c.b16 %v2918_v59, %v2917_v8  ;;  %v2307_v4 = vsel %vm6207_vm0, %v4764_v38, %v2306_v15  ;;  %v1567_v11 = vsel %vm6002_vm7, %v1422_v14, %v1566_v46  ;;  %v3000_v16 = vunpack.c.l.b16 %v2444_v20  ;;  %v2377_v8 = vld [vmem:[#allocation2 + $0x34] sm:$0x1]  ;;  %v2363_v20 = vld [vmem:[#allocation2 + $0x40] sm:$0xf] }
 0x213   :  { %v2084_v24 = vrot.slane %v2083_v17, 4  ;;  %1568 = vst [vmem:[#allocation2 + $0x44] sm:$0x1] %v1567_v11  ;;  %v2448_v59 = vrot.slane %v2446_v55, 4  ;;  %v2451_v23 = vrot.slane %v2449_v22, 5  ;;  %v2462_v29 = vrot.slane %v2460_v18, 4 }
 0x214   :  { %v2902_v32 = vpack.c.b16 %v2888_v47, %v2887_v0  ;;  %v2919_v58 = vunpack.c.l.b16 %v2303_v61  ;;  %v3014_v45 = vpack.c.b16 %v3000_v16, %v2999_v7  ;;  %v2920_v2 = vunpack.c.l.b16 %v2307_v4  ;;  %v2364_v17 = vld [vmem:[#allocation2 + $0x48] sm:$0xf]  ;;  %v2249_v55 = vld [vmem:[#allocation2 + $0x30] sm:$0xe]  ;;  %v6702_v22 = vld [vmem:[#allocation2 + $0x3c] sm:$0x1] }
 0x215   :  { %v2455_v28 = vshll.u32 %v2377_v8, 16  ;;  %v2452_v14 = vor.u32 %v2451_v23, %v2448_v59  ;;  %v2469_v39 = vshll.u32 %v2378_v33, 16  ;;  %v2105_v9 = vshrl.u32 %v1994_v36, 16 }
 0x216   :  { %v6648_v44 = vpop.f32.mrf.mxu0  ;;  %v2108_v26 = vshll.u32 %v1994_v36, 16  ;;  %v4864_v13 = vor.u32 %v5266_v48, %v4863_v63  ;;  %v2934_v60 = vpack.c.b16 %v2920_v2, %v2919_v58  ;;  %v2474_v47 = vshrl.u32 %v2363_v20, 16  ;;  %v4867_v48 = vld [vmem:[#allocation2 + $0x30] sm:$0xf] }
 0x217   :  { %3729 = vmatmul.bf16.gmra.mxu1 %v2796_v43  ;;  %v2457_v15 = vrot.slane %v2455_v28, 5  ;;  %v2107_v18 = vrot.slane %v2105_v9, 4  ;;  %v2488_v46 = vshrl.u32 %v2364_v17, 16  ;;  %v2491_v7 = vshll.u32 %v2364_v17, 16  ;;  %v1996_v28 = vld [vmem:[#allocation2 + $0x58] sm:$0xf] }
 0x218   :  { %v4765_v4 = vrot.slane %v2248_v54, 9  ;;  %v2310_v11 = vrot.slane %v6671_v1, 5  ;;  %v4766_v16 = vrot.slane %v2249_v55, 9  ;;  %v2114_v23 = vshll.u32 %v6702_v22, 16 }
 0x219   :  { %3841 = vmatmul.bf16.vlgmr.msra.gmra.mxu0 %v2901_v34  ;;  %v2463_v34 = vshll.u32 %v2362_v31, 16  ;;  %v1995_v31 = vld [vmem:[#allocation2 + $0x40] sm:$0xf]  ;;  %v2476_v33 = vrot.slane %v2474_v47, 4  ;;  %v2490_v58 = vrot.slane %v2488_v46, 4 }
 0x21a   :  { %v2122_v0 = vshll.u32 %v1995_v31, 16  ;;  %v2116_v9 = vrot.slane %v2114_v23, 5 }
 0x21b   :  { %3988 = vmatmul.bf16.vlgmr.msrb.gmra.mxu3 %v3013_v21  ;;  %v2097_v21 = vor.u32 %v2096_v52, %v2093_v42  ;;  %v2465_v19 = vrot.slane %v2463_v34, 5  ;;  %v2110_v34 = vrot.slane %v2108_v26, 5 }
 0x21d   :  { %v2098_v3 = vrot.slane %v2097_v21, 4 }
 0x21e   :  { %v6661_v43 = vpop.f32.mrf.mxu0 }
 0x220   :  { %3939 = vmatmul.bf16.vlgmr.msrb.gmra.mxu2 %v4860_v6  ;;  %v2088_v6 = vrot.slane %v2086_v12, 5  ;;  %v2477_v12 = vshll.u32 %v2363_v20, 16 }
 0x222   :  { %v2089_v50 = vsel %vm5488_vm3, %v2084_v24, %v2088_v6  ;;  %v2124_v6 = vrot.slane %v2122_v0, 5  ;;  %v2479_v1 = vrot.slane %v2477_v12, 5  ;;  %v2365_v0 = vld [vmem:[#allocation2 + $0x60] sm:$0xf] }
 0x223   :  { %v3744_v56 = vpop.f32.mrf.mxu2  ;;  %v2889_v38 = vunpack.c.l.b16 %v2089_v50  ;;  %v2311_v50 = vsel %vm6207_vm0, %v4765_v4, %v2310_v11  ;;  %v2250_v4 = vld [vmem:[#allocation2 + $0x38] sm:$0xe]  ;;  %v2505_v23 = vshll.u32 %v2365_v0, 16 }
 0x224   :  { %v3695_v49 = vpop.f32.mrf.mxu1  ;;  %v2480_v26 = vor.u32 %v2479_v1, %v2476_v33  ;;  %v4767_v1 = vrot.slane %v2250_v4, 9 }
 0x225   :  { %v3696_v62 = vadd.f32 %v3695_v49, %v6648_v44  ;;  %v6685_v44 = vld [vmem:[#allocation2 + $0x34] sm:$0x1] }
 0x226   :  { %v6690_v57 = vpop.f32.mrf.mxu0  ;;  %v2100_v30 = vshll.u32 %v6685_v44, 16  ;;  %v2314_v59 = vrot.slane %v6685_v44, 5  ;;  %v5341_v44 = vld [vmem:[%s7549_s2 + $0x220] sm:$0xff]  ;;  %v2481_v47 = vrot.slane %v2480_v26, 4 }
 0x227   :  { %v6683_v51 = vadd.f32 %v3744_v56, %v3696_v62  ;;  %3890 = vmatmul.bf16.vlgmr.msra.gmra.mxu1 %v2933_v37  ;;  %v2466_v37 = vor.u32 %v2465_v19, %v2462_v29  ;;  %v2471_v56 = vrot.slane %v2469_v39, 5  ;;  %v2119_v62 = vshrl.u32 %v1995_v31, 16  ;;  %4032 = vmatpush.bf16.msrb.mxu0 %v5341_v44  ;;  %v2379_v31 = vld [vmem:[#allocation2 + $0x44] sm:$0x1] }
 0x228   :  { %v2102_v53 = vrot.slane %v2100_v30, 5  ;;  %v2111_v19 = vor.u32 %v2110_v34, %v2107_v18  ;;  %v2493_v30 = vrot.slane %v2491_v7, 5  ;;  %v2483_v12 = vshll.u32 %v2379_v31, 16  ;;  %v6746_v26 = vld [vmem:[#allocation2 + $0x64] sm:$0x1] }
 0x229   :  { %3846 = vmatmul.bf16.gmra.mxu0 %v2902_v32  ;;  %v2467_v49 = vrot.slane %v2466_v37, 4  ;;  %v2121_v32 = vrot.slane %v2119_v62, 4 }
 0x22a   :  { %v2103_v52 = vsel %vm5488_vm3, %v2098_v3, %v2102_v53  ;;  %v2315_v3 = vsel %vm6207_vm0, %v4766_v16, %v2314_v59  ;;  %v2112_v37 = vrot.slane %v2111_v19, 4  ;;  %v2502_v59 = vshrl.u32 %v2365_v0, 16 }
 0x22b   :  { %v3746_v40 = vpop.f32.mrf.mxu2  ;;  %3993 = vmatmul.bf16.gmra.mxu3 %v3014_v45  ;;  %v2890_v61 = vunpack.c.l.b16 %v2103_v52  ;;  %v2472_v8 = vsel %vm5488_vm3, %v2467_v49, %v2471_v56  ;;  %v2125_v39 = vor.u32 %v2124_v6, %v2121_v32  ;;  %v2922_v18 = vunpack.c.l.b16 %v2315_v3  ;;  %v2251_v32 = vld [vmem:[#allocation2 + $0x40] sm:$0xe] }
 0x22c   :  { %v3697_v5 = vpop.f32.mrf.mxu1  ;;  %v3002_v63 = vunpack.c.l.b16 %v2472_v8  ;;  %v2117_v34 = vsel %vm5488_vm3, %v2112_v37, %v2116_v9  ;;  %v2366_v8 = vld [vmem:[#allocation2 + $0x68] sm:$0xf]  ;;  %v2485_v33 = vrot.slane %v2483_v12, 5  ;;  %v2504_v3 = vrot.slane %v2502_v59, 4  ;;  %v6773_v12 = vld [vmem:[#allocation2 + $0x6c] sm:$0x1] }
 0x22d   :  { %v3698_v10 = vadd.f32 %v3697_v5, %v6661_v43  ;;  %v2453_v43 = vrot.slane %v2452_v14, 4  ;;  %v1997_v5 = vld [vmem:[#allocation2 + $0x60] sm:$0xf]  ;;  %v6723_v14 = vld [vmem:[#allocation2 + $0x44] sm:$0x1]  ;;  %v2126_v62 = vrot.slane %v2125_v39, 4  ;;  %v2891_v19 = vunpack.c.l.b16 %v2117_v34 }
 0x22e   :  { %v6698_v42 = vpop.f32.mrf.mxu0  ;;  %v2147_v20 = vshrl.u32 %v1997_v5, 16  ;;  %v2128_v49 = vshll.u32 %v6723_v14, 16  ;;  %v2150_v56 = vshll.u32 %v1997_v5, 16  ;;  %v2516_v44 = vshrl.u32 %v2366_v8, 16  ;;  %v1999_v59 = vld [vmem:[#allocation2 + $0x70] sm:$0xf] }
 0x22f   :  { %v6696_v35 = vadd.f32 %v3746_v40, %v3698_v10  ;;  %v2458_v25 = vsel %vm5488_vm3, %v2453_v43, %v2457_v15  ;;  %v2903_v40 = vpack.c.b16 %v2890_v61, %v2889_v38  ;;  %v2380_v10 = vld [vmem:[#allocation2 + $0x4c] sm:$0x1]  ;;  %v2136_v15 = vshll.u32 %v1996_v28, 16 }
 0x230   :  { %3944 = vmatmul.bf16.gmra.mxu2 %v4864_v13  ;;  %v3001_v45 = vunpack.c.l.b16 %v2458_v25  ;;  %v2494_v13 = vor.u32 %v2493_v30, %v2490_v58  ;;  %v2497_v53 = vshll.u32 %v2380_v10, 16  ;;  %v2921_v43 = vunpack.c.l.b16 %v2311_v50  ;;  %v6736_v30 = vld [vmem:[#allocation2 + $0x5c] sm:$0x1] }
 0x231   :  { %v2138_v16 = vrot.slane %v2136_v15, 5  ;;  %v2152_v25 = vrot.slane %v2150_v56, 5  ;;  %v2318_v58 = vrot.slane %v6702_v22, 5  ;;  %v2486_v5 = vsel %vm5488_vm3, %v2481_v47, %v2485_v33 }
 0x232   :  { %v3015_v54 = vpack.c.b16 %v3002_v63, %v3001_v45  ;;  %v2495_v46 = vrot.slane %v2494_v13, 4  ;;  %v2499_v7 = vrot.slane %v2497_v53, 5  ;;  %v6740_v63 = vld [vmem:[#allocation2 + $0x64] sm:$0x1]  ;;  %v2507_v37 = vrot.slane %v2505_v23, 5 }
 0x233   :  { %v3749_v21 = vpop.f32.mrf.mxu2  ;;  %v4768_v10 = vrot.slane %v2251_v32, 9  ;;  %v2142_v9 = vshll.u32 %v6736_v30, 16  ;;  %v6748_v53 = vld [vmem:[#allocation2 + $0x40] sm:$0xf]  ;;  %v6754_v31 = vsel %vm6207_vm0, %v4767_v1, %v2318_v58  ;;  %v2156_v15 = vshll.u32 %v6740_v63, 16 }
 0x234   :  { %v3700_v24 = vpop.f32.mrf.mxu1  ;;  %v2500_v45 = vsel %vm5488_vm3, %v2495_v46, %v2499_v7  ;;  %v2511_v34 = vshll.u32 %v6746_v26, 16  ;;  %v2923_v46 = vunpack.c.l.b16 %v6754_v31  ;;  %v6782_v58 = vld [vmem:[#allocation2 + $0x60] sm:$0xf] }
 0x235   :  { %v3701_v29 = vadd.f32 %v3700_v24, %v6690_v57  ;;  %v5267_v57 = vld [vmem:[#allocation2 + $0x34] sm:$0xf0]  ;;  %v2149_v24 = vrot.slane %v2147_v20, 4  ;;  %v3004_v13 = vunpack.c.l.b16 %v2500_v45  ;;  %v2144_v7 = vrot.slane %v2142_v9, 5  ;;  %v2367_v9 = vld [vmem:[#allocation2 + $0x70] sm:$0xf] }
 0x236   :  { %v6717_v2 = vpop.f32.mrf.mxu0  ;;  %v4868_v52 = vor.u32 %v5267_v57, %v4867_v48  ;;  %v2519_v57 = vshll.u32 %v2366_v8, 16  ;;  %v2158_v4 = vrot.slane %v2156_v15, 5  ;;  %v2253_v8 = vld [vmem:[#allocation2 + $0x60] sm:$0xe]  ;;  %v2513_v1 = vrot.slane %v2511_v34, 5 }
 0x237   :  { %v6712_v36 = vadd.f32 %v3749_v21, %v3701_v29  ;;  %3895 = vmatmul.bf16.gmra.mxu1 %v2934_v60  ;;  %v2133_v60 = vshrl.u32 %v1996_v28, 16  ;;  %v2935_v29 = vpack.c.b16 %v2922_v18, %v2921_v43  ;;  %v5340_v43 = vld [vmem:[%s7549_s2 + $0x218] sm:$0xff] }
 0x238   :  { %4033 = vmatpush.bf16.msrb.mxu0 %v5340_v43 }
 0x239   :  { %3851 = vmatmul.bf16.gmra.mxu0 %v2903_v40  ;;  %v2135_v11 = vrot.slane %v2133_v60, 4  ;;  %v2153_v40 = vor.u32 %v2152_v25, %v2149_v24  ;;  %v2322_v60 = vrot.slane %v6723_v14, 5  ;;  %v2508_v14 = vor.u32 %v2507_v37, %v2504_v3 }
 0x23a   :  { %v2175_v37 = vshrl.u32 %v1999_v59, 16 }
 0x23b   :  { %v3751_v17 = vpop.f32.mrf.mxu2  ;;  %3998 = vmatmul.bf16.gmra.mxu3 %v3015_v54  ;;  %v2139_v48 = vor.u32 %v2138_v16, %v2135_v11  ;;  %v6750_v54 = vld [vmem:[#allocation2 + $0x44] sm:$0xf0]  ;;  %v2154_v18 = vrot.slane %v2153_v40, 4  ;;  %v2252_v11 = vld [vmem:[#allocation2 + $0x58] sm:$0xe]  ;;  %v2509_v33 = vrot.slane %v2508_v14, 4 }
 0x23c   :  { %v3702_v38 = vpop.f32.mrf.mxu1  ;;  %v4872_v47 = vor.u32 %v6750_v54, %v6748_v53  ;;  %v6790_v40 = vld [vmem:[#allocation2 + $0x6c] sm:$0x1]  ;;  %v2533_v14 = vshll.u32 %v2367_v9, 16 }
 0x23d   :  { %v3703_v55 = vadd.f32 %v3702_v38, %v6698_v42  ;;  %v2130_v42 = vrot.slane %v2128_v49, 5  ;;  %v3003_v38 = vunpack.c.l.b16 %v2486_v5  ;;  %v1998_v49 = vld [vmem:[#allocation2 + $0x68] sm:$0xf]  ;;  %v2330_v5 = vrot.slane %v6740_v63, 5 }
 0x23e   :  { %v6731_v21 = vpop.f32.mrf.mxu0  ;;  %v2161_v16 = vshrl.u32 %v1998_v49, 16  ;;  %v2164_v23 = vshll.u32 %v1998_v49, 16  ;;  %v2514_v15 = vsel %vm5488_vm3, %v2509_v33, %v2513_v1  ;;  %v6811_v49 = vld [vmem:[#allocation2 + $0x74] sm:$0x1] }
 0x23f   :  { %v6729_v61 = vadd.f32 %v3751_v17, %v3703_v55  ;;  %v2131_v6 = vsel %vm5488_vm3, %v2126_v62, %v2130_v42  ;;  %v2518_v17 = vrot.slane %v2516_v44, 4  ;;  %v2140_v55 = vrot.slane %v2139_v48, 4  ;;  %v5353_v62 = vld [vmem:[%s7550_s3] sm:$0xff]  ;;  %v6786_v44 = vld [vmem:[#allocation2 + $0x64] sm:$0xf0] }
 0x240   :  { %3949 = vmatmul.bf16.gmra.mxu2 %v4868_v52  ;;  %v2892_v39 = vunpack.c.l.b16 %v2131_v6  ;;  %v2521_v52 = vrot.slane %v2519_v57, 5  ;;  %4323 = vmatpush.bf16.msrb.mxu1 %v5353_v62  ;;  %v3016_v24 = vpack.c.b16 %v3004_v13, %v3003_v38  ;;  %v2323_v42 = vsel %vm6207_vm0, %v4768_v10, %v2322_v60  ;;  %v2368_v60 = vld [vmem:[#allocation2 + $0x78] sm:$0xf] }
 0x241   :  { %v2145_v32 = vsel %vm5488_vm3, %v2140_v55, %v2144_v7  ;;  %v2159_v6 = vsel %vm5488_vm3, %v2154_v18, %v2158_v4  ;;  %v2525_v48 = vshll.u32 %v6773_v12, 16  ;;  %v4769_v57 = vrot.slane %v2252_v11, 9 }
 0x242   :  { %v2904_v0 = vpack.c.b16 %v2892_v39, %v2891_v19  ;;  %v2522_v25 = vor.u32 %v2521_v52, %v2518_v17  ;;  %v2163_v3 = vrot.slane %v2161_v16, 4  ;;  %v2166_v10 = vrot.slane %v2164_v23, 5 }
 0x243   :  { %v3754_v28 = vpop.f32.mrf.mxu2  ;;  %v2924_v53 = vunpack.c.l.b16 %v2323_v42  ;;  %v2893_v54 = vunpack.c.l.b16 %v2145_v32  ;;  %v2894_v31 = vunpack.c.l.b16 %v2159_v6  ;;  %v2527_v38 = vrot.slane %v2525_v48, 5  ;;  %v2001_v32 = vld [vmem:[#allocation2 + $0x80] sm:$0xf] }
 0x244   :  { %v3705_v50 = vpop.f32.mrf.mxu1  ;;  %v2523_v39 = vrot.slane %v2522_v25, 4  ;;  %v2170_v52 = vshll.u32 %v6790_v40, 16  ;;  %v2177_v55 = vrot.slane %v2175_v37, 4  ;;  %v2530_v18 = vshrl.u32 %v2367_v9, 16  ;;  %v6830_v37 = vld [vmem:[#allocation2 + $0x7c] sm:$0x1] }
 0x245   :  { %v3706_v22 = vadd.f32 %v3705_v50, %v6717_v2  ;;  %v6758_v2 = vpop.f32.mrf.mxu3  ;;  %v2326_v50 = vrot.slane %v6736_v30, 5  ;;  %v4876_v30 = vor.u32 %v6786_v44, %v6782_v58  ;;  %v2167_v62 = vor.u32 %v2166_v10, %v2163_v3 }
 0x246   :  { %v6765_v56 = vpop.f32.mrf.mxu0  ;;  %v2528_v34 = vsel %vm5488_vm3, %v2523_v39, %v2527_v38  ;;  %v2936_v11 = vpack.c.b16 %v2924_v53, %v2923_v46  ;;  %v2905_v16 = vpack.c.b16 %v2894_v31, %v2893_v54  ;;  %v2547_v42 = vshll.u32 %v2368_v60, 16 }
 0x247   :  { %v6760_v20 = vadd.f32 %v3754_v28, %v3706_v22  ;;  %3900 = vmatmul.bf16.gmra.mxu1 %v2935_v29  ;;  %v4770_v28 = vrot.slane %v2253_v8, 9  ;;  %v6804_v17 = vsel %vm6207_vm0, %v4769_v57, %v2326_v50  ;;  %v2184_v23 = vshll.u32 %v6811_v49, 16 }
 0x248   :  { %v2925_v8 = vunpack.c.l.b16 %v6804_v17  ;;  %v3006_v6 = vunpack.c.l.b16 %v2528_v34  ;;  %v6821_v33 = vrot.slane %v2170_v52, 5  ;;  %v2532_v1 = vrot.slane %v2530_v18, 4 }
 0x249   :  { %3856 = vmatmul.bf16.gmra.mxu0 %v2904_v0  ;;  %v6809_v43 = vsel %vm6207_vm0, %v4770_v28, %v2330_v5  ;;  %v2535_v46 = vrot.slane %v2533_v14, 5  ;;  %v5339_v28 = vld [vmem:[%s7549_s2 + $0x210] sm:$0xff]  ;;  %v2370_v5 = vld [vmem:[#allocation2 + $0x88] sm:$0xf]  ;;  %v2549_v39 = vrot.slane %v2547_v42, 5  ;;  %v2203_v9 = vshrl.u32 %v2001_v32, 16 }
 0x24a   :  { %v2186_v53 = vrot.slane %v2184_v23, 5  ;;  %4034 = vmatpush.bf16.msrb.mxu0 %v5339_v28  ;;  %v2206_v54 = vshll.u32 %v2001_v32, 16  ;;  %v2572_v17 = vshrl.u32 %v2370_v5, 16  ;;  %v2575_v52 = vshll.u32 %v2370_v5, 16 }
 0x24b   :  { %v3756_v19 = vpop.f32.mrf.mxu2  ;;  %4003 = vmatmul.bf16.gmra.mxu3 %v3016_v24  ;;  %v3005_v24 = vunpack.c.l.b16 %v2514_v15  ;;  %v2536_v15 = vor.u32 %v2535_v46, %v2532_v1  ;;  %v2553_v34 = vshll.u32 %v6830_v37, 16 }
 0x24c   :  { %v3707_v29 = vpop.f32.mrf.mxu1  ;;  %v2577_v1 = vrot.slane %v2575_v52, 5 }
 0x24d   :  { %v3708_v45 = vadd.f32 %v3707_v29, %v6731_v21  ;;  %v2178_v21 = vshll.u32 %v1999_v59, 16  ;;  %v6798_v63 = vpop.f32.mrf.mxu3  ;;  %v2926_v59 = vunpack.c.l.b16 %v6809_v43  ;;  %v6819_v29 = vld [vmem:[#allocation2 + $0x74] sm:$0x1]  ;;  %v2537_v32 = vrot.slane %v2536_v15, 4 }
 0x24e   :  { %v6794_v13 = vpop.f32.mrf.mxu0  ;;  %v2539_v38 = vshll.u32 %v6819_v29, 16 }
 0x24f   :  { %v6792_v22 = vadd.f32 %v3756_v19, %v3708_v45  ;;  %v2180_v0 = vrot.slane %v2178_v21, 5  ;;  %v2000_v19 = vld [vmem:[#allocation2 + $0x78] sm:$0xf]  ;;  %v2369_v45 = vld [vmem:[#allocation2 + $0x80] sm:$0xf] }
 0x250   :  { %3954 = vmatmul.bf16.gmra.mxu2 %v4872_v47  ;;  %v2544_v47 = vshrl.u32 %v2368_v60, 16  ;;  %v2189_v10 = vshrl.u32 %v2000_v19, 16  ;;  %v2192_v21 = vshll.u32 %v2000_v19, 16  ;;  %v2558_v31 = vshrl.u32 %v2369_v45, 16 }
 0x251   :  { %v2181_v57 = vor.u32 %v2180_v0, %v2177_v55  ;;  %v2561_v60 = vshll.u32 %v2369_v45, 16  ;;  %v3017_v55 = vpack.c.b16 %v3006_v6, %v3005_v24  ;;  %v2334_v45 = vrot.slane %v6790_v40, 5 }
 0x252   :  { %v2546_v50 = vrot.slane %v2544_v47, 4  ;;  %v2194_v42 = vrot.slane %v2192_v21, 5  ;;  %v2560_v24 = vrot.slane %v2558_v31, 4  ;;  %v2541_v5 = vrot.slane %v2539_v38, 5  ;;  %v6857_v31 = vld [vmem:[#allocation2 + $0x8c] sm:$0x1] }
 0x253   :  { %v3759_v4 = vpop.f32.mrf.mxu2  ;;  %v2182_v14 = vrot.slane %v2181_v57, 4  ;;  %v2563_v19 = vrot.slane %v2561_v60, 5  ;;  %v2338_v57 = vrot.slane %v6811_v49, 5 }
 0x254   :  { %v3710_v7 = vpop.f32.mrf.mxu1 }
 0x255   :  { %v3711_v25 = vadd.f32 %v3710_v7, %v6765_v56  ;;  %v2168_v56 = vrot.slane %v2167_v62, 4  ;;  %v6833_v43 = vpop.f32.mrf.mxu3  ;;  %v2254_v62 = vld [vmem:[#allocation2 + $0x68] sm:$0xe]  ;;  %v2550_v7 = vor.u32 %v2549_v39, %v2546_v50  ;;  %v6844_v50 = vld [vmem:[#allocation2 + $0x7c] sm:$0x1]  ;;  %v2187_v40 = vsel %vm5488_vm3, %v2182_v14, %v2186_v53 }
 0x256   :  { %v6828_v3 = vpop.f32.mrf.mxu0  ;;  %v4771_v6 = vrot.slane %v2254_v62, 9  ;;  %v2564_v60 = vor.u32 %v2563_v19, %v2560_v24  ;;  %v2198_v15 = vshll.u32 %v6844_v50, 16 }
 0x257   :  { %v6823_v48 = vadd.f32 %v3759_v4, %v3711_v25  ;;  %3905 = vmatmul.bf16.gmra.mxu1 %v2936_v11  ;;  %v2173_v18 = vsel %vm5488_vm3, %v2168_v56, %v6821_v33  ;;  %v2255_v4 = vld [vmem:[#allocation2 + $0x70] sm:$0xe]  ;;  %v2191_v11 = vrot.slane %v2189_v10, 4  ;;  %v2205_v25 = vrot.slane %v2203_v9, 4  ;;  %v6848_v10 = vld [vmem:[#allocation2 + $0x84] sm:$0x1] }
 0x258   :  { %v2574_v33 = vrot.slane %v2572_v17, 4  ;;  %v4772_v56 = vrot.slane %v2255_v4, 9  ;;  %v2551_v39 = vrot.slane %v2550_v7, 4  ;;  %v6850_v9 = vld [vmem:[#allocation2 + $0x84] sm:$0x1]  ;;  %v2895_v49 = vunpack.c.l.b16 %v2173_v18 }
 0x259   :  { %3861 = vmatmul.bf16.gmra.mxu0 %v2905_v16  ;;  %v2208_v16 = vrot.slane %v2206_v54, 5  ;;  %v2195_v21 = vor.u32 %v2194_v42, %v2191_v11  ;;  %v2335_v17 = vsel %vm6207_vm0, %v4771_v6, %v2334_v45  ;;  %v2212_v44 = vshll.u32 %v6848_v10, 16  ;;  %v2002_v11 = vld [vmem:[#allocation2 + $0x88] sm:$0xf]  ;;  %v6874_v42 = vld [vmem:[#allocation2 + $0x70] sm:$0xf] }
 0x25a   :  { %v2578_v38 = vor.u32 %v2577_v1, %v2574_v33  ;;  %v2339_v58 = vsel %vm6207_vm0, %v4772_v56, %v2338_v57  ;;  %v2565_v4 = vrot.slane %v2564_v60, 4  ;;  %v2200_v24 = vrot.slane %v2198_v15, 5  ;;  %v2003_v45 = vld [vmem:[#allocation2 + $0x90] sm:$0xf]  ;;  %v6893_v60 = vld [vmem:[#allocation2 + $0x78] sm:$0xe] }
 0x25b   :  { %v3761_v47 = vpop.f32.mrf.mxu2  ;;  %4008 = vmatmul.bf16.gmra.mxu3 %v3017_v55  ;;  %v2209_v54 = vor.u32 %v2208_v16, %v2205_v25  ;;  %v2896_v55 = vunpack.c.l.b16 %v2187_v40  ;;  %v2196_v14 = vrot.slane %v2195_v21, 4  ;;  %v6876_v25 = vld [vmem:[#allocation2 + $0x74] sm:$0xf0]  ;;  %v2928_v16 = vunpack.c.l.b16 %v2339_v58  ;;  %v6887_v21 = vld [vmem:[#allocation2 + $0x90] sm:$0xf] }
 0x25c   :  { %v3712_v0 = vpop.f32.mrf.mxu1  ;;  %v2579_v19 = vrot.slane %v2578_v38, 4  ;;  %v2214_v33 = vrot.slane %v2212_v44, 5  ;;  %v2231_v38 = vshrl.u32 %v2003_v45, 16  ;;  %v2621_v58 = vld [vmem:[#allocation2 + $0x60] sm:$0xe] }
 0x25d   :  { %v3713_v23 = vadd.f32 %v3712_v0, %v6794_v13  ;;  %v2937_v13 = vpack.c.b16 %v2926_v59, %v2925_v8  ;;  %v2542_v8 = vsel %vm5488_vm3, %v2537_v32, %v2541_v5  ;;  %v2555_v59 = vrot.slane %v2553_v34, 5  ;;  %v6871_v62 = vpop.f32.mrf.mxu3 }
 0x25e   :  { %v6846_v28 = vpop.f32.mrf.mxu0  ;;  %v2581_v34 = vshll.u32 %v6857_v31, 16  ;;  %v2210_v7 = vrot.slane %v2209_v54, 4  ;;  %v2201_v57 = vsel %vm5488_vm3, %v2196_v14, %v2200_v24  ;;  %v2906_v40 = vpack.c.b16 %v2896_v55, %v2895_v49 }
 0x25f   :  { %v6840_v46 = vadd.f32 %v3761_v47, %v3713_v23  ;;  %v2556_v18 = vsel %vm5488_vm3, %v2551_v39, %v2555_v59  ;;  %v3007_v47 = vunpack.c.l.b16 %v2542_v8  ;;  %v2927_v23 = vunpack.c.l.b16 %v2335_v17 }
 0x260   :  { %3959 = vmatmul.bf16.gmra.mxu2 %v4876_v30  ;;  %v2567_v30 = vshll.u32 %v6850_v9, 16  ;;  %v3008_v6 = vunpack.c.l.b16 %v2556_v18  ;;  %v2583_v5 = vrot.slane %v2581_v34, 5  ;;  %v2217_v39 = vshrl.u32 %v2002_v11, 16 }
 0x261   :  { %v2220_v8 = vshll.u32 %v2002_v11, 16  ;;  %v4880_v59 = vor.u32 %v6876_v25, %v6874_v42  ;;  %v2234_v17 = vshll.u32 %v2003_v45, 16  ;;  %v6899_v44 = vpack.c.b16 %v2928_v16, %v2927_v23  ;;  %v2623_v23 = vld [vmem:[#allocation2 + $0x70] sm:$0xe] }
 0x262   :  { %v2569_v1 = vrot.slane %v2567_v30, 5  ;;  %v2584_v15 = vsel %vm5488_vm3, %v2579_v19, %v2583_v5  ;;  %v3018_v49 = vpack.c.b16 %v3008_v6, %v3007_v47  ;;  %v6901_v30 = vunpack.c.l.b16 %v2201_v57  ;;  %v2625_v5 = vld [vmem:[#allocation2 + $0x80] sm:$0xe] }
 0x263   :  { %v3764_v52 = vpop.f32.mrf.mxu2  ;;  %v4773_v34 = vrot.slane %v6893_v60, 9  ;;  %v6914_v11 = vunpack.c.l.b16 %v2584_v15  ;;  %v6916_v42 = vrot.slane %v2220_v8, 5  ;;  %v4785_v25 = vrot.slane %v2621_v58, 9  ;;  %v2627_v58 = vld [vmem:[#allocation2 + $0x90] sm:$0xe] }
 0x264   :  { %v3715_v53 = vpop.f32.mrf.mxu1  ;;  %v2570_v54 = vsel %vm5488_vm3, %v2565_v4, %v2569_v1  ;;  %v2622_v4 = vld [vmem:[#allocation2 + $0x68] sm:$0xe]  ;;  %v6918_v16 = vrot.slane %v2231_v38, 4  ;;  %v6920_v24 = vrot.slane %v2234_v17, 5  ;;  %v2589_v19 = vshll.u32 %v6887_v21, 16 }
 0x265   :  { %v3716_v0 = vadd.f32 %v3715_v53, %v6828_v3  ;;  %v5338_v3 = vld [vmem:[%s7549_s2 + $0x208] sm:$0xff]  ;;  %v2586_v53 = vshrl.u32 %v6887_v21, 16  ;;  %v6906_v14 = vunpack.c.l.b16 %v2570_v54  ;;  %v2695_v6 = vrot.slane %v6746_v26, 5  ;;  %v6924_v1 = vpop.f32.mrf.mxu3 }
 0x266   :  { %v6883_v56 = vpop.f32.mrf.mxu0  ;;  %4035 = vmatpush.bf16.msrb.mxu0 %v5338_v3  ;;  %v4786_v57 = vrot.slane %v2622_v4, 9  ;;  %v2699_v21 = vrot.slane %v6773_v12, 5  ;;  %v2703_v26 = vrot.slane %v6819_v29, 5  ;;  %v2626_v54 = vld [vmem:[#allocation2 + $0x88] sm:$0xe]  ;;  %v2707_v17 = vrot.slane %v6830_v37, 5 }
 0x267   :  { %v6878_v32 = vadd.f32 %v3764_v52, %v3716_v0  ;;  %3910 = vmatmul.bf16.gmra.mxu1 %v2937_v13  ;;  %v2215_v13 = vsel %vm5488_vm3, %v2210_v7, %v2214_v33  ;;  %v6909_v0 = vrot.slane %v2217_v39, 4  ;;  %v6911_v7 = vld [vmem:[#allocation2 + $0x98] sm:$0xf]  ;;  %v2711_v29 = vrot.slane %v6850_v9, 5 }
 0x268   :  { %v6904_v18 = vunpack.c.l.b16 %v2215_v13  ;;  %v2624_v33 = vld [vmem:[#allocation2 + $0x78] sm:$0xe]  ;;  %v2600_v45 = vshrl.u32 %v6911_v7, 16  ;;  %v4787_v13 = vrot.slane %v2623_v23, 9  ;;  %v2603_v8 = vshll.u32 %v6911_v7, 16 }
 0x269   :  { %3866 = vmatmul.bf16.gmra.mxu0 %v2906_v40  ;;  %v2696_v40 = vsel %vm6207_vm0, %v4785_v25, %v2695_v6  ;;  %v4788_v38 = vrot.slane %v2624_v33, 9  ;;  %v4790_v37 = vrot.slane %v2626_v54, 9 }
 0x26a   :  { %v3037_v15 = vunpack.c.l.b16 %v2696_v40  ;;  %v2704_v12 = vsel %vm6207_vm0, %v4787_v13, %v2703_v26 }
 0x26b   :  { %v3766_v55 = vpop.f32.mrf.mxu2  ;;  %4013 = vmatmul.bf16.gmra.mxu3 %v3018_v49  ;;  %v6939_v49 = vld [vmem:[#allocation2 + $0x94] sm:$0x1]  ;;  %v2708_v7 = vsel %vm6207_vm0, %v4788_v38, %v2707_v17  ;;  %v3039_v4 = vunpack.c.l.b16 %v2704_v12 }
 0x26c   :  { %v3717_v52 = vpop.f32.mrf.mxu1  ;;  %v3040_v6 = vunpack.c.l.b16 %v2708_v7  ;;  %v2719_v13 = vrot.slane %v6939_v49, 5  ;;  %v2605_v7 = vrot.slane %v2603_v8, 5  ;;  %v2223_v8 = vor.u32 %v6916_v42, %v6909_v0 }
 0x26d   :  { %v3718_v47 = vadd.f32 %v3717_v52, %v6846_v28  ;;  %v6928_v28 = vrot.slane %v2586_v53, 4  ;;  %v2700_v53 = vsel %vm6207_vm0, %v4786_v57, %v2699_v21  ;;  %v4789_v52 = vrot.slane %v2625_v5, 9 }
 0x26e   :  { %v6931_v39 = vpop.f32.mrf.mxu0  ;;  %v2715_v57 = vrot.slane %v6857_v31, 5  ;;  %v4791_v5 = vrot.slane %v2627_v58, 9  ;;  %v6957_v26 = vpack.c.b16 %v3040_v6, %v3039_v4  ;;  %v2257_v31 = vld [vmem:[#allocation2 + $0x80] sm:$0xe]  ;;  %v2591_v58 = vrot.slane %v2589_v19, 5 }
 0x26f   :  { %v6926_v3 = vadd.f32 %v3766_v55, %v3718_v47  ;;  %v6946_v55 = vld [vmem:[#allocation2 + $0x9c] sm:$0x1]  ;;  %v2628_v47 = vld [vmem:[#allocation2 + $0x98] sm:$0xe]  ;;  %v2712_v33 = vsel %vm6207_vm0, %v4789_v52, %v2711_v29  ;;  %v6970_v29 = vld [vmem:[#allocation2 + $0x8c] sm:$0x1]  ;;  %v2907_v19 = vpack.c.b16 %v6904_v18, %v6901_v30  ;;  %v3019_v30 = vpack.c.b16 %v6914_v11, %v6906_v14 }
 0x270   :  { %3964 = vmatmul.bf16.gmra.mxu2 %v4880_v59  ;;  %v3038_v59 = vunpack.c.l.b16 %v2700_v53  ;;  %v3041_v21 = vunpack.c.l.b16 %v2712_v33  ;;  %v2716_v54 = vsel %vm6207_vm0, %v4790_v37, %v2715_v57  ;;  %v4792_v38 = vrot.slane %v2628_v47, 9 }
 0x271   :  { %v2723_v17 = vrot.slane %v6946_v55, 5  ;;  %v2720_v12 = vsel %vm6207_vm0, %v4791_v5, %v2719_v13  ;;  %v2342_v47 = vrot.slane %v6844_v50, 5  ;;  %v4774_v33 = vrot.slane %v2257_v31, 9  ;;  %v5271_v13 = vld [vmem:[#allocation2 + $0x84] sm:$0xf0] }
 0x272   :  { %v6954_v40 = vpack.c.b16 %v3038_v59, %v3037_v15  ;;  %v3042_v15 = vunpack.c.l.b16 %v2716_v54  ;;  %v2602_v59 = vrot.slane %v2600_v45, 4  ;;  %v3043_v37 = vunpack.c.l.b16 %v2720_v12 }
 0x273   :  { %v3769_v23 = vpop.f32.mrf.mxu2  ;;  %v2724_v4 = vsel %vm6207_vm0, %v4792_v38, %v2723_v17  ;;  %v2346_v45 = vrot.slane %v6848_v10, 5  ;;  %v2237_v57 = vor.u32 %v6920_v24, %v6918_v16  ;;  %v2226_v50 = vshll.u32 %v6970_v29, 16 }
 0x274   :  { %v3720_v25 = vpop.f32.mrf.mxu1  ;;  %v3044_v6 = vunpack.c.l.b16 %v2724_v4  ;;  %v2592_v54 = vor.u32 %v2591_v58, %v6928_v28  ;;  %v2606_v0 = vor.u32 %v2605_v7, %v2602_v59  ;;  %v2609_v42 = vshll.u32 %v6946_v55, 16 }
 0x275   :  { %v3721_v9 = vadd.f32 %v3720_v25, %v6883_v56  ;;  %v5337_v56 = vld [vmem:[%s7549_s2 + $0x200] sm:$0xff]  ;;  %v6979_v25 = vld [vmem:[#allocation2 + $0x94] sm:$0x1]  ;;  %v2343_v14 = vsel %vm6207_vm0, %v4773_v34, %v2342_v47  ;;  %v2347_v11 = vsel %vm6207_vm0, %v4774_v33, %v2346_v45  ;;  %v2224_v24 = vrot.slane %v2223_v8, 4 }
 0x276   :  { %v3676_v52 = vpop.f32.mrf.mxu0  ;;  %4036 = vmatpush.bf16.msrb.mxu0 %v5337_v56  ;;  %v6991_v18 = vpack.c.b16 %v3044_v6, %v3043_v37  ;;  %v2240_v10 = vshll.u32 %v6979_v25, 16  ;;  %v2238_v38 = vrot.slane %v2237_v57, 4  ;;  %v2595_v17 = vshll.u32 %v6939_v49, 16 }
 0x277   :  { %v6962_v53 = vadd.f32 %v3769_v23, %v3721_v9  ;;  %3915 = vmatmul.bf16.gmra.mxu1 %v6899_v44  ;;  %v6974_v44 = vpop.f32.mrf.mxu3  ;;  %v6981_v23 = vpack.c.b16 %v3042_v15, %v3041_v21  ;;  %v4883_v21 = vld [vmem:[#allocation2 + $0x80] sm:$0xf]  ;;  %v2228_v58 = vrot.slane %v2226_v50, 5  ;;  %v2607_v15 = vrot.slane %v2606_v0, 4 }
 0x278   :  { %v4884_v28 = vor.u32 %v5271_v13, %v4883_v21  ;;  %v2242_v56 = vrot.slane %v2240_v10, 5  ;;  %v2611_v12 = vrot.slane %v2609_v42, 5  ;;  %v2929_v60 = vunpack.c.l.b16 %v2343_v14  ;;  %v2259_v21 = vld [vmem:[#allocation2 + $0x90] sm:$0xe]  ;;  %v2614_v14 = vld [vmem:[#allocation2 + $0x18] sm:$0xe] }
 0x279   :  { %3871 = vmatmul.bf16.gmra.mxu0 %v2907_v19  ;;  %v2930_v59 = vunpack.c.l.b16 %v2347_v11  ;;  %v2229_v34 = vsel %vm5488_vm3, %v2224_v24, %v2228_v58  ;;  %v2597_v4 = vrot.slane %v2595_v17, 5  ;;  %v2350_v0 = vrot.slane %v6970_v29, 5  ;;  %v5272_v17 = vld [vmem:[#allocation2 + $0x94] sm:$0xf0] }
 0x27a   :  { %v2243_v7 = vsel %vm5488_vm3, %v2238_v38, %v2242_v56  ;;  %v2612_v6 = vsel %vm5488_vm3, %v2607_v15, %v2611_v12  ;;  %v2899_v8 = vunpack.c.l.b16 %v2229_v34  ;;  %v4776_v42 = vrot.slane %v2259_v21, 9  ;;  %v4887_v38 = vld [vmem:[#allocation2 + $0x90] sm:$0xf] }
 0x27b   :  { %v3771_v9 = vpop.f32.mrf.mxu2  ;;  %4018 = vmatmul.bf16.gmra.mxu3 %v3019_v30  ;;  %v2939_v45 = vpack.c.b16 %v2930_v59, %v2929_v60  ;;  %v2900_v57 = vunpack.c.l.b16 %v2243_v7  ;;  %v2258_v30 = vld [vmem:[#allocation2 + $0x88] sm:$0xe]  ;;  %v2354_v27 = vrot.slane %v6979_v25, 5  ;;  %v5377_v25 = vld [vmem:[#allocation2 + $0x14] sm:$0x1]  ;;  %v4778_v12 = vrot.slane %v2614_v14, 9 }
 0x27c   :  { %v3722_v5 = vpop.f32.mrf.mxu1  ;;  %v2663_v15 = vrot.slane %v5377_v25, 5  ;;  %v5378_v60 = vld [vmem:[#allocation2 + $0x1c] sm:$0x1]  ;;  %v4888_v7 = vor.u32 %v5272_v17, %v4887_v38  ;;  %v5380_v17 = vld [vmem:[#allocation2 + $0x2c] sm:$0x1] }
 0x27d   :  { %v3723_v16 = vadd.f32 %v3722_v5, %v6931_v39  ;;  %v2593_v39 = vrot.slane %v2592_v54, 4  ;;  %v2908_v10 = vpack.c.b16 %v2900_v57, %v2899_v8  ;;  %v4775_v54 = vrot.slane %v2258_v30, 9 }
 0x27e   :  { %v3678_v55 = vpop.f32.mrf.mxu0  ;;  %v2355_v29 = vsel %vm6207_vm0, %v4776_v42, %v2354_v27  ;;  %v2667_v59 = vrot.slane %v5378_v60, 5  ;;  %v2616_v42 = vld [vmem:[#allocation2 + $0x28] sm:$0xe] }
 0x27f   :  { %v7004_v31 = vadd.f32 %v3771_v9, %v3723_v16  ;;  %v7010_v49 = vpop.f32.mrf.mxu3  ;;  %v2598_v47 = vsel %vm5488_vm3, %v2593_v39, %v2597_v4  ;;  %v3012_v9 = vunpack.c.l.b16 %v2612_v6  ;;  %v2613_v16 = vld [vmem:[#allocation2 + $0x10] sm:$0xe]  ;;  %v2351_v56 = vsel %vm6207_vm0, %v4775_v54, %v2350_v0  ;;  %v2615_v0 = vld [vmem:[#allocation2 + $0x20] sm:$0xe] }
 0x280   :  { %3969 = vmatmul.bf16.gmra.mxu2 %v4884_v28  ;;  %v3011_v5 = vunpack.c.l.b16 %v2598_v47  ;;  %v4777_v39 = vrot.slane %v2613_v16, 9  ;;  %v2668_v47 = vsel %vm6207_vm0, %v4778_v12, %v2667_v59  ;;  %v4779_v14 = vrot.slane %v2615_v0, 9 }
 0x281   :  { %v3030_v30 = vunpack.c.l.b16 %v2668_v47  ;;  %v4780_v38 = vrot.slane %v2616_v42, 9  ;;  %v5382_v42 = vld [vmem:[#allocation2 + $0x3c] sm:$0x1] }
 0x283   :  { %v3774_v19 = vpop.f32.mrf.mxu2 }
 0x284   :  { %v3725_v37 = vpop.f32.mrf.mxu1 }
 0x285   :  { %v3726_v33 = vadd.f32 %v3725_v37, %v3676_v52  ;;  %v3020_v52 = vpack.c.b16 %v3012_v9, %v3011_v5  ;;  %v2931_v37 = vunpack.c.l.b16 %v2351_v56  ;;  %v3794_v9 = vadd.f32 %v6758_v2, %v6683_v51 }
 0x286   :  { %v3681_v13 = vpop.f32.mrf.mxu0  ;;  %v3796_v51 = vadd.f32 %v6798_v63, %v6696_v35 }
 0x287   :  { %v7016_v50 = vadd.f32 %v3774_v19, %v3726_v33  ;;  %3920 = vmatmul.bf16.gmra.mxu1 %v2939_v45  ;;  %v7020_v28 = vpop.f32.mrf.mxu3  ;;  %v2664_v19 = vsel %vm6207_vm0, %v4777_v39, %v2663_v15  ;;  %v5179_v39 = vld [vmem:[%s7547_s0] sm:$0xf] }
 0x288   :  { %v3029_v57 = vunpack.c.l.b16 %v2664_v19  ;;  %v3799_v19 = vadd.f32 %v6833_v43, %v6712_v36  ;;  %v3801_v36 = vadd.f32 %v6871_v62, %v6729_v61 }
 0x289   :  { %3876 = vmatmul.bf16.gmra.mxu0 %v2908_v10 }
 0x28a   :  { %v3045_v54 = vpack.c.b16 %v3030_v30, %v3029_v57 }
 0x28b   :  { %v3776_v24 = vpop.f32.mrf.mxu2  ;;  %4023 = vmatmul.bf16.gmra.mxu3 %v3020_v52 }
 0x28c   :  { %v3727_v11 = vpop.f32.mrf.mxu1 }
 0x28d   :  { %v3728_v58 = vadd.f32 %v3727_v11, %v3678_v55  ;;  %v2932_v55 = vunpack.c.l.b16 %v2355_v29  ;;  %v5379_v11 = vld [vmem:[#allocation2 + $0x24] sm:$0x1]  ;;  %v5345_v29 = vld [vmem:[%s7547_s0 + $0x4] sm:$0xf0] }
 0x28e   :  { %v3683_v4 = vpop.f32.mrf.mxu0  ;;  %v5180_v60 = vor.u32 %v5345_v29, %v5179_v39 }
 0x28f   :  { %v7026_v34 = vadd.f32 %v3776_v24, %v3728_v58  ;;  %v2940_v8 = vpack.c.b16 %v2932_v55, %v2931_v37  ;;  %v7036_v52 = vpop.f32.mrf.mxu3  ;;  %v2671_v24 = vrot.slane %v5379_v11, 5  ;;  %v2675_v58 = vrot.slane %v5380_v17, 5 }
 0x290   :  { %3974 = vmatmul.bf16.gmra.mxu2 %v4888_v7 }
 0x291   :  { %v2672_v15 = vsel %vm6207_vm0, %v4779_v14, %v2671_v24  ;;  %v2676_v12 = vsel %vm6207_vm0, %v4780_v38, %v2675_v58  ;;  %v5346_v14 = vld [vmem:[%s7547_s0 + $0x14] sm:$0xf0] }
 0x292   :  { %v3031_v63 = vunpack.c.l.b16 %v2672_v15 }
 0x293   :  { %v3779_v33 = vpop.f32.mrf.mxu2 }
 0x294   :  { %v3730_v6 = vpop.f32.mrf.mxu1 }
 0x295   :  { %v3731_v45 = vadd.f32 %v3730_v6, %v3681_v13 }
 0x296   :  { %v3842_v21 = vpop.f32.mrf.mxu0 }
 0x297   :  { %v7032_v5 = vadd.f32 %v3779_v33, %v3731_v45  ;;  %3925 = vmatmul.bf16.gmra.mxu1 %v2940_v8  ;;  %v3843_v10 = vadd.f32 %v3842_v21, %v3794_v9  ;;  %v7052_v37 = vpop.f32.mrf.mxu3  ;;  %v2617_v45 = vld [vmem:[#allocation2 + $0x30] sm:$0xe]  ;;  %v2618_v8 = vld [vmem:[#allocation2 + $0x38] sm:$0xe] }
 0x298   :  { %v4781_v21 = vrot.slane %v2617_v45, 9  ;;  %v4782_v0 = vrot.slane %v2618_v8, 9  ;;  %v5384_v8 = vld [vmem:[#allocation2 + $0x4c] sm:$0x1] }
 0x299   :  { %4037 = vmatmul.bf16.vlgmr.msrb.gmra.mxu0 %v3045_v54 }
 0x29b   :  { %v3781_v16 = vpop.f32.mrf.mxu2 }
 0x29c   :  { %v3732_v27 = vpop.f32.mrf.mxu1 }
 0x29d   :  { %v3733_v13 = vadd.f32 %v3732_v27, %v3683_v4  ;;  %v3032_v4 = vunpack.c.l.b16 %v2676_v12  ;;  %v2683_v27 = vrot.slane %v5382_v42, 5 }
 0x29e   :  { %v3844_v2 = vpop.f32.mrf.mxu0 }
 0x29f   :  { %v7038_v56 = vadd.f32 %v3781_v16, %v3733_v13  ;;  %v3845_v25 = vadd.f32 %v3844_v2, %v3796_v51  ;;  %v3046_v33 = vpack.c.b16 %v3032_v4, %v3031_v63  ;;  %v5183_v13 = vld [vmem:[%s7547_s0 + $0x10] sm:$0xf]  ;;  %v7069_v11 = vpop.f32.mrf.mxu3  ;;  %v2684_v17 = vsel %vm6207_vm0, %v4782_v0, %v2683_v27 }
 0x2a0   :  { %v5184_v58 = vor.u32 %v5346_v14, %v5183_v13  ;;  %v3034_v39 = vunpack.c.l.b16 %v2684_v17 }
 0x2a3   :  { %v3940_v7 = vpop.f32.mrf.mxu2 }
 0x2a4   :  { %v3891_v59 = vpop.f32.mrf.mxu1 }
 0x2a5   :  { %v3892_v35 = vadd.f32 %v3891_v59, %v3843_v10  ;;  %v5381_v10 = vld [vmem:[#allocation2 + $0x34] sm:$0x1] }
 0x2a6   :  { %v3847_v47 = vpop.f32.mrf.mxu0  ;;  %v2679_v54 = vrot.slane %v5381_v10, 5 }
 0x2a7   :  { %v7054_v55 = vadd.f32 %v3940_v7, %v3892_v35  ;;  %5217 = vmatmul.msk.bf16.vlgmr.msrb.gmra.mxu1 %vm326_vm2, %v5180_v60  ;;  %v3848_v6 = vadd.f32 %v3847_v47, %v3799_v19  ;;  %v7080_v59 = vpop.f32.mrf.mxu3  ;;  %v2619_v7 = vld [vmem:[#allocation2 + $0x40] sm:$0xe]  ;;  %v2620_v35 = vld [vmem:[#allocation2 + $0x48] sm:$0xe] }
 0x2a8   :  { %v2680_v38 = vsel %vm6207_vm0, %v4781_v21, %v2679_v54  ;;  %v4783_v47 = vrot.slane %v2619_v7, 9  ;;  %v4784_v45 = vrot.slane %v2620_v35, 9  ;;  %v5347_v21 = vld [vmem:[%s7547_s0 + $0x24] sm:$0xf0] }
 0x2a9   :  { %4042 = vmatmul.bf16.gmra.mxu0 %v3046_v33  ;;  %v3033_v2 = vunpack.c.l.b16 %v2680_v38 }
 0x2ab   :  { %v3942_v30 = vpop.f32.mrf.mxu2  ;;  %v3047_v60 = vpack.c.b16 %v3034_v39, %v3033_v2  ;;  %v5191_v39 = vld [vmem:[%s7547_s0 + $0x30] sm:$0xf] }
 0x2ac   :  { %v3893_v57 = vpop.f32.mrf.mxu1 }
 0x2ad   :  { %v3894_v9 = vadd.f32 %v3893_v57, %v3845_v25  ;;  %v3804_v25 = vadd.f32 %v6924_v1, %v6760_v20  ;;  %v2691_v57 = vrot.slane %v5384_v8, 5  ;;  %v3806_v20 = vadd.f32 %v6974_v44, %v6792_v22 }
 0x2ae   :  { %v3849_v43 = vpop.f32.mrf.mxu0 }
 0x2af   :  { %v7059_v16 = vadd.f32 %v3942_v30, %v3894_v9  ;;  %v3850_v24 = vadd.f32 %v3849_v43, %v3801_v36  ;;  %v5187_v9 = vld [vmem:[%s7547_s0 + $0x20] sm:$0xf]  ;;  %v2692_v0 = vsel %vm6207_vm0, %v4784_v45, %v2691_v57  ;;  %v3823_v43 = vpop.f32.mrf.mxu3 }
 0x2b0   :  { %v5188_v42 = vor.u32 %v5347_v21, %v5187_v9  ;;  %v3036_v44 = vunpack.c.l.b16 %v2692_v0  ;;  %v3821_v9 = vadd.f32 %v7080_v59, %v7004_v31 }
 0x2b3   :  { %v3945_v62 = vpop.f32.mrf.mxu2 }
 0x2b4   :  { %v3896_v61 = vpop.f32.mrf.mxu1 }
 0x2b5   :  { %v3897_v51 = vadd.f32 %v3896_v61, %v3848_v6  ;;  %v5383_v6 = vld [vmem:[#allocation2 + $0x44] sm:$0x1] }
 0x2b6   :  { %v3852_v15 = vpop.f32.mrf.mxu0  ;;  %v2687_v33 = vrot.slane %v5383_v6, 5 }
 0x2b7   :  { %v7075_v29 = vadd.f32 %v3945_v62, %v3897_v51  ;;  %5218 = vmatmul.msk.bf16.gmra.mxu1 %vm326_vm2, %v5184_v58  ;;  %v3853_v12 = vadd.f32 %v3852_v15, %v3804_v25  ;;  %v3811_v62 = vadd.f32 %v7020_v28, %v6840_v46  ;;  %v3825_v51 = vpop.f32.mrf.mxu3  ;;  %v3814_v46 = vadd.f32 %v7036_v52, %v6878_v32  ;;  %v5349_v32 = vld [vmem:[%s7547_s0 + $0x4c] sm:$0xf0] }
 0x2b8   :  { %v2688_v54 = vsel %vm6207_vm0, %v4783_v47, %v2687_v33  ;;  %v5195_v47 = vld [vmem:[%s7547_s0 + $0x48] sm:$0xf] }
 0x2b9   :  { %4047 = vmatmul.bf16.gmra.mxu0 %v3047_v60  ;;  %v3035_v22 = vunpack.c.l.b16 %v2688_v54  ;;  %v5196_v6 = vor.u32 %v5349_v32, %v5195_v47 }
 0x2bb   :  { %v3947_v4 = vpop.f32.mrf.mxu2  ;;  %v3048_v58 = vpack.c.b16 %v3036_v44, %v3035_v22  ;;  %v3826_v44 = vadd.f32 %v3825_v51, %v7026_v34 }
 0x2bc   :  { %v3898_v63 = vpop.f32.mrf.mxu1 }
 0x2bd   :  { %v3899_v19 = vadd.f32 %v3898_v63, %v3850_v24  ;;  %v3809_v24 = vadd.f32 %v7010_v49, %v6823_v48  ;;  %v5348_v48 = vld [vmem:[%s7547_s0 + $0x34] sm:$0xf0] }
 0x2be   :  { %v3854_v1 = vpop.f32.mrf.mxu0  ;;  %v5192_v25 = vor.u32 %v5348_v48, %v5191_v39 }
 0x2bf   :  { %v7082_v30 = vadd.f32 %v3947_v4, %v3899_v19  ;;  %v3855_v10 = vadd.f32 %v3854_v1, %v3806_v20  ;;  %v3828_v7 = vpop.f32.mrf.mxu3  ;;  %v3816_v4 = vadd.f32 %v7052_v37, %v6926_v3  ;;  %v3819_v3 = vadd.f32 %v7069_v11, %v6962_v53  ;;  %v5350_v53 = vld [vmem:[%s7547_s0 + $0x5c] sm:$0xf0] }
 0x2c3   :  { %v3950_v13 = vpop.f32.mrf.mxu2 }
 0x2c4   :  { %v3901_v27 = vpop.f32.mrf.mxu1 }
 0x2c5   :  { %v3902_v36 = vadd.f32 %v3901_v27, %v3853_v12 }
 0x2c6   :  { %v3857_v38 = vpop.f32.mrf.mxu0 }
 0x2c7   :  { %v7096_v14 = vadd.f32 %v3950_v13, %v3902_v36  ;;  %5219 = vmatmul.msk.bf16.gmra.mxu1 %vm326_vm2, %v5188_v42  ;;  %v3858_v17 = vadd.f32 %v3857_v38, %v3809_v24  ;;  %v3830_v33 = vpop.f32.mrf.mxu3  ;;  %v3824_v42 = vadd.f32 %v3823_v43, %v7016_v50  ;;  %v5203_v24 = vld [vmem:[%s7547_s0 + $0x68] sm:$0xf]  ;;  %v5351_v38 = vld [vmem:[%s7547_s0 + $0x6c] sm:$0xf0] }
 0x2c8   :  { %v3831_v48 = vadd.f32 %v3830_v33, %v7038_v56 }
 0x2c9   :  { %4052 = vmatmul.bf16.gmra.mxu0 %v3048_v58 }
 0x2cc   :  { %v3903_v41 = vpop.f32.mrf.mxu1 }
 0x2cd   :  { %v7101_v61 = vadd.f32 %v3903_v41, %v3855_v10  ;;  %v5199_v10 = vld [vmem:[%s7547_s0 + $0x58] sm:$0xf] }
 0x2ce   :  { %v3859_v2 = vpop.f32.mrf.mxu0  ;;  %v5200_v54 = vor.u32 %v5350_v53, %v5199_v10 }
 0x2cf   :  { %v3860_v49 = vadd.f32 %v3859_v2, %v3811_v62  ;;  %v3989_v1 = vpop.f32.mrf.mxu3 }
 0x2d4   :  { %v3906_v15 = vpop.f32.mrf.mxu1 }
 0x2d5   :  { %v7111_v12 = vadd.f32 %v3906_v15, %v3858_v17  ;;  %v5204_v17 = vor.u32 %v5351_v38, %v5203_v24  ;;  %v5352_v15 = vld [vmem:[%s7547_s0 + $0x7c] sm:$0xf0] }
 0x2d6   :  { %v3862_v28 = vpop.f32.mrf.mxu0 }
 0x2d7   :  { %5220 = vmatmul.msk.bf16.gmra.mxu1 %vm326_vm2, %v5192_v25  ;;  %v3863_v60 = vadd.f32 %v3862_v28, %v3814_v46  ;;  %v3991_v27 = vpop.f32.mrf.mxu3  ;;  %v5207_v25 = vld [vmem:[%s7547_s0 + $0x78] sm:$0xf] }
 0x2d8   :  { %v5208_v46 = vor.u32 %v5352_v15, %v5207_v25  ;;  %v3992_v32 = vadd.f32 %v3991_v27, %v7059_v16 }
 0x2d9   :  { %4057 = vmatmul.bf16.gmra.mxu0 %v6954_v40 }
 0x2dc   :  { %v3908_v35 = vpop.f32.mrf.mxu1 }
 0x2dd   :  { %v7117_v63 = vadd.f32 %v3908_v35, %v3860_v49 }
 0x2de   :  { %v3864_v19 = vpop.f32.mrf.mxu0 }
 0x2df   :  { %v3865_v52 = vadd.f32 %v3864_v19, %v3816_v4  ;;  %v3994_v43 = vpop.f32.mrf.mxu3 }
 0x2e4   :  { %v3911_v45 = vpop.f32.mrf.mxu1 }
 0x2e5   :  { %v7127_v40 = vadd.f32 %v3911_v45, %v3863_v60  ;;  %v3952_v45 = vpop.f32.mrf.mxu2 }
 0x2e6   :  { %v3867_v37 = vpop.f32.mrf.mxu0  ;;  %v3953_v27 = vadd.f32 %v3952_v45, %v7101_v61 }
 0x2e7   :  { %5221 = vmatmul.msk.bf16.gmra.mxu1 %vm326_vm2, %v5196_v6  ;;  %v3868_v8 = vadd.f32 %v3867_v37, %v3819_v3  ;;  %v3996_v51 = vpop.f32.mrf.mxu3  ;;  %v3995_v3 = vadd.f32 %v3994_v43, %v7075_v29 }
 0x2e9   :  { %4062 = vmatmul.bf16.gmra.mxu0 %v6957_v26 }
 0x2ec   :  { %v3913_v57 = vpop.f32.mrf.mxu1 }
 0x2ed   :  { %v7133_v20 = vadd.f32 %v3913_v57, %v3865_v52  ;;  %v3955_v57 = vpop.f32.mrf.mxu2 }
 0x2ee   :  { %v3869_v21 = vpop.f32.mrf.mxu0 }
 0x2ef   :  { %v3870_v11 = vadd.f32 %v3869_v21, %v3821_v9 }
 0x2f4   :  { %v3916_v0 = vpop.f32.mrf.mxu1 }
 0x2f5   :  { %v7143_v26 = vadd.f32 %v3916_v0, %v3868_v8 }
 0x2f6   :  { %v3872_v31 = vpop.f32.mrf.mxu0 }
 0x2f7   :  { %5222 = vmatmul.msk.bf16.gmra.mxu1 %vm326_vm2, %v5200_v54  ;;  %v3873_v59 = vadd.f32 %v3872_v31, %v3824_v42 }
 0x2f9   :  { %4067 = vmatmul.bf16.gmra.mxu0 %v6981_v23  ;;  %v3829_v23 = vadd.f32 %v3828_v7, %v7032_v5  ;;  %v3990_v7 = vadd.f32 %v3989_v1, %v7054_v55  ;;  %v3997_v1 = vadd.f32 %v3996_v51, %v7082_v30 }
 0x2fc   :  { %v3918_v36 = vpop.f32.mrf.mxu1 }
 0x2fd   :  { %v7148_v22 = vadd.f32 %v3918_v36, %v3870_v11  ;;  %v3957_v11 = vpop.f32.mrf.mxu2  ;;  %v3956_v36 = vadd.f32 %v3955_v57, %v7111_v12 }
 0x2fe   :  { %v3874_v13 = vpop.f32.mrf.mxu0 }
 0x2ff   :  { %v3875_v50 = vadd.f32 %v3874_v13, %v3826_v44 }
 0x304   :  { %v3921_v58 = vpop.f32.mrf.mxu1 }
 0x305   :  { %v7157_v41 = vadd.f32 %v3921_v58, %v3873_v59  ;;  %v3960_v31 = vpop.f32.mrf.mxu2 }
 0x306   :  { %v3877_v34 = vpop.f32.mrf.mxu0  ;;  %v3961_v45 = vadd.f32 %v3960_v31, %v7127_v40 }
 0x307   :  { %5223 = vmatmul.msk.bf16.gmra.mxu1 %vm326_vm2, %v5204_v17  ;;  %v3878_v62 = vadd.f32 %v3877_v34, %v3829_v23  ;;  %v3958_v34 = vadd.f32 %v3957_v11, %v7117_v63 }
 0x309   :  { %4072 = vmatmul.bf16.gmra.mxu0 %v6991_v18  ;;  %v3999_v18 = vpop.f32.mrf.mxu3 }
 0x30a   :  { %v4000_v56 = vadd.f32 %v3999_v18, %v7096_v14 }
 0x30c   :  { %v3923_v2 = vpop.f32.mrf.mxu1 }
 0x30d   :  { %v7162_v39 = vadd.f32 %v3923_v2, %v3875_v50 }
 0x30e   :  { %v3879_v49 = vpop.f32.mrf.mxu0 }
 0x30f   :  { %v3880_v5 = vadd.f32 %v3879_v49, %v3831_v48  ;;  %v3962_v49 = vpop.f32.mrf.mxu2 }
 0x311   :  { %v4001_v14 = vpop.f32.mrf.mxu3 }
 0x312   :  { %v4002_v38 = vadd.f32 %v4001_v14, %v3953_v27 }
 0x314   :  { %v3926_v28 = vpop.f32.mrf.mxu1 }
 0x315   :  { %v7171_v60 = vadd.f32 %v3926_v28, %v3878_v62 }
 0x316   :  { %v4038_v35 = vpop.f32.mrf.mxu0 }
 0x317   :  { %5224 = vmatmul.msk.bf16.gmra.mxu1 %vm326_vm2, %v5208_v46  ;;  %v7176_v4 = vadd.f32 %v4038_v35, %v3990_v7 }
 0x319   :  { %v4004_v16 = vpop.f32.mrf.mxu3  ;;  %v4101_v44 = vmul.f32 %v7176_v4, %v7176_v4 }
 0x31a   :  { %v4005_v12 = vadd.f32 %v4004_v16, %v3956_v36 }
 0x31c   :  { %v3928_v19 = vpop.f32.mrf.mxu1 }
 0x31d   :  { %v7178_v47 = vadd.f32 %v3928_v19, %v3880_v5 }
 0x31e   :  { %v4040_v52 = vpop.f32.mrf.mxu0 }
 0x31f   :  { %v7181_v6 = vadd.f32 %v4040_v52, %v3992_v32 }
 0x321   :  { %v4006_v0 = vpop.f32.mrf.mxu3  ;;  %v4102_v30 = vmul.f32 %v7181_v6, %v7181_v6  ;;  %v4080_v13 = vadd.f32 %v7181_v6, %v7176_v4 }
 0x322   :  { %v4007_v7 = vadd.f32 %v4006_v0, %v3958_v34  ;;  %v3963_v0 = vadd.f32 %v3962_v49, %v7133_v20 }
 0x323   :  { %v4117_v61 = vadd.f32 %v4102_v30, %v4101_v44 }
 0x324   :  { %v7183_v33 = vpop.f32.mrf.mxu1 }
 0x326   :  { %v4043_v37 = vpop.f32.mrf.mxu0 }
 0x327   :  { %v7186_v55 = vadd.f32 %v4043_v37, %v3995_v3 }
 0x329   :  { %v4103_v24 = vmul.f32 %v7186_v55, %v7186_v55  ;;  %v4009_v50 = vpop.f32.mrf.mxu3  ;;  %v4081_v17 = vadd.f32 %v4080_v13, %v7186_v55 }
 0x32b   :  { %v4118_v62 = vadd.f32 %v4117_v61, %v4103_v24 }
 0x32c   :  { %v7188_v8 = vpop.f32.mrf.mxu1 }
 0x32e   :  { %v4045_v9 = vpop.f32.mrf.mxu0 }
 0x32f   :  { %v7191_v21 = vadd.f32 %v4045_v9, %v3997_v1  ;;  %v3965_v1 = vpop.f32.mrf.mxu2  ;;  %v4010_v9 = vadd.f32 %v4009_v50, %v3961_v45 }
 0x331   :  { %v4104_v58 = vmul.f32 %v7191_v21, %v7191_v21  ;;  %v4082_v51 = vadd.f32 %v4081_v17, %v7191_v21  ;;  %v4011_v52 = vpop.f32.mrf.mxu3 }
 0x332   :  { %v4012_v30 = vadd.f32 %v4011_v52, %v3963_v0 }
 0x333   :  { %v4119_v25 = vadd.f32 %v4118_v62, %v4104_v58 }
 0x334   :  { %v7193_v10 = vpop.f32.mrf.mxu1 }
 0x336   :  { %v4048_v53 = vpop.f32.mrf.mxu0 }
 0x337   :  { %v7195_v54 = vadd.f32 %v4048_v53, %v4000_v56  ;;  %v3967_v44 = vpop.f32.mrf.mxu2 }
 0x338   :  { %v3968_v34 = vadd.f32 %v3967_v44, %v7148_v22 }
 0x339   :  { %v4105_v2 = vmul.f32 %v7195_v54, %v7195_v54  ;;  %v4083_v15 = vadd.f32 %v4082_v51, %v7195_v54  ;;  %v4014_v27 = vpop.f32.mrf.mxu3 }
 0x33b   :  { %v4120_v28 = vadd.f32 %v4119_v25, %v4105_v2 }
 0x33c   :  { %v7197_v29 = vpop.f32.mrf.mxu1 }
 0x33e   :  { %v4050_v42 = vpop.f32.mrf.mxu0 }
 0x33f   :  { %v7214_v23 = vadd.f32 %v4050_v42, %v4002_v38  ;;  %v3966_v38 = vadd.f32 %v3965_v1, %v7143_v26  ;;  %v3970_v62 = vpop.f32.mrf.mxu2 }
 0x341   :  { %v4106_v5 = vmul.f32 %v7214_v23, %v7214_v23  ;;  %v4084_v63 = vadd.f32 %v4083_v15, %v7214_v23  ;;  %v4015_v17 = vadd.f32 %v4014_v27, %v3966_v38 }
 0x343   :  { %v4121_v35 = vadd.f32 %v4120_v28, %v4106_v5 }
 0x344   :  { %v7202_v59 = vpop.f32.mrf.mxu1 }
 0x346   :  { %v4053_v43 = vpop.f32.mrf.mxu0 }
 0x347   :  { %v7220_v48 = vadd.f32 %v4053_v43, %v4005_v12  ;;  %v4016_v43 = vpop.f32.mrf.mxu3 }
 0x348   :  { %v4017_v25 = vadd.f32 %v4016_v43, %v3968_v34 }
 0x349   :  { %v4107_v18 = vmul.f32 %v7220_v48, %v7220_v48  ;;  %v4085_v19 = vadd.f32 %v4084_v63, %v7220_v48  ;;  %v3971_v63 = vadd.f32 %v3970_v62, %v7157_v41 }
 0x34b   :  { %v4122_v3 = vadd.f32 %v4121_v35, %v4107_v18 }
 0x34c   :  { %v7225_v46 = vpop.f32.mrf.mxu1 }
 0x34e   :  { %v4055_v56 = vpop.f32.mrf.mxu0 }
 0x34f   :  { %v7231_v32 = vadd.f32 %v4055_v56, %v4007_v7  ;;  %v4019_v15 = vpop.f32.mrf.mxu3  ;;  %v3972_v7 = vpop.f32.mrf.mxu2 }
 0x351   :  { %v4086_v37 = vadd.f32 %v4085_v19, %v7231_v32  ;;  %v4108_v14 = vmul.f32 %v7231_v32, %v7231_v32  ;;  %v4020_v19 = vadd.f32 %v4019_v15, %v3971_v63  ;;  %v4388_v15 = vmul.f32 %v7183_v33, %v7183_v33 }
 0x352   :  { %v4390_v63 = vmul.f32 %v7193_v10, %v7193_v10 }
 0x353   :  { %v4123_v57 = vadd.f32 %v4122_v3, %v4108_v14 }
 0x354   :  { %v7237_v16 = vpop.f32.mrf.mxu1 }
 0x356   :  { %v4058_v53 = vpop.f32.mrf.mxu0 }
 0x357   :  { %v7239_v11 = vadd.f32 %v4058_v53, %v4010_v9  ;;  %v4021_v3 = vpop.f32.mrf.mxu3  ;;  %v3975_v1 = vpop.f32.mrf.mxu2 }
 0x359   :  { %v4087_v42 = vadd.f32 %v4086_v37, %v7239_v11  ;;  %v4109_v40 = vmul.f32 %v7239_v11, %v7239_v11  ;;  %v3973_v37 = vadd.f32 %v3972_v7, %v7162_v39 }
 0x35b   :  { %v4124_v31 = vadd.f32 %v4123_v57, %v4109_v40  ;;  %v4022_v9 = vadd.f32 %v4021_v3, %v3973_v37  ;;  %v3976_v40 = vadd.f32 %v3975_v1, %v7171_v60 }
 0x35c   :  { %v7247_v24 = vpop.f32.mrf.mxu1 }
 0x35e   :  { %v4060_v36 = vpop.f32.mrf.mxu0 }
 0x35f   :  { %v7245_v13 = vadd.f32 %v4060_v36, %v4012_v30 }
 0x361   :  { %v4088_v50 = vadd.f32 %v4087_v42, %v7245_v13  ;;  %v4110_v20 = vmul.f32 %v7245_v13, %v7245_v13 }
 0x363   :  { %v4125_v61 = vadd.f32 %v4124_v31, %v4110_v20  ;;  %v4024_v31 = vpop.f32.mrf.mxu3 }
 0x364   :  { %v7259_v26 = vpop.f32.mrf.mxu1  ;;  %v4025_v36 = vadd.f32 %v4024_v31, %v3976_v40 }
 0x366   :  { %v4063_v58 = vpop.f32.mrf.mxu0 }
 0x367   :  { %v7253_v12 = vadd.f32 %v4063_v58, %v4015_v17 }
 0x369   :  { %v4089_v51 = vadd.f32 %v4088_v50, %v7253_v12  ;;  %v4111_v2 = vmul.f32 %v7253_v12, %v7253_v12  ;;  %v3977_v50 = vpop.f32.mrf.mxu2 }
 0x36b   :  { %v4126_v49 = vadd.f32 %v4125_v61, %v4111_v2  ;;  %v3978_v61 = vadd.f32 %v3977_v50, %v7178_v47  ;;  %v4026_v58 = vpop.f32.mrf.mxu3  ;;  %v4367_v2 = vadd.f32 %v7188_v8, %v7183_v33 }
 0x36c   :  { %v7267_v35 = vpop.f32.mrf.mxu1 }
 0x36d   :  { %v4027_v34 = vadd.f32 %v4026_v58, %v3978_v61 }
 0x36e   :  { %v4065_v5 = vpop.f32.mrf.mxu0 }
 0x36f   :  { %v7261_v28 = vadd.f32 %v4065_v5, %v4017_v25  ;;  %v4368_v5 = vadd.f32 %v4367_v2, %v7193_v10 }
 0x371   :  { %v4090_v18 = vadd.f32 %v4089_v51, %v7261_v28  ;;  %v4112_v22 = vmul.f32 %v7261_v28, %v7261_v28 }
 0x373   :  { %v4127_v56 = vadd.f32 %v4126_v49, %v4112_v22  ;;  %v4389_v49 = vmul.f32 %v7188_v8, %v7188_v8 }
 0x374   :  { %v7275_v53 = vpop.f32.mrf.mxu1 }
 0x376   :  { %v4068_v52 = vpop.f32.mrf.mxu0 }
 0x377   :  { %v7269_v45 = vadd.f32 %v4068_v52, %v4020_v19  ;;  %v4369_v19 = vadd.f32 %v4368_v5, %v7197_v29  ;;  %v4391_v52 = vmul.f32 %v7197_v29, %v7197_v29 }
 0x379   :  { %v4091_v14 = vadd.f32 %v4090_v18, %v7269_v45  ;;  %v4113_v41 = vmul.f32 %v7269_v45, %v7269_v45 }
 0x37b   :  { %v4128_v57 = vadd.f32 %v4127_v56, %v4113_v41  ;;  %v4404_v56 = vadd.f32 %v4389_v49, %v4388_v15  ;;  %v4370_v41 = vadd.f32 %v4369_v19, %v7202_v59  ;;  %v4397_v19 = vmul.f32 %v7267_v35, %v7267_v35 }
 0x37c   :  { %v7285_v20 = vpop.f32.mrf.mxu1 }
 0x37d   :  { %v4371_v40 = vadd.f32 %v4370_v41, %v7225_v46 }
 0x37e   :  { %v4070_v0 = vpop.f32.mrf.mxu0 }
 0x37f   :  { %v7277_v42 = vadd.f32 %v4070_v0, %v4022_v9 }
 0x381   :  { %v4092_v27 = vadd.f32 %v4091_v14, %v7277_v42  ;;  %v4114_v39 = vmul.f32 %v7277_v42, %v7277_v42  ;;  %v4405_v14 = vadd.f32 %v4404_v56, %v4390_v63 }
 0x383   :  { %v4129_v30 = vadd.f32 %v4128_v57, %v4114_v39  ;;  %v4392_v57 = vmul.f32 %v7202_v59, %v7202_v59  ;;  %v4406_v0 = vadd.f32 %v4405_v14, %v4391_v52 }
 0x384   :  { %v7305_v18 = vpop.f32.mrf.mxu1 }
 0x386   :  { %v4073_v44 = vpop.f32.mrf.mxu0 }
 0x387   :  { %v7283_v38 = vadd.f32 %v4073_v44, %v4025_v36  ;;  %v4372_v36 = vadd.f32 %v4371_v40, %v7237_v16  ;;  %v4394_v44 = vmul.f32 %v7237_v16, %v7237_v16 }
 0x389   :  { %v4093_v43 = vadd.f32 %v4092_v27, %v7283_v38  ;;  %v4115_v60 = vmul.f32 %v7283_v38, %v7283_v38  ;;  %v4393_v27 = vmul.f32 %v7225_v46, %v7225_v46 }
 0x38b   :  { %v4130_v17 = vadd.f32 %v4129_v30, %v4115_v60  ;;  %v4407_v30 = vadd.f32 %v4406_v0, %v4392_v57  ;;  %v4373_v60 = vadd.f32 %v4372_v36, %v7247_v24 }
 0x38c   :  { %v7322_v58 = vpop.f32.mrf.mxu1 }
 0x38d   :  { %v4374_v49 = vadd.f32 %v4373_v60, %v7259_v26 }
 0x38e   :  { %v4075_v62 = vpop.f32.mrf.mxu0 }
 0x38f   :  { %v7291_v51 = vadd.f32 %v4075_v62, %v4027_v34  ;;  %v4375_v63 = vadd.f32 %v4374_v49, %v7267_v35 }
 0x391   :  { %v4094_v25 = vadd.f32 %v4093_v43, %v7291_v51  ;;  %v4116_v47 = vmul.f32 %v7291_v51, %v7291_v51  ;;  %v4408_v43 = vadd.f32 %v4407_v30, %v4393_v27  ;;  %v4376_v52 = vadd.f32 %v4375_v63, %v7275_v53 }
 0x392   :  { %v4400_v30 = vmul.f32 %v7305_v18, %v7305_v18 }
 0x393   :  { %v4095_v22 = vrot.slane %v4094_v25, 4  ;;  %v4131_v7 = vadd.f32 %v4130_v17, %v4116_v47  ;;  %v4395_v17 = vmul.f32 %v7247_v24, %v7247_v24  ;;  %v4409_v2 = vadd.f32 %v4408_v43, %v4394_v44 }
 0x395   :  { %v4096_v3 = vadd.f32 %v4095_v22, %v4094_v25  ;;  %v4132_v37 = vrot.slane %v4131_v7, 4  ;;  %v4396_v25 = vmul.f32 %v7259_v26, %v7259_v26  ;;  %v4410_v5 = vadd.f32 %v4409_v2, %v4395_v17 }
 0x397   :  { %v4097_v1 = vrot.slane %v4096_v3, 2  ;;  %v4133_v9 = vadd.f32 %v4132_v37, %v4131_v7  ;;  %v4411_v56 = vadd.f32 %v4410_v5, %v4396_v25 }
 0x399   :  { %v4098_v39 = vadd.f32 %v4097_v1, %v4096_v3  ;;  %v4134_v31 = vrot.slane %v4133_v9, 2  ;;  %v4398_v3 = vmul.f32 %v7275_v53, %v7275_v53 }
 0x39b   :  { %v4099_v50 = vrot.slane %v4098_v39, 1  ;;  %v4135_v61 = vadd.f32 %v4134_v31, %v4133_v9 }
 0x39d   :  { %v4100_v34 = vadd.f32 %v4099_v50, %v4098_v39  ;;  %v4136_v62 = vrot.slane %v4135_v61, 1  ;;  %v7359_v39 = vpop.f32.mrf.mxu1 }
 0x39e   :  { %v4402_v50 = vmul.f32 %v7359_v39, %v7359_v39 }
 0x39f   :  { %v4137_v47 = vadd.f32 %v4136_v62, %v4135_v61  ;;  %v7327_v15 = vmul.f32 0.0078125, %v4100_v34 }
 0x3a1   :  { %v4139_v22 = vmul.f32 0.0078125, %v4137_v47  ;;  %v4140_v7 = vmul.f32 %v7327_v15, %v7327_v15  ;;  %v4149_v14 = vsub.f32 %v7220_v48, %v7327_v15  ;;  %v4150_v41 = vsub.f32 %v7231_v32, %v7327_v15 }
 0x3a2   :  { %v4151_v57 = vsub.f32 %v7239_v11, %v7327_v15  ;;  %v4152_v1 = vsub.f32 %v7245_v13, %v7327_v15  ;;  %v4153_v9 = vsub.f32 %v7253_v12, %v7327_v15  ;;  %v4154_v0 = vsub.f32 %v7261_v28, %v7327_v15 }
 0x3a3   :  { %v4141_v37 = vsub.f32 %v4139_v22, %v4140_v7  ;;  %v4155_v40 = vsub.f32 %v7269_v45, %v7327_v15  ;;  %v4156_v48 = vsub.f32 %v7277_v42, %v7327_v15  ;;  %v4157_v32 = vsub.f32 %v7283_v38, %v7327_v15 }
 0x3a4   :  { %v4158_v11 = vsub.f32 %v7291_v51, %v7327_v15  ;;  %v4412_v13 = vadd.f32 %v4411_v56, %v4397_v19  ;;  %v4399_v12 = vmul.f32 %v7285_v20, %v7285_v20  ;;  %v4377_v28 = vadd.f32 %v4376_v52, %v7285_v20 }
 0x3a5   :  { %v4142_v27 = vmax.f32 %v4141_v37, 0.0  ;;  %v4401_v51 = vmul.f32 %v7322_v58, %v7322_v58  ;;  %v7371_v60 = vpop.f32.mrf.mxu1  ;;  %v4143_v19 = vsub.f32 %v7176_v4, %v7327_v15  ;;  %v4145_v37 = vsub.f32 %v7186_v55, %v7327_v15 }
 0x3a6   :  { %v4413_v45 = vadd.f32 %v4412_v13, %v4398_v3  ;;  %v4378_v42 = vadd.f32 %v4377_v28, %v7305_v18  ;;  %v4403_v62 = vmul.f32 %v7371_v60, %v7371_v60  ;;  %v4144_v3 = vsub.f32 %v7181_v6, %v7327_v15 }
 0x3a7   :  { %v4159_v31 = vadd.f32 1e-05, %v4142_v27  ;;  %v4146_v27 = vsub.f32 %v7191_v21, %v7327_v15  ;;  %v4147_v13 = vsub.f32 %v7195_v54, %v7327_v15 }
 0x3a8   :  { %v4414_v38 = vadd.f32 %v4413_v45, %v4399_v12  ;;  %v4379_v36 = vadd.f32 %v4378_v42, %v7322_v58  ;;  %v4148_v12 = vsub.f32 %v7214_v23, %v7327_v15 }
 0x3a9   :  { %5371 = vrsqrt.f32 %v4159_v31  ;;  %vm4166_vm2 = vweird.f32 %v4159_v31 }
 0x3aa   :  { %v4415_v44 = vadd.f32 %v4414_v38, %v4400_v30  ;;  %v4380_v61 = vadd.f32 %v4379_v36, %v7359_v39 }
 0x3ac   :  { %v4416_v43 = vadd.f32 %v4415_v44, %v4401_v51  ;;  %v4381_v34 = vadd.f32 %v4380_v61, %v7371_v60 }
 0x3ae   :  { %v4417_v49 = vadd.f32 %v4416_v43, %v4402_v50  ;;  %v4382_v47 = vrot.slane %v4381_v34, 4 }
 0x3af   :  { %v5372_v17 = vpop.eup %5371 }
 0x3b0   :  { %v4161_v2 = vmul.f32 %v5372_v17, %v4159_v31  ;;  %v4418_v5 = vadd.f32 %v4417_v49, %v4403_v62  ;;  %vm4167_vm1 = vweird.f32 %v5372_v17  ;;  %v4383_v7 = vadd.f32 %v4382_v47, %v4381_v34 }
 0x3b1   :  { %vm4168_vm3 = vmor %vm4166_vm2, %vm4167_vm1 }
 0x3b2   :  { %v4162_v25 = vmul.f32 %v5372_v17, %v4161_v2  ;;  %v4419_v56 = vrot.slane %v4418_v5, 4  ;;  %v4384_v4 = vrot.slane %v4383_v7, 2 }
 0x3b4   :  { %v4163_v63 = vmul.f32 0.5, %v4162_v25  ;;  %v4420_v45 = vadd.f32 %v4419_v56, %v4418_v5  ;;  %v4385_v15 = vadd.f32 %v4384_v4, %v4383_v7  ;;  %v7408_v56 = vld [vmem:[%s7551_s4 + $0x3] ss:$0 sm:$0xff] }
 0x3b6   :  { %v4164_v22 = vsub.f32 1.5, %v4163_v63  ;;  %v4386_v62 = vrot.slane %v4385_v15, 1 }
 0x3b8   :  { %v4165_v52 = vmul.f32 %v5372_v17, %v4164_v22  ;;  %v4387_v49 = vadd.f32 %v4386_v62, %v4385_v15 }
 0x3ba   :  { %v4169_v28 = vsel %vm4168_vm3, %v5372_v17, %v4165_v52  ;;  %v4421_v17 = vrot.slane %v4420_v45, 2  ;;  %v7392_v5 = vmul.f32 0.0078125, %v4387_v49 }
 0x3bb   :  { %v4170_v31 = vmul.f32 %v4169_v28, %v4143_v19  ;;  %v4171_v30 = vmul.f32 %v4169_v28, %v4144_v3  ;;  %v4172_v42 = vmul.f32 %v4169_v28, %v4145_v37  ;;  %v4173_v6 = vmul.f32 %v4169_v28, %v4146_v27 }
 0x3bc   :  { %v4174_v38 = vmul.f32 %v4169_v28, %v4147_v13  ;;  %v4175_v51 = vmul.f32 %v4169_v28, %v4148_v12  ;;  %v4176_v55 = vmul.f32 %v4169_v28, %v4149_v14  ;;  %v4177_v36 = vmul.f32 %v4169_v28, %v4150_v41 }
 0x3bd   :  { %v4178_v44 = vmul.f32 %v4169_v28, %v4151_v57  ;;  %v4179_v21 = vmul.f32 %v4169_v28, %v4152_v1  ;;  %v4180_v50 = vmul.f32 %v4169_v28, %v4153_v9  ;;  %v4181_v61 = vmul.f32 %v4169_v28, %v4154_v0 }
 0x3be   :  { %v4182_v54 = vmul.f32 %v4169_v28, %v4155_v40  ;;  %v4183_v43 = vmul.f32 %v4169_v28, %v4156_v48  ;;  %v7388_v34 = vmul.f32 %v4169_v28, %v4157_v32  ;;  %v7390_v23 = vmul.f32 %v4169_v28, %v4158_v11  ;;  %v7399_v40 = vld [vmem:[%s7551_s4 + $0x2] ss:$0 sm:$0xff] }
 0x3bf   :  { %v4422_v2 = vadd.f32 %v4421_v17, %v4420_v45  ;;  %v4427_v41 = vmul.f32 %v7392_v5, %v7392_v5  ;;  %v4187_v11 = vmul.f32 %v7399_v40, %v4170_v31  ;;  %v4188_v63 = vmul.f32 %v7399_v40, %v4171_v30 }
 0x3c0   :  { %v4189_v22 = vmul.f32 %v7399_v40, %v4172_v42  ;;  %v4190_v7 = vmul.f32 %v7399_v40, %v4173_v6  ;;  %v4191_v52 = vmul.f32 %v7399_v40, %v4174_v38  ;;  %v4192_v3 = vmul.f32 %v7399_v40, %v4175_v51 }
 0x3c1   :  { %v4423_v25 = vrot.slane %v4422_v2, 1  ;;  %v7413_v37 = vmul.f32 %v7399_v40, %v4176_v55  ;;  %v7416_v27 = vmul.f32 %v7399_v40, %v4177_v36  ;;  %v7419_v13 = vmul.f32 %v7399_v40, %v4178_v44 }
 0x3c2   :  { %v7422_v12 = vmul.f32 %v7399_v40, %v4179_v21  ;;  %v7425_v4 = vmul.f32 %v7399_v40, %v4180_v50  ;;  %v7428_v45 = vmul.f32 %v7399_v40, %v4181_v61  ;;  %v7431_v31 = vmul.f32 %v7399_v40, %v4182_v54 }
 0x3c3   :  { %v4424_v47 = vadd.f32 %v4423_v25, %v4422_v2  ;;  %v4200_v30 = vmul.f32 %v7399_v40, %v4183_v43  ;;  %v7435_v42 = vadd.f32 %v7408_v56, %v4187_v11  ;;  %v7438_v6 = vadd.f32 %v7408_v56, %v4188_v63 }
 0x3c4   :  { %v4206_v51 = vadd.f32 %v7408_v56, %v4189_v22  ;;  %v4430_v55 = vsub.f32 %v7183_v33, %v7392_v5  ;;  %v4431_v36 = vsub.f32 %v7188_v8, %v7392_v5  ;;  %v4432_v44 = vsub.f32 %v7193_v10, %v7392_v5  ;;  %v7458_v8 = vld [vmem:[%s7551_s4 + $0x4] ss:$0 sm:$0xff] }
 0x3c5   :  { %v4426_v14 = vmul.f32 0.0078125, %v4424_v47  ;;  %v4207_v21 = vadd.f32 %v7408_v56, %v4190_v7  ;;  %v7449_v50 = vadd.f32 %v7408_v56, %v4191_v52  ;;  %v4433_v61 = vsub.f32 %v7197_v29, %v7392_v5 }
 0x3c6   :  { %v4434_v43 = vsub.f32 %v7202_v59, %v7392_v5  ;;  %v4209_v10 = vadd.f32 %v7408_v56, %v4192_v3  ;;  %v4435_v62 = vsub.f32 %v7225_v46, %v7392_v5  ;;  %v4443_v29 = vsub.f32 %v7322_v58, %v7392_v5 }
 0x3c7   :  { %v4428_v57 = vsub.f32 %v4426_v14, %v4427_v41  ;;  %v4217_v49 = vadd.f32 %v7408_v56, %v4200_v30  ;;  %v4436_v59 = vsub.f32 %v7237_v16, %v7392_v5  ;;  %v4437_v25 = vsub.f32 %v7247_v24, %v7392_v5  ;;  %v7480_v16 = vld [vmem:[%s7551_s4 + $0x5] ss:$0 sm:$0xff]  ;;  %s5412_s4 = smov [#allocation3]  }
 0x3c8   :  { %v4438_v14 = vsub.f32 %v7259_v26, %v7392_v5  ;;  %v4439_v41 = vsub.f32 %v7267_v35, %v7392_v5  ;;  %v4440_v24 = vsub.f32 %v7275_v53, %v7392_v5  ;;  %v4441_v26 = vsub.f32 %v7285_v20, %v7392_v5  ;;  %s4543_s28 = sshll.u32 %s5412_s4, 4  ;;  %s4544_s28 = int_to_ptr.vmem [resolvable:$true] %s4543_s28 }
 0x3c9   :  { %v4429_v1 = vmax.f32 %v4428_v57, 0.0  ;;  %v4444_v11 = vsub.f32 %v7359_v39, %v7392_v5  ;;  %v4445_v39 = vsub.f32 %v7371_v60, %v7392_v5 }
 0x3cb   :  { %v4446_v9 = vadd.f32 1e-05, %v4429_v1 }
 0x3cd   :  { %5373 = vrsqrt.f32 %v4446_v9  ;;  %vm4453_vm5 = vweird.f32 %v4446_v9 }
 0x3d3   :  { %v5374_v0 = vpop.eup %5373 }
 0x3d4   :  { %v4448_v48 = vmul.f32 %v5374_v0, %v4446_v9  ;;  %vm4454_vm4 = vweird.f32 %v5374_v0 }
 0x3d5   :  { %vm4455_vm6 = vmor %vm4453_vm5, %vm4454_vm4 }
 0x3d6   :  { %v4449_v32 = vmul.f32 %v5374_v0, %v4448_v48 }
 0x3d8   :  { %v4450_v19 = vmul.f32 0.5, %v4449_v32  ;;  %v4442_v32 = vsub.f32 %v7305_v18, %v7392_v5 }
 0x3da   :  { %v4451_v28 = vsub.f32 1.5, %v4450_v19 }
 0x3dc   :  { %v4452_v38 = vmul.f32 %v5374_v0, %v4451_v28 }
 0x3de   :  { %v4456_v54 = vsel %vm4455_vm6, %v5374_v0, %v4452_v38 }
 0x3df   :  { %v4457_v33 = vmul.f32 %v4456_v54, %v4430_v55  ;;  %v4458_v15 = vmul.f32 %v4456_v54, %v4431_v36  ;;  %v4459_v17 = vmul.f32 %v4456_v54, %v4432_v44  ;;  %v4460_v2 = vmul.f32 %v4456_v54, %v4433_v61 }
 0x3e0   :  { %v4461_v47 = vmul.f32 %v4456_v54, %v4434_v43  ;;  %v4462_v46 = vmul.f32 %v4456_v54, %v4435_v62  ;;  %v4470_v57 = vmul.f32 %v4456_v54, %v4443_v29  ;;  %v4463_v1 = vmul.f32 %v4456_v54, %v4436_v59 }
 0x3e1   :  { %v4474_v58 = vmul.f32 %v7458_v8, %v4457_v33  ;;  %v4475_v9 = vmul.f32 %v7458_v8, %v4458_v15  ;;  %v4476_v0 = vmul.f32 %v7458_v8, %v4459_v17  ;;  %v4464_v35 = vmul.f32 %v4456_v54, %v4437_v25 }
 0x3e2   :  { %v4477_v48 = vmul.f32 %v7458_v8, %v4460_v2  ;;  %v4465_v63 = vmul.f32 %v4456_v54, %v4438_v14  ;;  %v4478_v22 = vmul.f32 %v7458_v8, %v4461_v47  ;;  %v4466_v7 = vmul.f32 %v4456_v54, %v4439_v41 }
 0x3e3   :  { %v4467_v19 = vmul.f32 %v4456_v54, %v4440_v24  ;;  %v4479_v52 = vmul.f32 %v7458_v8, %v4462_v46  ;;  %v4487_v53 = vmul.f32 %v7458_v8, %v4470_v57  ;;  %v4480_v20 = vmul.f32 %v7458_v8, %v4463_v1 }
 0x3e4   :  { %v4491_v3 = vadd.f32 %v7480_v16, %v4474_v58  ;;  %v4492_v28 = vadd.f32 %v7480_v16, %v4475_v9  ;;  %v4493_v18 = vadd.f32 %v7480_v16, %v4476_v0  ;;  %v4468_v30 = vmul.f32 %v4456_v54, %v4441_v26 }
 0x3e5   :  { %v4481_v38 = vmul.f32 %v7458_v8, %v4464_v35  ;;  %v4494_v55 = vadd.f32 %v7480_v16, %v4477_v48  ;;  %v4469_v36 = vmul.f32 %v4456_v54, %v4442_v32  ;;  %v4471_v44 = vmul.f32 %v4456_v54, %v4444_v11 }
 0x3e6   :  { %v4482_v61 = vmul.f32 %v7458_v8, %v4465_v63  ;;  %v4495_v43 = vadd.f32 %v7480_v16, %v4478_v22  ;;  %v4483_v33 = vmul.f32 %v7458_v8, %v4466_v7  ;;  %v4484_v15 = vmul.f32 %v7458_v8, %v4467_v19 }
 0x3e7   :  { %v4496_v17 = vadd.f32 %v7480_v16, %v4479_v52  ;;  %v4504_v62 = vadd.f32 %v7480_v16, %v4487_v53  ;;  %v4497_v60 = vadd.f32 %v7480_v16, %v4480_v20  ;;  %v4507_v5 = vadd.f32 %v4491_v3, %v7435_v42 }
 0x3e8   :  { %v4508_v29 = vadd.f32 %v4492_v28, %v7438_v6  ;;  %v4509_v2 = vadd.f32 %v4493_v18, %v4206_v51  ;;  %v4472_v59 = vmul.f32 %v4456_v54, %v4445_v39  ;;  %v4485_v25 = vmul.f32 %v7458_v8, %v4468_v30 }
 0x3e9   :  { %v4498_v47 = vadd.f32 %v7480_v16, %v4481_v38  ;;  %v4510_v14 = vadd.f32 %v4494_v55, %v4207_v21  ;;  %v4210_v41 = vadd.f32 %v7408_v56, %v7413_v37  ;;  %v4486_v46 = vmul.f32 %v7458_v8, %v4469_v36  ;;  %4523 = vst [vmem:[#allocation3] sm:$0xff] %v4507_v5 }
 0x3ea   :  { %v4499_v57 = vadd.f32 %v7480_v16, %v4482_v61  ;;  %v4511_v1 = vadd.f32 %v4495_v43, %v7449_v50  ;;  %v4211_v42 = vadd.f32 %v7408_v56, %v7416_v27  ;;  %v4500_v6 = vadd.f32 %v7480_v16, %v4483_v33  ;;  %4524 = vst [vmem:[#allocation3 + $0x8] sm:$0xff] %v4508_v29 }
 0x3eb   :  { %v4512_v51 = vadd.f32 %v4496_v17, %v4209_v10  ;;  %v4520_v54 = vadd.f32 %v4504_v62, %v4217_v49  ;;  %v4212_v21 = vadd.f32 %v7408_v56, %v7419_v13  ;;  %v4488_v37 = vmul.f32 %v7458_v8, %v4471_v44  ;;  %4525 = vst [vmem:[#allocation3 + $0x10] sm:$0xff] %v4509_v2 }
 0x3ec   :  { %v4501_v58 = vadd.f32 %v7480_v16, %v4484_v15  ;;  %v4513_v9 = vadd.f32 %v4497_v60, %v4210_v41  ;;  %v4213_v50 = vadd.f32 %v7408_v56, %v7422_v12  ;;  %v4489_v0 = vmul.f32 %v7458_v8, %v4472_v59  ;;  %4526 = vst [vmem:[#allocation3 + $0x18] sm:$0xff] %v4510_v14 }
 0x3ed   :  { %v4502_v27 = vadd.f32 %v7480_v16, %v4485_v25  ;;  %v4514_v24 = vadd.f32 %v4498_v47, %v4211_v42  ;;  %v4201_v10 = vmul.f32 %v7399_v40, %v7388_v34  ;;  %v4214_v13 = vadd.f32 %v7408_v56, %v7425_v4  ;;  %4527 = vst [vmem:[#allocation3 + $0x20] sm:$0xff] %v4511_v1 }
 0x3ee   :  { %v4503_v49 = vadd.f32 %v7480_v16, %v4486_v46  ;;  %v4515_v26 = vadd.f32 %v4499_v57, %v4212_v21  ;;  %v4202_v35 = vmul.f32 %v7399_v40, %v7390_v23  ;;  %v4215_v12 = vadd.f32 %v7408_v56, %v7428_v45  ;;  %4528 = vst [vmem:[#allocation3 + $0x28] sm:$0xff] %v4512_v51 }
 0x3ef   :  { %v4516_v8 = vadd.f32 %v4500_v6, %v4213_v50  ;;  %v4216_v48 = vadd.f32 %v7408_v56, %v7431_v31  ;;  %v4505_v34 = vadd.f32 %v7480_v16, %v4488_v37  ;;  %v4517_v32 = vadd.f32 %v4501_v58, %v4214_v13  ;;  %4529 = vst [vmem:[#allocation3 + $0x30] sm:$0xff] %v4513_v9 }
 0x3f0   :  { %v4506_v4 = vadd.f32 %v7480_v16, %v4489_v0  ;;  %v4518_v11 = vadd.f32 %v4502_v27, %v4215_v12  ;;  %4530 = vst [vmem:[#allocation3 + $0x38] sm:$0xff] %v4514_v24  ;;  %v4218_v63 = vadd.f32 %v7408_v56, %v4201_v10  ;;  %v4219_v23 = vadd.f32 %v7408_v56, %v4202_v35 }
 0x3f1   :  { %v4519_v22 = vadd.f32 %v4503_v49, %v4216_v48  ;;  %4531 = vst [vmem:[#allocation3 + $0x40] sm:$0xff] %v4515_v26 }
 0x3f2   :  { %4532 = vst [vmem:[#allocation3 + $0x48] sm:$0xff] %v4516_v8  ;;  %v4521_v40 = vadd.f32 %v4505_v34, %v4218_v63  ;;  %v4522_v45 = vadd.f32 %v4506_v4, %v4219_v23 }
 0x3f3   :  { %4533 = vst [vmem:[#allocation3 + $0x50] sm:$0xff] %v4517_v32 }
 0x3f4   :  { %4534 = vst [vmem:[#allocation3 + $0x58] sm:$0xff] %v4518_v11 }
 0x3f5   :  { %4535 = vst [vmem:[#allocation3 + $0x60] sm:$0xff] %v4519_v22 }
 0x3f6   :  { %4536 = vst [vmem:[#allocation3 + $0x68] sm:$0xff] %v4520_v54 }
 0x3f7   :  { %4537 = vst [vmem:[#allocation3 + $0x70] sm:$0xff] %v4521_v40 }
 0x3f8   :  { %4538 = vst [vmem:[#allocation3 + $0x78] sm:$0xff] %v4522_v45 }
 0x3f9   :  { %4551 = dma.vmem_to_hbm [thread:$0]  %s4544_s28, 2048, %s4546_s6, [#allocation4], %s5413_s7, %s5413_s7, %s5414_s8  }
 0x3fa   :  { %5409 = dma.done.wait [#allocation4], 2048  }
 0x3fb   :  { %5410 = vsyncadd [#allocation4], 4294965248 }
 0x3fc   :  { %4556 = vsyncpa [#allocation4], 1 }

</bundles_post_ra>
